<compile_context>
chip_gen: v7x
topology: tpu7x:2x2x1
jax: 0.10.0
libtpu: 0.0.40
codegen_flags: <defaults>
</compile_context>

<pallas_src>
import functools

import jax
import jax.numpy as jnp
from jax.experimental import pallas as pl
from jax.experimental.pallas import tpu as pltpu

P = 128   # padded lane width used for input_size / emb_dim / hidden_size
BP = 8    # padded batch size (one full sublane group)


def seq2seq_kernel(x_ref, w512_ref, w128_ref, out_ref, *, target_len):
    T, Bp, Dp = x_ref.shape          # Dp == P
    p = Dp                           # all feature dims share the same padded width

    # ---- static, 8/128-aligned slices of the two packed parameter buffers ----
    enc_wih = w512_ref[0:p, :]                   # (P, 4P)
    enc_whh = w512_ref[p:2 * p, :]               # (P, 4P)
    dec_w = w512_ref[2 * p:4 * p, :]             # (2P, 4P) == [W_ih_dec ; W_hh_dec]
    enc_gb = w512_ref[4 * p:4 * p + 1, :]        # (1, 4P)  fused encoder gate bias
    dec_b = w512_ref[4 * p + 8:4 * p + 16, :]    # (Bp, 4P) pre-broadcast decoder bias
    emb_w = w128_ref[0:p, :]                     # (P, P)
    out_w = w128_ref[p:2 * p, :]                 # (P, P)
    out_b = w128_ref[2 * p:2 * p + 8, :]         # (Bp, P)  pre-broadcast output bias

    def sigmoid(v):
        # single EUP tanh + cheap VPU mul/add (no f32 divide on the VALU)
        return 0.5 * jnp.tanh(0.5 * v) + 0.5

    def gates_to_hc(gates, c):
        # PyTorch gate order i, f, g, o; each slice is a full 128-lane group.
        i = sigmoid(gates[:, 0:p])
        f = sigmoid(gates[:, p:2 * p])
        g = jnp.tanh(gates[:, 2 * p:3 * p])
        o = sigmoid(gates[:, 3 * p:4 * p])
        c_new = f * c + i * g
        h_new = o * jnp.tanh(c_new)
        return h_new, c_new

    # ---- encoder: input-side projections hoisted out of the recurrence ----
    x_all = x_ref[...].reshape(T * Bp, Dp)                               # (T*Bp, P)
    e_all = jnp.dot(x_all, emb_w, preferred_element_type=jnp.float32)    # embedding
    gx_all = jnp.dot(e_all, enc_wih,
                     preferred_element_type=jnp.float32) + enc_gb        # (T*Bp, 4P)

    h = jnp.zeros((Bp, p), jnp.float32)
    c = jnp.zeros((Bp, p), jnp.float32)
    for t in range(T):   # fully unrolled; only h@W_hh remains on the serial chain
        gates = gx_all[t * Bp:(t + 1) * Bp, :] + jnp.dot(
            h, enc_whh, preferred_element_type=jnp.float32)
        h, c = gates_to_hc(gates, c)

    # ---- decoder (autoregressive): one fused matmul per step ----
    y = x_ref[T - 1]                                                     # (Bp, P)
    for t in range(target_len):   # fully unrolled; static lane-dense stores
        gates = jnp.dot(jnp.concatenate([y, h], axis=1), dec_w,
                        preferred_element_type=jnp.float32) + dec_b
        h, c = gates_to_hc(gates, c)
        y = jnp.dot(h, out_w, preferred_element_type=jnp.float32) + out_b
        out_ref[t] = y


def _pad_gate_cols(w, H):
    """(rows, 4H) in PyTorch gate order i,f,g,o -> (rows, 4P); each gate block
    starts at a 128-lane boundary, padding columns are zero."""
    rows = w.shape[0]
    out = jnp.zeros((rows, 4 * P), jnp.float32)
    for g in range(4):
        out = out.at[:, g * P:g * P + H].set(w[:, g * H:(g + 1) * H])
    return out


def lstm_seq2seq_forward(x, params, target_len):
    """x: (seq_len, batch, input_size) float32 -> (target_len, batch, input_size)."""
    T, B, D = x.shape
    E = params["emb_w"].shape[0]
    H = params["enc_whh"].shape[1]
    assert B <= BP and max(D, E, H) <= P, "shapes exceed single-tile padding"
    f32 = jnp.float32

    # Encoder input path: pre-transpose and fold the embedding bias into a single
    # fused gate bias (exact: (x@We^T+be)@Wih^T + b == x@We^T@Wih^T + (be@Wih^T + b)).
    emb_w_t = params["emb_w"].T.astype(f32)                                  # (D, E)
    enc_wih_t = _pad_gate_cols(params["enc_wih"].T.astype(f32), H)           # (E, 4P)
    enc_whh_t = _pad_gate_cols(params["enc_whh"].T.astype(f32), H)           # (H, 4P)
    enc_gate_b = (params["emb_b"] @ params["enc_wih"].T
                  + params["enc_bih"] + params["enc_bhh"]).astype(f32)       # (4H,)
    enc_gate_b = _pad_gate_cols(enc_gate_b.reshape(1, 4 * H), H)             # (1, 4P)

    # Decoder: stacked [W_ih ; W_hh] for a single fused matmul per step.
    dec_wih_t = _pad_gate_cols(params["dec_wih"].T.astype(f32), H)           # (D, 4P)
    dec_whh_t = _pad_gate_cols(params["dec_whh"].T.astype(f32), H)           # (H, 4P)
    dec_b = _pad_gate_cols(
        (params["dec_bih"] + params["dec_bhh"]).reshape(1, 4 * H).astype(f32), H)

    out_w_t = params["out_w"].T.astype(f32)                                  # (H, D)
    out_b = params["out_b"].astype(f32)                                      # (D,)

    # Pack everything into two lane-dense buffers (3 input DMAs total).
    w512 = jnp.zeros((4 * P + 16, 4 * P), f32)
    w512 = w512.at[0:E, :].set(enc_wih_t)
    w512 = w512.at[P:P + H, :].set(enc_whh_t)
    w512 = w512.at[2 * P:2 * P + D, :].set(dec_wih_t)
    w512 = w512.at[3 * P:3 * P + H, :].set(dec_whh_t)
    w512 = w512.at[4 * P:4 * P + 1, :].set(enc_gate_b)
    w512 = w512.at[4 * P + 8:4 * P + 16, :].set(jnp.broadcast_to(dec_b, (8, 4 * P)))

    w128 = jnp.zeros((2 * P + 8, P), f32)
    w128 = w128.at[0:D, 0:E].set(emb_w_t)
    w128 = w128.at[P:P + H, 0:D].set(out_w_t)
    w128 = w128.at[2 * P:2 * P + 8, 0:D].set(
        jnp.broadcast_to(out_b.reshape(1, D), (8, D)))

    # Pad activations: batch -> full sublane group, features -> full lane width.
    x_p = jnp.zeros((T, BP, P), f32).at[:, :B, :D].set(x.astype(f32))

    kernel = functools.partial(seq2seq_kernel, target_len=target_len)
    vmem = pl.BlockSpec(memory_space=pltpu.MemorySpace.VMEM)
    out_p = pl.pallas_call(
        kernel,
        out_shape=jax.ShapeDtypeStruct((target_len, BP, P), f32),
        in_specs=[vmem, vmem, vmem],
        out_specs=vmem,
    )(x_p, w512, w128)
    return out_p[:, :B, :D]


# ------------------- pure-JAX reference (for verification) -------------------
def _ref_forward(x, params, target_len):
    T, B, D = x.shape
    H = params["enc_whh"].shape[1]

    def cell(x_t, h, c, wih, whh, bih, bhh):
        gates = x_t @ wih.T + bih + h @ whh.T + bhh
        i = jax.nn.sigmoid(gates[:, 0:H])
        f = jax.nn.sigmoid(gates[:, H:2 * H])
        g = jnp.tanh(gates[:, 2 * H:3 * H])
        o = jax.nn.sigmoid(gates[:, 3 * H:4 * H])
        c = f * c + i * g
        h = o * jnp.tanh(c)
        return h, c

    h = jnp.zeros((B, H), jnp.float32)
    c = jnp.zeros((B, H), jnp.float32)
    for t in range(T):
        e = x[t] @ params["emb_w"].T + params["emb_b"]
        h, c = cell(e, h, c, params["enc_wih"], params["enc_whh"],
                    params["enc_bih"], params["enc_bhh"])
    dec_in = x[-1]
    outs = []
    for _ in range(target_len):
        h, c = cell(dec_in, h, c, params["dec_wih"], params["dec_whh"],
                    params["dec_bih"], params["dec_bhh"])
        y = h @ params["out_w"].T + params["out_b"]
        outs.append(y)
        dec_in = y
    return jnp.stack(outs, axis=0)


if __name__ == "__main__":
    # Small shapes consistent with the module's forward semantics.
    seq_len, batch, input_size = 8, 2, 4
    emb_dim, hidden_size = 16, 32
    target_len = 6
    H = hidden_size

    key = jax.random.PRNGKey(0)
    keys = jax.random.split(key, 12)

    def init(k, shape, scale=0.1):
        return (scale * jax.random.normal(k, shape)).astype(jnp.float32)

    params = {
        # encoder embedding: nn.Linear(input_size, emb_dim)
        "emb_w": init(keys[0], (emb_dim, input_size)),
        "emb_b": init(keys[1], (emb_dim,)),
        # encoder LSTM(emb_dim -> hidden_size)
        "enc_wih": init(keys[2], (4 * H, emb_dim)),
        "enc_whh": init(keys[3], (4 * H, H)),
        "enc_bih": init(keys[4], (4 * H,)),
        "enc_bhh": init(keys[5], (4 * H,)),
        # decoder LSTM(input_size -> hidden_size)
        "dec_wih": init(keys[6], (4 * H, input_size)),
        "dec_whh": init(keys[7], (4 * H, H)),
        "dec_bih": init(keys[8], (4 * H,)),
        "dec_bhh": init(keys[9], (4 * H,)),
        # decoder output linear: nn.Linear(hidden_size, input_size)
        "out_w": init(keys[10], (input_size, H)),
        "out_b": init(keys[11], (input_size,)),
    }

    x = jax.random.normal(jax.random.PRNGKey(42), (seq_len, batch, input_size),
                          dtype=jnp.float32)

    out = lstm_seq2seq_forward(x, params, target_len)
    out = jax.block_until_ready(out)

    ref = _ref_forward(x, params, target_len)
    assert out.shape == (target_len, batch, input_size)
    assert jnp.allclose(out, ref, atol=1e-4, rtol=1e-4), "Pallas kernel mismatch vs reference"

    print("KERNEL_OK")
</pallas_src>

<mosaic_0001>
module attributes {stable_mosaic.version = 11 : i64} {
  func.func @seq2seq_kernel(%arg0: memref<8x8x128xf32, #tpu.memory_space<vmem>>, %arg1: memref<528x512xf32, #tpu.memory_space<vmem>>, %arg2: memref<264x128xf32, #tpu.memory_space<vmem>>, %arg3: memref<6x8x128xf32, #tpu.memory_space<vmem>>) attributes {dimension_semantics = [], scalar_prefetch = 0 : i64, scratch_operands = 0 : i64, tpu.core_type = #tpu.core_type<tc>} {
    %c0 = arith.constant 0 : index
    %c0_0 = arith.constant 0 : index
    %0 = vector.load %arg1[%c0, %c0_0] : memref<528x512xf32, #tpu.memory_space<vmem>>, vector<128x512xf32>
    %c128 = arith.constant 128 : index
    %c0_1 = arith.constant 0 : index
    %1 = vector.load %arg1[%c128, %c0_1] : memref<528x512xf32, #tpu.memory_space<vmem>>, vector<128x512xf32>
    %c256 = arith.constant 256 : index
    %c0_2 = arith.constant 0 : index
    %2 = vector.load %arg1[%c256, %c0_2] : memref<528x512xf32, #tpu.memory_space<vmem>>, vector<256x512xf32>
    %c512 = arith.constant 512 : index
    %c0_3 = arith.constant 0 : index
    %3 = vector.load %arg1[%c512, %c0_3] : memref<528x512xf32, #tpu.memory_space<vmem>>, vector<1x512xf32>
    %c520 = arith.constant 520 : index
    %c0_4 = arith.constant 0 : index
    %4 = vector.load %arg1[%c520, %c0_4] : memref<528x512xf32, #tpu.memory_space<vmem>>, vector<8x512xf32>
    %c0_5 = arith.constant 0 : index
    %c0_6 = arith.constant 0 : index
    %5 = vector.load %arg2[%c0_5, %c0_6] : memref<264x128xf32, #tpu.memory_space<vmem>>, vector<128x128xf32>
    %c128_7 = arith.constant 128 : index
    %c0_8 = arith.constant 0 : index
    %6 = vector.load %arg2[%c128_7, %c0_8] : memref<264x128xf32, #tpu.memory_space<vmem>>, vector<128x128xf32>
    %c256_9 = arith.constant 256 : index
    %c0_10 = arith.constant 0 : index
    %7 = vector.load %arg2[%c256_9, %c0_10] : memref<264x128xf32, #tpu.memory_space<vmem>>, vector<8x128xf32>
    %c0_11 = arith.constant 0 : index
    %c0_12 = arith.constant 0 : index
    %c0_13 = arith.constant 0 : index
    %8 = vector.load %arg0[%c0_11, %c0_12, %c0_13] : memref<8x8x128xf32, #tpu.memory_space<vmem>>, vector<8x8x128xf32>
    %9 = vector.shape_cast %8 : vector<8x8x128xf32> to vector<64x128xf32>
    %cst = arith.constant dense<0.000000e+00> : vector<64x128xf32>
    %10 = tpu.matmul %9, %5, %cst {dimension_numbers = #tpu.dot_dimension_numbers<[1], [0], [0], [1], [0, 0, 1, 1], [], []>} : vector<64x128xf32>, vector<128x128xf32>, vector<64x128xf32> -> vector<64x128xf32>
    %cst_14 = arith.constant dense<0.000000e+00> : vector<64x512xf32>
    %11 = tpu.matmul %10, %0, %cst_14 {dimension_numbers = #tpu.dot_dimension_numbers<[1], [0], [0], [1], [0, 0, 1, 1], [], []>} : vector<64x128xf32>, vector<128x512xf32>, vector<64x512xf32> -> vector<64x512xf32>
    %12 = vector.broadcast %3 : vector<1x512xf32> to vector<64x512xf32>
    %13 = arith.addf %11, %12 : vector<64x512xf32>
    %cst_15 = arith.constant 0.000000e+00 : f32
    %14 = vector.broadcast %cst_15 : f32 to vector<8x128xf32>
    %cst_16 = arith.constant 0.000000e+00 : f32
    %15 = vector.broadcast %cst_16 : f32 to vector<8x128xf32>
    %16 = vector.extract_strided_slice %13 {offsets = [0, 0], sizes = [8, 512], strides = [1, 1]} : vector<64x512xf32> to vector<8x512xf32>
    %cst_17 = arith.constant dense<0.000000e+00> : vector<8x512xf32>
    %17 = tpu.matmul %14, %1, %cst_17 {dimension_numbers = #tpu.dot_dimension_numbers<[1], [0], [0], [1], [0, 0, 1, 1], [], []>} : vector<8x128xf32>, vector<128x512xf32>, vector<8x512xf32> -> vector<8x512xf32>
    %18 = arith.addf %16, %17 : vector<8x512xf32>
    %19 = vector.extract_strided_slice %18 {offsets = [0, 0], sizes = [8, 128], strides = [1, 1]} : vector<8x512xf32> to vector<8x128xf32>
    %cst_18 = arith.constant 5.000000e-01 : f32
    %20 = vector.broadcast %cst_18 : f32 to vector<8x128xf32>
    %21 = arith.mulf %20, %19 : vector<8x128xf32>
    %22 = math.tanh %21 : vector<8x128xf32>
    %cst_19 = arith.constant 5.000000e-01 : f32
    %23 = vector.broadcast %cst_19 : f32 to vector<8x128xf32>
    %24 = arith.mulf %23, %22 : vector<8x128xf32>
    %cst_20 = arith.constant 5.000000e-01 : f32
    %25 = vector.broadcast %cst_20 : f32 to vector<8x128xf32>
    %26 = arith.addf %24, %25 : vector<8x128xf32>
    %27 = vector.extract_strided_slice %18 {offsets = [0, 128], sizes = [8, 128], strides = [1, 1]} : vector<8x512xf32> to vector<8x128xf32>
    %cst_21 = arith.constant 5.000000e-01 : f32
    %28 = vector.broadcast %cst_21 : f32 to vector<8x128xf32>
    %29 = arith.mulf %28, %27 : vector<8x128xf32>
    %30 = math.tanh %29 : vector<8x128xf32>
    %cst_22 = arith.constant 5.000000e-01 : f32
    %31 = vector.broadcast %cst_22 : f32 to vector<8x128xf32>
    %32 = arith.mulf %31, %30 : vector<8x128xf32>
    %cst_23 = arith.constant 5.000000e-01 : f32
    %33 = vector.broadcast %cst_23 : f32 to vector<8x128xf32>
    %34 = arith.addf %32, %33 : vector<8x128xf32>
    %35 = vector.extract_strided_slice %18 {offsets = [0, 256], sizes = [8, 128], strides = [1, 1]} : vector<8x512xf32> to vector<8x128xf32>
    %36 = math.tanh %35 : vector<8x128xf32>
    %37 = vector.extract_strided_slice %18 {offsets = [0, 384], sizes = [8, 128], strides = [1, 1]} : vector<8x512xf32> to vector<8x128xf32>
    %cst_24 = arith.constant 5.000000e-01 : f32
    %38 = vector.broadcast %cst_24 : f32 to vector<8x128xf32>
    %39 = arith.mulf %38, %37 : vector<8x128xf32>
    %40 = math.tanh %39 : vector<8x128xf32>
    %cst_25 = arith.constant 5.000000e-01 : f32
    %41 = vector.broadcast %cst_25 : f32 to vector<8x128xf32>
    %42 = arith.mulf %41, %40 : vector<8x128xf32>
    %cst_26 = arith.constant 5.000000e-01 : f32
    %43 = vector.broadcast %cst_26 : f32 to vector<8x128xf32>
    %44 = arith.addf %42, %43 : vector<8x128xf32>
    %45 = arith.mulf %34, %15 : vector<8x128xf32>
    %46 = arith.mulf %26, %36 : vector<8x128xf32>
    %47 = arith.addf %45, %46 : vector<8x128xf32>
    %48 = math.tanh %47 : vector<8x128xf32>
    %49 = arith.mulf %44, %48 : vector<8x128xf32>
    %50 = vector.extract_strided_slice %13 {offsets = [8, 0], sizes = [8, 512], strides = [1, 1]} : vector<64x512xf32> to vector<8x512xf32>
    %cst_27 = arith.constant dense<0.000000e+00> : vector<8x512xf32>
    %51 = tpu.matmul %49, %1, %cst_27 {dimension_numbers = #tpu.dot_dimension_numbers<[1], [0], [0], [1], [0, 0, 1, 1], [], []>} : vector<8x128xf32>, vector<128x512xf32>, vector<8x512xf32> -> vector<8x512xf32>
    %52 = arith.addf %50, %51 : vector<8x512xf32>
    %53 = vector.extract_strided_slice %52 {offsets = [0, 0], sizes = [8, 128], strides = [1, 1]} : vector<8x512xf32> to vector<8x128xf32>
    %cst_28 = arith.constant 5.000000e-01 : f32
    %54 = vector.broadcast %cst_28 : f32 to vector<8x128xf32>
    %55 = arith.mulf %54, %53 : vector<8x128xf32>
    %56 = math.tanh %55 : vector<8x128xf32>
    %cst_29 = arith.constant 5.000000e-01 : f32
    %57 = vector.broadcast %cst_29 : f32 to vector<8x128xf32>
    %58 = arith.mulf %57, %56 : vector<8x128xf32>
    %cst_30 = arith.constant 5.000000e-01 : f32
    %59 = vector.broadcast %cst_30 : f32 to vector<8x128xf32>
    %60 = arith.addf %58, %59 : vector<8x128xf32>
    %61 = vector.extract_strided_slice %52 {offsets = [0, 128], sizes = [8, 128], strides = [1, 1]} : vector<8x512xf32> to vector<8x128xf32>
    %cst_31 = arith.constant 5.000000e-01 : f32
    %62 = vector.broadcast %cst_31 : f32 to vector<8x128xf32>
    %63 = arith.mulf %62, %61 : vector<8x128xf32>
    %64 = math.tanh %63 : vector<8x128xf32>
    %cst_32 = arith.constant 5.000000e-01 : f32
    %65 = vector.broadcast %cst_32 : f32 to vector<8x128xf32>
    %66 = arith.mulf %65, %64 : vector<8x128xf32>
    %cst_33 = arith.constant 5.000000e-01 : f32
    %67 = vector.broadcast %cst_33 : f32 to vector<8x128xf32>
    %68 = arith.addf %66, %67 : vector<8x128xf32>
    %69 = vector.extract_strided_slice %52 {offsets = [0, 256], sizes = [8, 128], strides = [1, 1]} : vector<8x512xf32> to vector<8x128xf32>
    %70 = math.tanh %69 : vector<8x128xf32>
    %71 = vector.extract_strided_slice %52 {offsets = [0, 384], sizes = [8, 128], strides = [1, 1]} : vector<8x512xf32> to vector<8x128xf32>
    %cst_34 = arith.constant 5.000000e-01 : f32
    %72 = vector.broadcast %cst_34 : f32 to vector<8x128xf32>
    %73 = arith.mulf %72, %71 : vector<8x128xf32>
    %74 = math.tanh %73 : vector<8x128xf32>
    %cst_35 = arith.constant 5.000000e-01 : f32
    %75 = vector.broadcast %cst_35 : f32 to vector<8x128xf32>
    %76 = arith.mulf %75, %74 : vector<8x128xf32>
    %cst_36 = arith.constant 5.000000e-01 : f32
    %77 = vector.broadcast %cst_36 : f32 to vector<8x128xf32>
    %78 = arith.addf %76, %77 : vector<8x128xf32>
    %79 = arith.mulf %68, %47 : vector<8x128xf32>
    %80 = arith.mulf %60, %70 : vector<8x128xf32>
    %81 = arith.addf %79, %80 : vector<8x128xf32>
    %82 = math.tanh %81 : vector<8x128xf32>
    %83 = arith.mulf %78, %82 : vector<8x128xf32>
    %84 = vector.extract_strided_slice %13 {offsets = [16, 0], sizes = [8, 512], strides = [1, 1]} : vector<64x512xf32> to vector<8x512xf32>
    %cst_37 = arith.constant dense<0.000000e+00> : vector<8x512xf32>
    %85 = tpu.matmul %83, %1, %cst_37 {dimension_numbers = #tpu.dot_dimension_numbers<[1], [0], [0], [1], [0, 0, 1, 1], [], []>} : vector<8x128xf32>, vector<128x512xf32>, vector<8x512xf32> -> vector<8x512xf32>
    %86 = arith.addf %84, %85 : vector<8x512xf32>
    %87 = vector.extract_strided_slice %86 {offsets = [0, 0], sizes = [8, 128], strides = [1, 1]} : vector<8x512xf32> to vector<8x128xf32>
    %cst_38 = arith.constant 5.000000e-01 : f32
    %88 = vector.broadcast %cst_38 : f32 to vector<8x128xf32>
    %89 = arith.mulf %88, %87 : vector<8x128xf32>
    %90 = math.tanh %89 : vector<8x128xf32>
    %cst_39 = arith.constant 5.000000e-01 : f32
    %91 = vector.broadcast %cst_39 : f32 to vector<8x128xf32>
    %92 = arith.mulf %91, %90 : vector<8x128xf32>
    %cst_40 = arith.constant 5.000000e-01 : f32
    %93 = vector.broadcast %cst_40 : f32 to vector<8x128xf32>
    %94 = arith.addf %92, %93 : vector<8x128xf32>
    %95 = vector.extract_strided_slice %86 {offsets = [0, 128], sizes = [8, 128], strides = [1, 1]} : vector<8x512xf32> to vector<8x128xf32>
    %cst_41 = arith.constant 5.000000e-01 : f32
    %96 = vector.broadcast %cst_41 : f32 to vector<8x128xf32>
    %97 = arith.mulf %96, %95 : vector<8x128xf32>
    %98 = math.tanh %97 : vector<8x128xf32>
    %cst_42 = arith.constant 5.000000e-01 : f32
    %99 = vector.broadcast %cst_42 : f32 to vector<8x128xf32>
    %100 = arith.mulf %99, %98 : vector<8x128xf32>
    %cst_43 = arith.constant 5.000000e-01 : f32
    %101 = vector.broadcast %cst_43 : f32 to vector<8x128xf32>
    %102 = arith.addf %100, %101 : vector<8x128xf32>
    %103 = vector.extract_strided_slice %86 {offsets = [0, 256], sizes = [8, 128], strides = [1, 1]} : vector<8x512xf32> to vector<8x128xf32>
    %104 = math.tanh %103 : vector<8x128xf32>
    %105 = vector.extract_strided_slice %86 {offsets = [0, 384], sizes = [8, 128], strides = [1, 1]} : vector<8x512xf32> to vector<8x128xf32>
    %cst_44 = arith.constant 5.000000e-01 : f32
    %106 = vector.broadcast %cst_44 : f32 to vector<8x128xf32>
    %107 = arith.mulf %106, %105 : vector<8x128xf32>
    %108 = math.tanh %107 : vector<8x128xf32>
    %cst_45 = arith.constant 5.000000e-01 : f32
    %109 = vector.broadcast %cst_45 : f32 to vector<8x128xf32>
    %110 = arith.mulf %109, %108 : vector<8x128xf32>
    %cst_46 = arith.constant 5.000000e-01 : f32
    %111 = vector.broadcast %cst_46 : f32 to vector<8x128xf32>
    %112 = arith.addf %110, %111 : vector<8x128xf32>
    %113 = arith.mulf %102, %81 : vector<8x128xf32>
    %114 = arith.mulf %94, %104 : vector<8x128xf32>
    %115 = arith.addf %113, %114 : vector<8x128xf32>
    %116 = math.tanh %115 : vector<8x128xf32>
    %117 = arith.mulf %112, %116 : vector<8x128xf32>
    %118 = vector.extract_strided_slice %13 {offsets = [24, 0], sizes = [8, 512], strides = [1, 1]} : vector<64x512xf32> to vector<8x512xf32>
    %cst_47 = arith.constant dense<0.000000e+00> : vector<8x512xf32>
    %119 = tpu.matmul %117, %1, %cst_47 {dimension_numbers = #tpu.dot_dimension_numbers<[1], [0], [0], [1], [0, 0, 1, 1], [], []>} : vector<8x128xf32>, vector<128x512xf32>, vector<8x512xf32> -> vector<8x512xf32>
    %120 = arith.addf %118, %119 : vector<8x512xf32>
    %121 = vector.extract_strided_slice %120 {offsets = [0, 0], sizes = [8, 128], strides = [1, 1]} : vector<8x512xf32> to vector<8x128xf32>
    %cst_48 = arith.constant 5.000000e-01 : f32
    %122 = vector.broadcast %cst_48 : f32 to vector<8x128xf32>
    %123 = arith.mulf %122, %121 : vector<8x128xf32>
    %124 = math.tanh %123 : vector<8x128xf32>
    %cst_49 = arith.constant 5.000000e-01 : f32
    %125 = vector.broadcast %cst_49 : f32 to vector<8x128xf32>
    %126 = arith.mulf %125, %124 : vector<8x128xf32>
    %cst_50 = arith.constant 5.000000e-01 : f32
    %127 = vector.broadcast %cst_50 : f32 to vector<8x128xf32>
    %128 = arith.addf %126, %127 : vector<8x128xf32>
    %129 = vector.extract_strided_slice %120 {offsets = [0, 128], sizes = [8, 128], strides = [1, 1]} : vector<8x512xf32> to vector<8x128xf32>
    %cst_51 = arith.constant 5.000000e-01 : f32
    %130 = vector.broadcast %cst_51 : f32 to vector<8x128xf32>
    %131 = arith.mulf %130, %129 : vector<8x128xf32>
    %132 = math.tanh %131 : vector<8x128xf32>
    %cst_52 = arith.constant 5.000000e-01 : f32
    %133 = vector.broadcast %cst_52 : f32 to vector<8x128xf32>
    %134 = arith.mulf %133, %132 : vector<8x128xf32>
    %cst_53 = arith.constant 5.000000e-01 : f32
    %135 = vector.broadcast %cst_53 : f32 to vector<8x128xf32>
    %136 = arith.addf %134, %135 : vector<8x128xf32>
    %137 = vector.extract_strided_slice %120 {offsets = [0, 256], sizes = [8, 128], strides = [1, 1]} : vector<8x512xf32> to vector<8x128xf32>
    %138 = math.tanh %137 : vector<8x128xf32>
    %139 = vector.extract_strided_slice %120 {offsets = [0, 384], sizes = [8, 128], strides = [1, 1]} : vector<8x512xf32> to vector<8x128xf32>
    %cst_54 = arith.constant 5.000000e-01 : f32
    %140 = vector.broadcast %cst_54 : f32 to vector<8x128xf32>
    %141 = arith.mulf %140, %139 : vector<8x128xf32>
    %142 = math.tanh %141 : vector<8x128xf32>
    %cst_55 = arith.constant 5.000000e-01 : f32
    %143 = vector.broadcast %cst_55 : f32 to vector<8x128xf32>
    %144 = arith.mulf %143, %142 : vector<8x128xf32>
    %cst_56 = arith.constant 5.000000e-01 : f32
    %145 = vector.broadcast %cst_56 : f32 to vector<8x128xf32>
    %146 = arith.addf %144, %145 : vector<8x128xf32>
    %147 = arith.mulf %136, %115 : vector<8x128xf32>
    %148 = arith.mulf %128, %138 : vector<8x128xf32>
    %149 = arith.addf %147, %148 : vector<8x128xf32>
    %150 = math.tanh %149 : vector<8x128xf32>
    %151 = arith.mulf %146, %150 : vector<8x128xf32>
    %152 = vector.extract_strided_slice %13 {offsets = [32, 0], sizes = [8, 512], strides = [1, 1]} : vector<64x512xf32> to vector<8x512xf32>
    %cst_57 = arith.constant dense<0.000000e+00> : vector<8x512xf32>
    %153 = tpu.matmul %151, %1, %cst_57 {dimension_numbers = #tpu.dot_dimension_numbers<[1], [0], [0], [1], [0, 0, 1, 1], [], []>} : vector<8x128xf32>, vector<128x512xf32>, vector<8x512xf32> -> vector<8x512xf32>
    %154 = arith.addf %152, %153 : vector<8x512xf32>
    %155 = vector.extract_strided_slice %154 {offsets = [0, 0], sizes = [8, 128], strides = [1, 1]} : vector<8x512xf32> to vector<8x128xf32>
    %cst_58 = arith.constant 5.000000e-01 : f32
    %156 = vector.broadcast %cst_58 : f32 to vector<8x128xf32>
    %157 = arith.mulf %156, %155 : vector<8x128xf32>
    %158 = math.tanh %157 : vector<8x128xf32>
    %cst_59 = arith.constant 5.000000e-01 : f32
    %159 = vector.broadcast %cst_59 : f32 to vector<8x128xf32>
    %160 = arith.mulf %159, %158 : vector<8x128xf32>
    %cst_60 = arith.constant 5.000000e-01 : f32
    %161 = vector.broadcast %cst_60 : f32 to vector<8x128xf32>
    %162 = arith.addf %160, %161 : vector<8x128xf32>
    %163 = vector.extract_strided_slice %154 {offsets = [0, 128], sizes = [8, 128], strides = [1, 1]} : vector<8x512xf32> to vector<8x128xf32>
    %cst_61 = arith.constant 5.000000e-01 : f32
    %164 = vector.broadcast %cst_61 : f32 to vector<8x128xf32>
    %165 = arith.mulf %164, %163 : vector<8x128xf32>
    %166 = math.tanh %165 : vector<8x128xf32>
    %cst_62 = arith.constant 5.000000e-01 : f32
    %167 = vector.broadcast %cst_62 : f32 to vector<8x128xf32>
    %168 = arith.mulf %167, %166 : vector<8x128xf32>
    %cst_63 = arith.constant 5.000000e-01 : f32
    %169 = vector.broadcast %cst_63 : f32 to vector<8x128xf32>
    %170 = arith.addf %168, %169 : vector<8x128xf32>
    %171 = vector.extract_strided_slice %154 {offsets = [0, 256], sizes = [8, 128], strides = [1, 1]} : vector<8x512xf32> to vector<8x128xf32>
    %172 = math.tanh %171 : vector<8x128xf32>
    %173 = vector.extract_strided_slice %154 {offsets = [0, 384], sizes = [8, 128], strides = [1, 1]} : vector<8x512xf32> to vector<8x128xf32>
    %cst_64 = arith.constant 5.000000e-01 : f32
    %174 = vector.broadcast %cst_64 : f32 to vector<8x128xf32>
    %175 = arith.mulf %174, %173 : vector<8x128xf32>
    %176 = math.tanh %175 : vector<8x128xf32>
    %cst_65 = arith.constant 5.000000e-01 : f32
    %177 = vector.broadcast %cst_65 : f32 to vector<8x128xf32>
    %178 = arith.mulf %177, %176 : vector<8x128xf32>
    %cst_66 = arith.constant 5.000000e-01 : f32
    %179 = vector.broadcast %cst_66 : f32 to vector<8x128xf32>
    %180 = arith.addf %178, %179 : vector<8x128xf32>
    %181 = arith.mulf %170, %149 : vector<8x128xf32>
    %182 = arith.mulf %162, %172 : vector<8x128xf32>
    %183 = arith.addf %181, %182 : vector<8x128xf32>
    %184 = math.tanh %183 : vector<8x128xf32>
    %185 = arith.mulf %180, %184 : vector<8x128xf32>
    %186 = vector.extract_strided_slice %13 {offsets = [40, 0], sizes = [8, 512], strides = [1, 1]} : vector<64x512xf32> to vector<8x512xf32>
    %cst_67 = arith.constant dense<0.000000e+00> : vector<8x512xf32>
    %187 = tpu.matmul %185, %1, %cst_67 {dimension_numbers = #tpu.dot_dimension_numbers<[1], [0], [0], [1], [0, 0, 1, 1], [], []>} : vector<8x128xf32>, vector<128x512xf32>, vector<8x512xf32> -> vector<8x512xf32>
    %188 = arith.addf %186, %187 : vector<8x512xf32>
    %189 = vector.extract_strided_slice %188 {offsets = [0, 0], sizes = [8, 128], strides = [1, 1]} : vector<8x512xf32> to vector<8x128xf32>
    %cst_68 = arith.constant 5.000000e-01 : f32
    %190 = vector.broadcast %cst_68 : f32 to vector<8x128xf32>
    %191 = arith.mulf %190, %189 : vector<8x128xf32>
    %192 = math.tanh %191 : vector<8x128xf32>
    %cst_69 = arith.constant 5.000000e-01 : f32
    %193 = vector.broadcast %cst_69 : f32 to vector<8x128xf32>
    %194 = arith.mulf %193, %192 : vector<8x128xf32>
    %cst_70 = arith.constant 5.000000e-01 : f32
    %195 = vector.broadcast %cst_70 : f32 to vector<8x128xf32>
    %196 = arith.addf %194, %195 : vector<8x128xf32>
    %197 = vector.extract_strided_slice %188 {offsets = [0, 128], sizes = [8, 128], strides = [1, 1]} : vector<8x512xf32> to vector<8x128xf32>
    %cst_71 = arith.constant 5.000000e-01 : f32
    %198 = vector.broadcast %cst_71 : f32 to vector<8x128xf32>
    %199 = arith.mulf %198, %197 : vector<8x128xf32>
    %200 = math.tanh %199 : vector<8x128xf32>
    %cst_72 = arith.constant 5.000000e-01 : f32
    %201 = vector.broadcast %cst_72 : f32 to vector<8x128xf32>
    %202 = arith.mulf %201, %200 : vector<8x128xf32>
    %cst_73 = arith.constant 5.000000e-01 : f32
    %203 = vector.broadcast %cst_73 : f32 to vector<8x128xf32>
    %204 = arith.addf %202, %203 : vector<8x128xf32>
    %205 = vector.extract_strided_slice %188 {offsets = [0, 256], sizes = [8, 128], strides = [1, 1]} : vector<8x512xf32> to vector<8x128xf32>
    %206 = math.tanh %205 : vector<8x128xf32>
    %207 = vector.extract_strided_slice %188 {offsets = [0, 384], sizes = [8, 128], strides = [1, 1]} : vector<8x512xf32> to vector<8x128xf32>
    %cst_74 = arith.constant 5.000000e-01 : f32
    %208 = vector.broadcast %cst_74 : f32 to vector<8x128xf32>
    %209 = arith.mulf %208, %207 : vector<8x128xf32>
    %210 = math.tanh %209 : vector<8x128xf32>
    %cst_75 = arith.constant 5.000000e-01 : f32
    %211 = vector.broadcast %cst_75 : f32 to vector<8x128xf32>
    %212 = arith.mulf %211, %210 : vector<8x128xf32>
    %cst_76 = arith.constant 5.000000e-01 : f32
    %213 = vector.broadcast %cst_76 : f32 to vector<8x128xf32>
    %214 = arith.addf %212, %213 : vector<8x128xf32>
    %215 = arith.mulf %204, %183 : vector<8x128xf32>
    %216 = arith.mulf %196, %206 : vector<8x128xf32>
    %217 = arith.addf %215, %216 : vector<8x128xf32>
    %218 = math.tanh %217 : vector<8x128xf32>
    %219 = arith.mulf %214, %218 : vector<8x128xf32>
    %220 = vector.extract_strided_slice %13 {offsets = [48, 0], sizes = [8, 512], strides = [1, 1]} : vector<64x512xf32> to vector<8x512xf32>
    %cst_77 = arith.constant dense<0.000000e+00> : vector<8x512xf32>
    %221 = tpu.matmul %219, %1, %cst_77 {dimension_numbers = #tpu.dot_dimension_numbers<[1], [0], [0], [1], [0, 0, 1, 1], [], []>} : vector<8x128xf32>, vector<128x512xf32>, vector<8x512xf32> -> vector<8x512xf32>
    %222 = arith.addf %220, %221 : vector<8x512xf32>
    %223 = vector.extract_strided_slice %222 {offsets = [0, 0], sizes = [8, 128], strides = [1, 1]} : vector<8x512xf32> to vector<8x128xf32>
    %cst_78 = arith.constant 5.000000e-01 : f32
    %224 = vector.broadcast %cst_78 : f32 to vector<8x128xf32>
    %225 = arith.mulf %224, %223 : vector<8x128xf32>
    %226 = math.tanh %225 : vector<8x128xf32>
    %cst_79 = arith.constant 5.000000e-01 : f32
    %227 = vector.broadcast %cst_79 : f32 to vector<8x128xf32>
    %228 = arith.mulf %227, %226 : vector<8x128xf32>
    %cst_80 = arith.constant 5.000000e-01 : f32
    %229 = vector.broadcast %cst_80 : f32 to vector<8x128xf32>
    %230 = arith.addf %228, %229 : vector<8x128xf32>
    %231 = vector.extract_strided_slice %222 {offsets = [0, 128], sizes = [8, 128], strides = [1, 1]} : vector<8x512xf32> to vector<8x128xf32>
    %cst_81 = arith.constant 5.000000e-01 : f32
    %232 = vector.broadcast %cst_81 : f32 to vector<8x128xf32>
    %233 = arith.mulf %232, %231 : vector<8x128xf32>
    %234 = math.tanh %233 : vector<8x128xf32>
    %cst_82 = arith.constant 5.000000e-01 : f32
    %235 = vector.broadcast %cst_82 : f32 to vector<8x128xf32>
    %236 = arith.mulf %235, %234 : vector<8x128xf32>
    %cst_83 = arith.constant 5.000000e-01 : f32
    %237 = vector.broadcast %cst_83 : f32 to vector<8x128xf32>
    %238 = arith.addf %236, %237 : vector<8x128xf32>
    %239 = vector.extract_strided_slice %222 {offsets = [0, 256], sizes = [8, 128], strides = [1, 1]} : vector<8x512xf32> to vector<8x128xf32>
    %240 = math.tanh %239 : vector<8x128xf32>
    %241 = vector.extract_strided_slice %222 {offsets = [0, 384], sizes = [8, 128], strides = [1, 1]} : vector<8x512xf32> to vector<8x128xf32>
    %cst_84 = arith.constant 5.000000e-01 : f32
    %242 = vector.broadcast %cst_84 : f32 to vector<8x128xf32>
    %243 = arith.mulf %242, %241 : vector<8x128xf32>
    %244 = math.tanh %243 : vector<8x128xf32>
    %cst_85 = arith.constant 5.000000e-01 : f32
    %245 = vector.broadcast %cst_85 : f32 to vector<8x128xf32>
    %246 = arith.mulf %245, %244 : vector<8x128xf32>
    %cst_86 = arith.constant 5.000000e-01 : f32
    %247 = vector.broadcast %cst_86 : f32 to vector<8x128xf32>
    %248 = arith.addf %246, %247 : vector<8x128xf32>
    %249 = arith.mulf %238, %217 : vector<8x128xf32>
    %250 = arith.mulf %230, %240 : vector<8x128xf32>
    %251 = arith.addf %249, %250 : vector<8x128xf32>
    %252 = math.tanh %251 : vector<8x128xf32>
    %253 = arith.mulf %248, %252 : vector<8x128xf32>
    %254 = vector.extract_strided_slice %13 {offsets = [56, 0], sizes = [8, 512], strides = [1, 1]} : vector<64x512xf32> to vector<8x512xf32>
    %cst_87 = arith.constant dense<0.000000e+00> : vector<8x512xf32>
    %255 = tpu.matmul %253, %1, %cst_87 {dimension_numbers = #tpu.dot_dimension_numbers<[1], [0], [0], [1], [0, 0, 1, 1], [], []>} : vector<8x128xf32>, vector<128x512xf32>, vector<8x512xf32> -> vector<8x512xf32>
    %256 = arith.addf %254, %255 : vector<8x512xf32>
    %257 = vector.extract_strided_slice %256 {offsets = [0, 0], sizes = [8, 128], strides = [1, 1]} : vector<8x512xf32> to vector<8x128xf32>
    %cst_88 = arith.constant 5.000000e-01 : f32
    %258 = vector.broadcast %cst_88 : f32 to vector<8x128xf32>
    %259 = arith.mulf %258, %257 : vector<8x128xf32>
    %260 = math.tanh %259 : vector<8x128xf32>
    %cst_89 = arith.constant 5.000000e-01 : f32
    %261 = vector.broadcast %cst_89 : f32 to vector<8x128xf32>
    %262 = arith.mulf %261, %260 : vector<8x128xf32>
    %cst_90 = arith.constant 5.000000e-01 : f32
    %263 = vector.broadcast %cst_90 : f32 to vector<8x128xf32>
    %264 = arith.addf %262, %263 : vector<8x128xf32>
    %265 = vector.extract_strided_slice %256 {offsets = [0, 128], sizes = [8, 128], strides = [1, 1]} : vector<8x512xf32> to vector<8x128xf32>
    %cst_91 = arith.constant 5.000000e-01 : f32
    %266 = vector.broadcast %cst_91 : f32 to vector<8x128xf32>
    %267 = arith.mulf %266, %265 : vector<8x128xf32>
    %268 = math.tanh %267 : vector<8x128xf32>
    %cst_92 = arith.constant 5.000000e-01 : f32
    %269 = vector.broadcast %cst_92 : f32 to vector<8x128xf32>
    %270 = arith.mulf %269, %268 : vector<8x128xf32>
    %cst_93 = arith.constant 5.000000e-01 : f32
    %271 = vector.broadcast %cst_93 : f32 to vector<8x128xf32>
    %272 = arith.addf %270, %271 : vector<8x128xf32>
    %273 = vector.extract_strided_slice %256 {offsets = [0, 256], sizes = [8, 128], strides = [1, 1]} : vector<8x512xf32> to vector<8x128xf32>
    %274 = math.tanh %273 : vector<8x128xf32>
    %275 = vector.extract_strided_slice %256 {offsets = [0, 384], sizes = [8, 128], strides = [1, 1]} : vector<8x512xf32> to vector<8x128xf32>
    %cst_94 = arith.constant 5.000000e-01 : f32
    %276 = vector.broadcast %cst_94 : f32 to vector<8x128xf32>
    %277 = arith.mulf %276, %275 : vector<8x128xf32>
    %278 = math.tanh %277 : vector<8x128xf32>
    %cst_95 = arith.constant 5.000000e-01 : f32
    %279 = vector.broadcast %cst_95 : f32 to vector<8x128xf32>
    %280 = arith.mulf %279, %278 : vector<8x128xf32>
    %cst_96 = arith.constant 5.000000e-01 : f32
    %281 = vector.broadcast %cst_96 : f32 to vector<8x128xf32>
    %282 = arith.addf %280, %281 : vector<8x128xf32>
    %283 = arith.mulf %272, %251 : vector<8x128xf32>
    %284 = arith.mulf %264, %274 : vector<8x128xf32>
    %285 = arith.addf %283, %284 : vector<8x128xf32>
    %286 = math.tanh %285 : vector<8x128xf32>
    %287 = arith.mulf %282, %286 : vector<8x128xf32>
    %c7 = arith.constant 7 : index
    %c0_97 = arith.constant 0 : index
    %c0_98 = arith.constant 0 : index
    %288 = vector.load %arg0[%c7, %c0_97, %c0_98] : memref<8x8x128xf32, #tpu.memory_space<vmem>>, vector<1x8x128xf32>
    %289 = vector.shape_cast %288 : vector<1x8x128xf32> to vector<8x128xf32>
    %290 = tpu.concatenate %289, %287 in 1 : vector<8x128xf32>, vector<8x128xf32> -> vector<8x256xf32>
    %cst_99 = arith.constant dense<0.000000e+00> : vector<8x512xf32>
    %291 = tpu.matmul %290, %2, %cst_99 {dimension_numbers = #tpu.dot_dimension_numbers<[1], [0], [0], [1], [0, 0, 1, 1], [], []>} : vector<8x256xf32>, vector<256x512xf32>, vector<8x512xf32> -> vector<8x512xf32>
    %292 = arith.addf %291, %4 : vector<8x512xf32>
    %293 = vector.extract_strided_slice %292 {offsets = [0, 0], sizes = [8, 128], strides = [1, 1]} : vector<8x512xf32> to vector<8x128xf32>
    %cst_100 = arith.constant 5.000000e-01 : f32
    %294 = vector.broadcast %cst_100 : f32 to vector<8x128xf32>
    %295 = arith.mulf %294, %293 : vector<8x128xf32>
    %296 = math.tanh %295 : vector<8x128xf32>
    %cst_101 = arith.constant 5.000000e-01 : f32
    %297 = vector.broadcast %cst_101 : f32 to vector<8x128xf32>
    %298 = arith.mulf %297, %296 : vector<8x128xf32>
    %cst_102 = arith.constant 5.000000e-01 : f32
    %299 = vector.broadcast %cst_102 : f32 to vector<8x128xf32>
    %300 = arith.addf %298, %299 : vector<8x128xf32>
    %301 = vector.extract_strided_slice %292 {offsets = [0, 128], sizes = [8, 128], strides = [1, 1]} : vector<8x512xf32> to vector<8x128xf32>
    %cst_103 = arith.constant 5.000000e-01 : f32
    %302 = vector.broadcast %cst_103 : f32 to vector<8x128xf32>
    %303 = arith.mulf %302, %301 : vector<8x128xf32>
    %304 = math.tanh %303 : vector<8x128xf32>
    %cst_104 = arith.constant 5.000000e-01 : f32
    %305 = vector.broadcast %cst_104 : f32 to vector<8x128xf32>
    %306 = arith.mulf %305, %304 : vector<8x128xf32>
    %cst_105 = arith.constant 5.000000e-01 : f32
    %307 = vector.broadcast %cst_105 : f32 to vector<8x128xf32>
    %308 = arith.addf %306, %307 : vector<8x128xf32>
    %309 = vector.extract_strided_slice %292 {offsets = [0, 256], sizes = [8, 128], strides = [1, 1]} : vector<8x512xf32> to vector<8x128xf32>
    %310 = math.tanh %309 : vector<8x128xf32>
    %311 = vector.extract_strided_slice %292 {offsets = [0, 384], sizes = [8, 128], strides = [1, 1]} : vector<8x512xf32> to vector<8x128xf32>
    %cst_106 = arith.constant 5.000000e-01 : f32
    %312 = vector.broadcast %cst_106 : f32 to vector<8x128xf32>
    %313 = arith.mulf %312, %311 : vector<8x128xf32>
    %314 = math.tanh %313 : vector<8x128xf32>
    %cst_107 = arith.constant 5.000000e-01 : f32
    %315 = vector.broadcast %cst_107 : f32 to vector<8x128xf32>
    %316 = arith.mulf %315, %314 : vector<8x128xf32>
    %cst_108 = arith.constant 5.000000e-01 : f32
    %317 = vector.broadcast %cst_108 : f32 to vector<8x128xf32>
    %318 = arith.addf %316, %317 : vector<8x128xf32>
    %319 = arith.mulf %308, %285 : vector<8x128xf32>
    %320 = arith.mulf %300, %310 : vector<8x128xf32>
    %321 = arith.addf %319, %320 : vector<8x128xf32>
    %322 = math.tanh %321 : vector<8x128xf32>
    %323 = arith.mulf %318, %322 : vector<8x128xf32>
    %cst_109 = arith.constant dense<0.000000e+00> : vector<8x128xf32>
    %324 = tpu.matmul %323, %6, %cst_109 {dimension_numbers = #tpu.dot_dimension_numbers<[1], [0], [0], [1], [0, 0, 1, 1], [], []>} : vector<8x128xf32>, vector<128x128xf32>, vector<8x128xf32> -> vector<8x128xf32>
    %325 = arith.addf %324, %7 : vector<8x128xf32>
    %c0_110 = arith.constant 0 : index
    %c0_111 = arith.constant 0 : index
    %c0_112 = arith.constant 0 : index
    %326 = vector.load %arg3[%c0_110, %c0_111, %c0_112] : memref<6x8x128xf32, #tpu.memory_space<vmem>>, vector<1x8x128xf32>
    %327 = vector.shape_cast %326 : vector<1x8x128xf32> to vector<8x128xf32>
    %328 = vector.shape_cast %325 : vector<8x128xf32> to vector<1x8x128xf32>
    tpu.vector_store %arg3[%c0_110, %c0_111, %c0_112], %328 {strides = array<i32>} : memref<6x8x128xf32, #tpu.memory_space<vmem>>, vector<1x8x128xf32>,
    %329 = tpu.concatenate %325, %323 in 1 : vector<8x128xf32>, vector<8x128xf32> -> vector<8x256xf32>
    %cst_113 = arith.constant dense<0.000000e+00> : vector<8x512xf32>
    %330 = tpu.matmul %329, %2, %cst_113 {dimension_numbers = #tpu.dot_dimension_numbers<[1], [0], [0], [1], [0, 0, 1, 1], [], []>} : vector<8x256xf32>, vector<256x512xf32>, vector<8x512xf32> -> vector<8x512xf32>
    %331 = arith.addf %330, %4 : vector<8x512xf32>
    %332 = vector.extract_strided_slice %331 {offsets = [0, 0], sizes = [8, 128], strides = [1, 1]} : vector<8x512xf32> to vector<8x128xf32>
    %cst_114 = arith.constant 5.000000e-01 : f32
    %333 = vector.broadcast %cst_114 : f32 to vector<8x128xf32>
    %334 = arith.mulf %333, %332 : vector<8x128xf32>
    %335 = math.tanh %334 : vector<8x128xf32>
    %cst_115 = arith.constant 5.000000e-01 : f32
    %336 = vector.broadcast %cst_115 : f32 to vector<8x128xf32>
    %337 = arith.mulf %336, %335 : vector<8x128xf32>
    %cst_116 = arith.constant 5.000000e-01 : f32
    %338 = vector.broadcast %cst_116 : f32 to vector<8x128xf32>
    %339 = arith.addf %337, %338 : vector<8x128xf32>
    %340 = vector.extract_strided_slice %331 {offsets = [0, 128], sizes = [8, 128], strides = [1, 1]} : vector<8x512xf32> to vector<8x128xf32>
    %cst_117 = arith.constant 5.000000e-01 : f32
    %341 = vector.broadcast %cst_117 : f32 to vector<8x128xf32>
    %342 = arith.mulf %341, %340 : vector<8x128xf32>
    %343 = math.tanh %342 : vector<8x128xf32>
    %cst_118 = arith.constant 5.000000e-01 : f32
    %344 = vector.broadcast %cst_118 : f32 to vector<8x128xf32>
    %345 = arith.mulf %344, %343 : vector<8x128xf32>
    %cst_119 = arith.constant 5.000000e-01 : f32
    %346 = vector.broadcast %cst_119 : f32 to vector<8x128xf32>
    %347 = arith.addf %345, %346 : vector<8x128xf32>
    %348 = vector.extract_strided_slice %331 {offsets = [0, 256], sizes = [8, 128], strides = [1, 1]} : vector<8x512xf32> to vector<8x128xf32>
    %349 = math.tanh %348 : vector<8x128xf32>
    %350 = vector.extract_strided_slice %331 {offsets = [0, 384], sizes = [8, 128], strides = [1, 1]} : vector<8x512xf32> to vector<8x128xf32>
    %cst_120 = arith.constant 5.000000e-01 : f32
    %351 = vector.broadcast %cst_120 : f32 to vector<8x128xf32>
    %352 = arith.mulf %351, %350 : vector<8x128xf32>
    %353 = math.tanh %352 : vector<8x128xf32>
    %cst_121 = arith.constant 5.000000e-01 : f32
    %354 = vector.broadcast %cst_121 : f32 to vector<8x128xf32>
    %355 = arith.mulf %354, %353 : vector<8x128xf32>
    %cst_122 = arith.constant 5.000000e-01 : f32
    %356 = vector.broadcast %cst_122 : f32 to vector<8x128xf32>
    %357 = arith.addf %355, %356 : vector<8x128xf32>
    %358 = arith.mulf %347, %321 : vector<8x128xf32>
    %359 = arith.mulf %339, %349 : vector<8x128xf32>
    %360 = arith.addf %358, %359 : vector<8x128xf32>
    %361 = math.tanh %360 : vector<8x128xf32>
    %362 = arith.mulf %357, %361 : vector<8x128xf32>
    %cst_123 = arith.constant dense<0.000000e+00> : vector<8x128xf32>
    %363 = tpu.matmul %362, %6, %cst_123 {dimension_numbers = #tpu.dot_dimension_numbers<[1], [0], [0], [1], [0, 0, 1, 1], [], []>} : vector<8x128xf32>, vector<128x128xf32>, vector<8x128xf32> -> vector<8x128xf32>
    %364 = arith.addf %363, %7 : vector<8x128xf32>
    %c1 = arith.constant 1 : index
    %c0_124 = arith.constant 0 : index
    %c0_125 = arith.constant 0 : index
    %365 = vector.load %arg3[%c1, %c0_124, %c0_125] : memref<6x8x128xf32, #tpu.memory_space<vmem>>, vector<1x8x128xf32>
    %366 = vector.shape_cast %365 : vector<1x8x128xf32> to vector<8x128xf32>
    %367 = vector.shape_cast %364 : vector<8x128xf32> to vector<1x8x128xf32>
    tpu.vector_store %arg3[%c1, %c0_124, %c0_125], %367 {strides = array<i32>} : memref<6x8x128xf32, #tpu.memory_space<vmem>>, vector<1x8x128xf32>,
    %368 = tpu.concatenate %364, %362 in 1 : vector<8x128xf32>, vector<8x128xf32> -> vector<8x256xf32>
    %cst_126 = arith.constant dense<0.000000e+00> : vector<8x512xf32>
    %369 = tpu.matmul %368, %2, %cst_126 {dimension_numbers = #tpu.dot_dimension_numbers<[1], [0], [0], [1], [0, 0, 1, 1], [], []>} : vector<8x256xf32>, vector<256x512xf32>, vector<8x512xf32> -> vector<8x512xf32>
    %370 = arith.addf %369, %4 : vector<8x512xf32>
    %371 = vector.extract_strided_slice %370 {offsets = [0, 0], sizes = [8, 128], strides = [1, 1]} : vector<8x512xf32> to vector<8x128xf32>
    %cst_127 = arith.constant 5.000000e-01 : f32
    %372 = vector.broadcast %cst_127 : f32 to vector<8x128xf32>
    %373 = arith.mulf %372, %371 : vector<8x128xf32>
    %374 = math.tanh %373 : vector<8x128xf32>
    %cst_128 = arith.constant 5.000000e-01 : f32
    %375 = vector.broadcast %cst_128 : f32 to vector<8x128xf32>
    %376 = arith.mulf %375, %374 : vector<8x128xf32>
    %cst_129 = arith.constant 5.000000e-01 : f32
    %377 = vector.broadcast %cst_129 : f32 to vector<8x128xf32>
    %378 = arith.addf %376, %377 : vector<8x128xf32>
    %379 = vector.extract_strided_slice %370 {offsets = [0, 128], sizes = [8, 128], strides = [1, 1]} : vector<8x512xf32> to vector<8x128xf32>
    %cst_130 = arith.constant 5.000000e-01 : f32
    %380 = vector.broadcast %cst_130 : f32 to vector<8x128xf32>
    %381 = arith.mulf %380, %379 : vector<8x128xf32>
    %382 = math.tanh %381 : vector<8x128xf32>
    %cst_131 = arith.constant 5.000000e-01 : f32
    %383 = vector.broadcast %cst_131 : f32 to vector<8x128xf32>
    %384 = arith.mulf %383, %382 : vector<8x128xf32>
    %cst_132 = arith.constant 5.000000e-01 : f32
    %385 = vector.broadcast %cst_132 : f32 to vector<8x128xf32>
    %386 = arith.addf %384, %385 : vector<8x128xf32>
    %387 = vector.extract_strided_slice %370 {offsets = [0, 256], sizes = [8, 128], strides = [1, 1]} : vector<8x512xf32> to vector<8x128xf32>
    %388 = math.tanh %387 : vector<8x128xf32>
    %389 = vector.extract_strided_slice %370 {offsets = [0, 384], sizes = [8, 128], strides = [1, 1]} : vector<8x512xf32> to vector<8x128xf32>
    %cst_133 = arith.constant 5.000000e-01 : f32
    %390 = vector.broadcast %cst_133 : f32 to vector<8x128xf32>
    %391 = arith.mulf %390, %389 : vector<8x128xf32>
    %392 = math.tanh %391 : vector<8x128xf32>
    %cst_134 = arith.constant 5.000000e-01 : f32
    %393 = vector.broadcast %cst_134 : f32 to vector<8x128xf32>
    %394 = arith.mulf %393, %392 : vector<8x128xf32>
    %cst_135 = arith.constant 5.000000e-01 : f32
    %395 = vector.broadcast %cst_135 : f32 to vector<8x128xf32>
    %396 = arith.addf %394, %395 : vector<8x128xf32>
    %397 = arith.mulf %386, %360 : vector<8x128xf32>
    %398 = arith.mulf %378, %388 : vector<8x128xf32>
    %399 = arith.addf %397, %398 : vector<8x128xf32>
    %400 = math.tanh %399 : vector<8x128xf32>
    %401 = arith.mulf %396, %400 : vector<8x128xf32>
    %cst_136 = arith.constant dense<0.000000e+00> : vector<8x128xf32>
    %402 = tpu.matmul %401, %6, %cst_136 {dimension_numbers = #tpu.dot_dimension_numbers<[1], [0], [0], [1], [0, 0, 1, 1], [], []>} : vector<8x128xf32>, vector<128x128xf32>, vector<8x128xf32> -> vector<8x128xf32>
    %403 = arith.addf %402, %7 : vector<8x128xf32>
    %c2 = arith.constant 2 : index
    %c0_137 = arith.constant 0 : index
    %c0_138 = arith.constant 0 : index
    %404 = vector.load %arg3[%c2, %c0_137, %c0_138] : memref<6x8x128xf32, #tpu.memory_space<vmem>>, vector<1x8x128xf32>
    %405 = vector.shape_cast %404 : vector<1x8x128xf32> to vector<8x128xf32>
    %406 = vector.shape_cast %403 : vector<8x128xf32> to vector<1x8x128xf32>
    tpu.vector_store %arg3[%c2, %c0_137, %c0_138], %406 {strides = array<i32>} : memref<6x8x128xf32, #tpu.memory_space<vmem>>, vector<1x8x128xf32>,
    %407 = tpu.concatenate %403, %401 in 1 : vector<8x128xf32>, vector<8x128xf32> -> vector<8x256xf32>
    %cst_139 = arith.constant dense<0.000000e+00> : vector<8x512xf32>
    %408 = tpu.matmul %407, %2, %cst_139 {dimension_numbers = #tpu.dot_dimension_numbers<[1], [0], [0], [1], [0, 0, 1, 1], [], []>} : vector<8x256xf32>, vector<256x512xf32>, vector<8x512xf32> -> vector<8x512xf32>
    %409 = arith.addf %408, %4 : vector<8x512xf32>
    %410 = vector.extract_strided_slice %409 {offsets = [0, 0], sizes = [8, 128], strides = [1, 1]} : vector<8x512xf32> to vector<8x128xf32>
    %cst_140 = arith.constant 5.000000e-01 : f32
    %411 = vector.broadcast %cst_140 : f32 to vector<8x128xf32>
    %412 = arith.mulf %411, %410 : vector<8x128xf32>
    %413 = math.tanh %412 : vector<8x128xf32>
    %cst_141 = arith.constant 5.000000e-01 : f32
    %414 = vector.broadcast %cst_141 : f32 to vector<8x128xf32>
    %415 = arith.mulf %414, %413 : vector<8x128xf32>
    %cst_142 = arith.constant 5.000000e-01 : f32
    %416 = vector.broadcast %cst_142 : f32 to vector<8x128xf32>
    %417 = arith.addf %415, %416 : vector<8x128xf32>
    %418 = vector.extract_strided_slice %409 {offsets = [0, 128], sizes = [8, 128], strides = [1, 1]} : vector<8x512xf32> to vector<8x128xf32>
    %cst_143 = arith.constant 5.000000e-01 : f32
    %419 = vector.broadcast %cst_143 : f32 to vector<8x128xf32>
    %420 = arith.mulf %419, %418 : vector<8x128xf32>
    %421 = math.tanh %420 : vector<8x128xf32>
    %cst_144 = arith.constant 5.000000e-01 : f32
    %422 = vector.broadcast %cst_144 : f32 to vector<8x128xf32>
    %423 = arith.mulf %422, %421 : vector<8x128xf32>
    %cst_145 = arith.constant 5.000000e-01 : f32
    %424 = vector.broadcast %cst_145 : f32 to vector<8x128xf32>
    %425 = arith.addf %423, %424 : vector<8x128xf32>
    %426 = vector.extract_strided_slice %409 {offsets = [0, 256], sizes = [8, 128], strides = [1, 1]} : vector<8x512xf32> to vector<8x128xf32>
    %427 = math.tanh %426 : vector<8x128xf32>
    %428 = vector.extract_strided_slice %409 {offsets = [0, 384], sizes = [8, 128], strides = [1, 1]} : vector<8x512xf32> to vector<8x128xf32>
    %cst_146 = arith.constant 5.000000e-01 : f32
    %429 = vector.broadcast %cst_146 : f32 to vector<8x128xf32>
    %430 = arith.mulf %429, %428 : vector<8x128xf32>
    %431 = math.tanh %430 : vector<8x128xf32>
    %cst_147 = arith.constant 5.000000e-01 : f32
    %432 = vector.broadcast %cst_147 : f32 to vector<8x128xf32>
    %433 = arith.mulf %432, %431 : vector<8x128xf32>
    %cst_148 = arith.constant 5.000000e-01 : f32
    %434 = vector.broadcast %cst_148 : f32 to vector<8x128xf32>
    %435 = arith.addf %433, %434 : vector<8x128xf32>
    %436 = arith.mulf %425, %399 : vector<8x128xf32>
    %437 = arith.mulf %417, %427 : vector<8x128xf32>
    %438 = arith.addf %436, %437 : vector<8x128xf32>
    %439 = math.tanh %438 : vector<8x128xf32>
    %440 = arith.mulf %435, %439 : vector<8x128xf32>
    %cst_149 = arith.constant dense<0.000000e+00> : vector<8x128xf32>
    %441 = tpu.matmul %440, %6, %cst_149 {dimension_numbers = #tpu.dot_dimension_numbers<[1], [0], [0], [1], [0, 0, 1, 1], [], []>} : vector<8x128xf32>, vector<128x128xf32>, vector<8x128xf32> -> vector<8x128xf32>
    %442 = arith.addf %441, %7 : vector<8x128xf32>
    %c3 = arith.constant 3 : index
    %c0_150 = arith.constant 0 : index
    %c0_151 = arith.constant 0 : index
    %443 = vector.load %arg3[%c3, %c0_150, %c0_151] : memref<6x8x128xf32, #tpu.memory_space<vmem>>, vector<1x8x128xf32>
    %444 = vector.shape_cast %443 : vector<1x8x128xf32> to vector<8x128xf32>
    %445 = vector.shape_cast %442 : vector<8x128xf32> to vector<1x8x128xf32>
    tpu.vector_store %arg3[%c3, %c0_150, %c0_151], %445 {strides = array<i32>} : memref<6x8x128xf32, #tpu.memory_space<vmem>>, vector<1x8x128xf32>,
    %446 = tpu.concatenate %442, %440 in 1 : vector<8x128xf32>, vector<8x128xf32> -> vector<8x256xf32>
    %cst_152 = arith.constant dense<0.000000e+00> : vector<8x512xf32>
    %447 = tpu.matmul %446, %2, %cst_152 {dimension_numbers = #tpu.dot_dimension_numbers<[1], [0], [0], [1], [0, 0, 1, 1], [], []>} : vector<8x256xf32>, vector<256x512xf32>, vector<8x512xf32> -> vector<8x512xf32>
    %448 = arith.addf %447, %4 : vector<8x512xf32>
    %449 = vector.extract_strided_slice %448 {offsets = [0, 0], sizes = [8, 128], strides = [1, 1]} : vector<8x512xf32> to vector<8x128xf32>
    %cst_153 = arith.constant 5.000000e-01 : f32
    %450 = vector.broadcast %cst_153 : f32 to vector<8x128xf32>
    %451 = arith.mulf %450, %449 : vector<8x128xf32>
    %452 = math.tanh %451 : vector<8x128xf32>
    %cst_154 = arith.constant 5.000000e-01 : f32
    %453 = vector.broadcast %cst_154 : f32 to vector<8x128xf32>
    %454 = arith.mulf %453, %452 : vector<8x128xf32>
    %cst_155 = arith.constant 5.000000e-01 : f32
    %455 = vector.broadcast %cst_155 : f32 to vector<8x128xf32>
    %456 = arith.addf %454, %455 : vector<8x128xf32>
    %457 = vector.extract_strided_slice %448 {offsets = [0, 128], sizes = [8, 128], strides = [1, 1]} : vector<8x512xf32> to vector<8x128xf32>
    %cst_156 = arith.constant 5.000000e-01 : f32
    %458 = vector.broadcast %cst_156 : f32 to vector<8x128xf32>
    %459 = arith.mulf %458, %457 : vector<8x128xf32>
    %460 = math.tanh %459 : vector<8x128xf32>
    %cst_157 = arith.constant 5.000000e-01 : f32
    %461 = vector.broadcast %cst_157 : f32 to vector<8x128xf32>
    %462 = arith.mulf %461, %460 : vector<8x128xf32>
    %cst_158 = arith.constant 5.000000e-01 : f32
    %463 = vector.broadcast %cst_158 : f32 to vector<8x128xf32>
    %464 = arith.addf %462, %463 : vector<8x128xf32>
    %465 = vector.extract_strided_slice %448 {offsets = [0, 256], sizes = [8, 128], strides = [1, 1]} : vector<8x512xf32> to vector<8x128xf32>
    %466 = math.tanh %465 : vector<8x128xf32>
    %467 = vector.extract_strided_slice %448 {offsets = [0, 384], sizes = [8, 128], strides = [1, 1]} : vector<8x512xf32> to vector<8x128xf32>
    %cst_159 = arith.constant 5.000000e-01 : f32
    %468 = vector.broadcast %cst_159 : f32 to vector<8x128xf32>
    %469 = arith.mulf %468, %467 : vector<8x128xf32>
    %470 = math.tanh %469 : vector<8x128xf32>
    %cst_160 = arith.constant 5.000000e-01 : f32
    %471 = vector.broadcast %cst_160 : f32 to vector<8x128xf32>
    %472 = arith.mulf %471, %470 : vector<8x128xf32>
    %cst_161 = arith.constant 5.000000e-01 : f32
    %473 = vector.broadcast %cst_161 : f32 to vector<8x128xf32>
    %474 = arith.addf %472, %473 : vector<8x128xf32>
    %475 = arith.mulf %464, %438 : vector<8x128xf32>
    %476 = arith.mulf %456, %466 : vector<8x128xf32>
    %477 = arith.addf %475, %476 : vector<8x128xf32>
    %478 = math.tanh %477 : vector<8x128xf32>
    %479 = arith.mulf %474, %478 : vector<8x128xf32>
    %cst_162 = arith.constant dense<0.000000e+00> : vector<8x128xf32>
    %480 = tpu.matmul %479, %6, %cst_162 {dimension_numbers = #tpu.dot_dimension_numbers<[1], [0], [0], [1], [0, 0, 1, 1], [], []>} : vector<8x128xf32>, vector<128x128xf32>, vector<8x128xf32> -> vector<8x128xf32>
    %481 = arith.addf %480, %7 : vector<8x128xf32>
    %c4 = arith.constant 4 : index
    %c0_163 = arith.constant 0 : index
    %c0_164 = arith.constant 0 : index
    %482 = vector.load %arg3[%c4, %c0_163, %c0_164] : memref<6x8x128xf32, #tpu.memory_space<vmem>>, vector<1x8x128xf32>
    %483 = vector.shape_cast %482 : vector<1x8x128xf32> to vector<8x128xf32>
    %484 = vector.shape_cast %481 : vector<8x128xf32> to vector<1x8x128xf32>
    tpu.vector_store %arg3[%c4, %c0_163, %c0_164], %484 {strides = array<i32>} : memref<6x8x128xf32, #tpu.memory_space<vmem>>, vector<1x8x128xf32>,
    %485 = tpu.concatenate %481, %479 in 1 : vector<8x128xf32>, vector<8x128xf32> -> vector<8x256xf32>
    %cst_165 = arith.constant dense<0.000000e+00> : vector<8x512xf32>
    %486 = tpu.matmul %485, %2, %cst_165 {dimension_numbers = #tpu.dot_dimension_numbers<[1], [0], [0], [1], [0, 0, 1, 1], [], []>} : vector<8x256xf32>, vector<256x512xf32>, vector<8x512xf32> -> vector<8x512xf32>
    %487 = arith.addf %486, %4 : vector<8x512xf32>
    %488 = vector.extract_strided_slice %487 {offsets = [0, 0], sizes = [8, 128], strides = [1, 1]} : vector<8x512xf32> to vector<8x128xf32>
    %cst_166 = arith.constant 5.000000e-01 : f32
    %489 = vector.broadcast %cst_166 : f32 to vector<8x128xf32>
    %490 = arith.mulf %489, %488 : vector<8x128xf32>
    %491 = math.tanh %490 : vector<8x128xf32>
    %cst_167 = arith.constant 5.000000e-01 : f32
    %492 = vector.broadcast %cst_167 : f32 to vector<8x128xf32>
    %493 = arith.mulf %492, %491 : vector<8x128xf32>
    %cst_168 = arith.constant 5.000000e-01 : f32
    %494 = vector.broadcast %cst_168 : f32 to vector<8x128xf32>
    %495 = arith.addf %493, %494 : vector<8x128xf32>
    %496 = vector.extract_strided_slice %487 {offsets = [0, 128], sizes = [8, 128], strides = [1, 1]} : vector<8x512xf32> to vector<8x128xf32>
    %cst_169 = arith.constant 5.000000e-01 : f32
    %497 = vector.broadcast %cst_169 : f32 to vector<8x128xf32>
    %498 = arith.mulf %497, %496 : vector<8x128xf32>
    %499 = math.tanh %498 : vector<8x128xf32>
    %cst_170 = arith.constant 5.000000e-01 : f32
    %500 = vector.broadcast %cst_170 : f32 to vector<8x128xf32>
    %501 = arith.mulf %500, %499 : vector<8x128xf32>
    %cst_171 = arith.constant 5.000000e-01 : f32
    %502 = vector.broadcast %cst_171 : f32 to vector<8x128xf32>
    %503 = arith.addf %501, %502 : vector<8x128xf32>
    %504 = vector.extract_strided_slice %487 {offsets = [0, 256], sizes = [8, 128], strides = [1, 1]} : vector<8x512xf32> to vector<8x128xf32>
    %505 = math.tanh %504 : vector<8x128xf32>
    %506 = vector.extract_strided_slice %487 {offsets = [0, 384], sizes = [8, 128], strides = [1, 1]} : vector<8x512xf32> to vector<8x128xf32>
    %cst_172 = arith.constant 5.000000e-01 : f32
    %507 = vector.broadcast %cst_172 : f32 to vector<8x128xf32>
    %508 = arith.mulf %507, %506 : vector<8x128xf32>
    %509 = math.tanh %508 : vector<8x128xf32>
    %cst_173 = arith.constant 5.000000e-01 : f32
    %510 = vector.broadcast %cst_173 : f32 to vector<8x128xf32>
    %511 = arith.mulf %510, %509 : vector<8x128xf32>
    %cst_174 = arith.constant 5.000000e-01 : f32
    %512 = vector.broadcast %cst_174 : f32 to vector<8x128xf32>
    %513 = arith.addf %511, %512 : vector<8x128xf32>
    %514 = arith.mulf %503, %477 : vector<8x128xf32>
    %515 = arith.mulf %495, %505 : vector<8x128xf32>
    %516 = arith.addf %514, %515 : vector<8x128xf32>
    %517 = math.tanh %516 : vector<8x128xf32>
    %518 = arith.mulf %513, %517 : vector<8x128xf32>
    %cst_175 = arith.constant dense<0.000000e+00> : vector<8x128xf32>
    %519 = tpu.matmul %518, %6, %cst_175 {dimension_numbers = #tpu.dot_dimension_numbers<[1], [0], [0], [1], [0, 0, 1, 1], [], []>} : vector<8x128xf32>, vector<128x128xf32>, vector<8x128xf32> -> vector<8x128xf32>
    %520 = arith.addf %519, %7 : vector<8x128xf32>
    %c5 = arith.constant 5 : index
    %c0_176 = arith.constant 0 : index
    %c0_177 = arith.constant 0 : index
    %521 = vector.load %arg3[%c5, %c0_176, %c0_177] : memref<6x8x128xf32, #tpu.memory_space<vmem>>, vector<1x8x128xf32>
    %522 = vector.shape_cast %521 : vector<1x8x128xf32> to vector<8x128xf32>
    %523 = vector.shape_cast %520 : vector<8x128xf32> to vector<1x8x128xf32>
    tpu.vector_store %arg3[%c5, %c0_176, %c0_177], %523 {strides = array<i32>} : memref<6x8x128xf32, #tpu.memory_space<vmem>>, vector<1x8x128xf32>,
    return
  }
}

</mosaic_0001>

<bundles_post_ra>
// kernel: tpu_custom_call.1
= control target key start
LH: loop header
LB: loop body
LE: loop exit
PB: predicated region body
PF: predicated region fallthrough
CT: control target
= control target key end

     0   :  { %8 = vsyncpa [#allocation3], 0  ;;  %s6861_s0 = inlined_call_operand.hbm [shape: f32[8,8,128], index: 0, kind: input, shape index: {}]   ;;  %s6862_s1 = inlined_call_operand.hbm [shape: f32[528,512], index: 1, kind: input, shape index: {}]   ;;  %s6863_s2 = inlined_call_operand.hbm [shape: f32[264,128], index: 2, kind: input, shape index: {}]   ;;  %s6864_s3 = inlined_call_operand.hbm [shape: f32[6,8,128], index: 3, kind: output, shape index: {}]  }
   0x1   :  { %9 = vsyncpa [#allocation6], 0 }
   0x2   :  { %10 = vsyncpa [#allocation4], 0  ;;  %s5648_s12 = smov [#allocation5]   ;;  %s5554_s16 = scalar_lea.hbm %s6862_s1, 33792 }
   0x3   :  { %s28_s13 = sshll.u32 %s5648_s12, 4  ;;  %p5555_p0 = scmp.ne.s32.totalorder %s6862_s1, %s5554_s16  ;;  %s29_s13 = int_to_ptr.vmem [resolvable:$true] %s28_s13 }
   0x4   :  { %p5558_p1 = scmp.lt.u32.totalorder %s5554_s16, %s6862_s1 }
   0x6   :  { %p5560_p2 = pnand %p5558_p1, %p5555_p0 }
   0x8   :  { %5563 = shalt.err (!%p5560_p2)
}
   0x9   :  { %s5564_s21 = scalar_lea.vmem %s29_s13, 33792  ;;  %p5569_p4 = scmp.lt.s32.totalorder %s29_s13, %s29_s13 }
   0xa   :  { %p5565_p3 = scmp.ne.s32.totalorder %s29_s13, %s5564_s21  ;;  %p5570_p5 = scmp.lt.s32.totalorder %s5564_s21, %s5564_s21 }
   0xc   :  { %p5571_p6 = por %p5570_p5, %p5569_p4 }
   0xe   :  { %p5572_p7 = pnand %p5571_p6, %p5565_p3 }
  0x10   :  { %5575 = shalt.err (!%p5572_p7)
}
  0x11   :  { %s5649_s22 = smov 512   ;;  %s5650_s23 = smov 32  }
  0x12   :  { %34 = dma.hbm_to_vmem [thread:$0]  %s6862_s1, 33792, %s29_s13, [#allocation6], %s5649_s22, %s5649_s22, %s5650_s23  }
  0x13   :  { %s5651_s26 = smov [#allocation2]   ;;  %s5576_s30 = scalar_lea.hbm %s6861_s0, 1024 }
  0x14   :  { %s16_s27 = sshll.u32 %s5651_s26, 4  ;;  %p5577_p8 = scmp.ne.s32.totalorder %s6861_s0, %s5576_s30  ;;  %s17_s27 = int_to_ptr.vmem [resolvable:$true] %s16_s27 }
  0x15   :  { %p5580_p9 = scmp.lt.u32.totalorder %s5576_s30, %s6861_s0 }
  0x17   :  { %p5582_p10 = pnand %p5580_p9, %p5577_p8 }
  0x19   :  { %5585 = shalt.err (!%p5582_p10)
}
  0x1a   :  { %s5586_s8 = scalar_lea.vmem %s17_s27, 1024  ;;  %p5591_p12 = scmp.lt.s32.totalorder %s17_s27, %s17_s27 }
  0x1b   :  { %p5587_p11 = scmp.ne.s32.totalorder %s17_s27, %s5586_s8  ;;  %p5592_p13 = scmp.lt.s32.totalorder %s5586_s8, %s5586_s8 }
  0x1d   :  { %p5593_p0 = por %p5592_p13, %p5591_p12 }
  0x1f   :  { %p5594_p1 = pnand %p5593_p0, %p5587_p11 }
  0x21   :  { %5597 = shalt.err (!%p5594_p1)
}
  0x22   :  { %s5652_s1 = smov 128   ;;  %s5653_s9 = smov 8  }
  0x23   :  { %22 = dma.hbm_to_vmem [thread:$0]  %s6861_s0, 1024, %s17_s27, [#allocation3], %s5652_s1, %s5652_s1, %s5653_s9  }
  0x24   :  { %s5654_s12 = smov [#allocation7]   ;;  %s5598_s16 = scalar_lea.hbm %s6863_s2, 4224 }
  0x25   :  { %s40_s13 = sshll.u32 %s5654_s12, 4  ;;  %p5599_p2 = scmp.ne.s32.totalorder %s6863_s2, %s5598_s16  ;;  %s41_s13 = int_to_ptr.vmem [resolvable:$true] %s40_s13 }
  0x26   :  { %p5602_p3 = scmp.lt.u32.totalorder %s5598_s16, %s6863_s2 }
  0x28   :  { %p5604_p4 = pnand %p5602_p3, %p5599_p2 }
  0x2a   :  { %5607 = shalt.err (!%p5604_p4)
}
  0x2b   :  { %s5608_s21 = scalar_lea.vmem %s41_s13, 4224  ;;  %p5613_p6 = scmp.lt.s32.totalorder %s41_s13, %s41_s13 }
  0x2c   :  { %p5609_p5 = scmp.ne.s32.totalorder %s41_s13, %s5608_s21  ;;  %p5614_p7 = scmp.lt.s32.totalorder %s5608_s21, %s5608_s21 }
  0x2e   :  { %p5615_p8 = por %p5614_p7, %p5613_p6 }
  0x30   :  { %p5616_p9 = pnand %p5615_p8, %p5609_p5 }
  0x32   :  { %5619 = shalt.err (!%p5616_p9)
}
  0x33   :  { %46 = dma.hbm_to_vmem [thread:$0]  %s6863_s2, 4224, %s41_s13, [#allocation6], %s5652_s1, %s5652_s1, %s5653_s9  }
  0x34   :  { %5642 = dma.done.wait [#allocation3], 1024  }
  0x35   :  { %5643 = vsyncadd [#allocation3], 4294966272 }
  0x36   :  { %5644 = dma.done.wait [#allocation6], 38016  }
  0x37   :  { %5645 = vsyncadd [#allocation6], 4294929280  ;;  %v318_v0 = vld [vmem:[#allocation7] sm:$0xff]  ;;  %v319_v1 = vld [vmem:[#allocation7 + $0x8] sm:$0xff]  ;;  %vm5657_vm0 = vmmov 0   ;;  %s5658_s2 = smov [#allocation8]  }
  0x38   :  { %v320_v2 = vld [vmem:[#allocation7 + $0x10] sm:$0xff]  ;;  %v3814_v3 = vpack.c.bf16 %v319_v1, %v318_v0  ;;  %v321_v4 = vld [vmem:[#allocation7 + $0x18] sm:$0xff]  ;;  %v322_v6 = vld [vmem:[#allocation7 + $0x20] sm:$0xff]  ;;  %s3421_s23 = sshll.u32 %s5658_s2, 4  ;;  %s3422_s23 = int_to_ptr.vmem [resolvable:$true] %s3421_s23 }
  0x39   :  { %v3818_v5 = vpack.c.bf16 %v321_v4, %v320_v2  ;;  %v323_v7 = vld [vmem:[#allocation7 + $0x28] sm:$0xff]  ;;  %v351_v9 = vld [vmem:[#allocation2] sm:$0xff]  ;;  %v324_v10 = vld [vmem:[#allocation7 + $0x30] sm:$0xff]  ;;  %s5620_s24 = scalar_lea.vmem %s3422_s23, 768  ;;  %p5625_p11 = scmp.lt.s32.totalorder %s3422_s23, %s3422_s23 }
  0x3a   :  { %3815 = vmatprep.subr.bf16.mxu0 %v3814_v3  ;;  %v3822_v8 = vpack.c.bf16 %v323_v7, %v322_v6  ;;  %v325_v11 = vld [vmem:[#allocation7 + $0x38] sm:$0xff]  ;;  %3592 = vmatprep.mubr.f32.mxu0 %v351_v9  ;;  %v57_v12 = vld [vmem:[#allocation5 + $0x8] sm:$0xff]  ;;  %v56_v14 = vld [vmem:[#allocation5] sm:$0xff]  ;;  %p5621_p10 = scmp.ne.s32.totalorder %s3422_s23, %s5620_s24  ;;  %p5626_p12 = scmp.lt.s32.totalorder %s5620_s24, %s5620_s24 }
  0x3b   :  { %3817 = vmatpush3.bf16.msra.mxu0 %v3814_v3  ;;  %v61_v13 = vld [vmem:[#allocation5 + $0x28] sm:$0xff]  ;;  %v3826_v15 = vpack.c.bf16 %v325_v11, %v324_v10  ;;  %v60_v17 = vld [vmem:[#allocation5 + $0x20] sm:$0xff]  ;;  %v328_v28 = vld [vmem:[#allocation7 + $0x50] sm:$0xff] }
  0x3c   :  { %3819 = vmatprep.subr.bf16.mxu0 %v3818_v5  ;;  %v3846_v16 = vpack.c.bf16 %v61_v13, %v57_v12  ;;  %v326_v18 = vld [vmem:[#allocation7 + $0x40] sm:$0xff]  ;;  %v327_v19 = vld [vmem:[#allocation7 + $0x48] sm:$0xff]  ;;  %v3848_v20 = vpack.c.bf16 %v60_v17, %v56_v14  ;;  %v329_v31 = vld [vmem:[#allocation7 + $0x58] sm:$0xff]  ;;  %p5627_p13 = por %p5626_p12, %p5625_p11 }
  0x3d   :  { %v65_v21 = vld [vmem:[#allocation5 + $0x48] sm:$0xff]  ;;  %v64_v23 = vld [vmem:[#allocation5 + $0x40] sm:$0xff]  ;;  %v3830_v27 = vpack.c.bf16 %v327_v19, %v326_v18  ;;  %v3834_v38 = vpack.c.bf16 %v329_v31, %v328_v28  ;;  %v332_v48 = vld [vmem:[#allocation7 + $0x70] sm:$0xff] }
  0x3e   :  { %3847 = vmatprep.subr.bf16.mxu1 %v3846_v16  ;;  %v69_v22 = vld [vmem:[#allocation5 + $0x68] sm:$0xff]  ;;  %v68_v24 = vld [vmem:[#allocation5 + $0x60] sm:$0xff]  ;;  %v333_v52 = vld [vmem:[#allocation7 + $0x78] sm:$0xff]  ;;  %p5628_p0 = pnand %p5627_p13, %p5621_p10 }
  0x3f   :  { %3821 = vmatpush3.bf16.msra.mxu0 %v3818_v5  ;;  %3849 = vmatpush1.bf16.msra.mxu1 %v3848_v20  ;;  %v3850_v25 = vpack.c.bf16 %v69_v22, %v65_v21  ;;  %v3852_v26 = vpack.c.bf16 %v68_v24, %v64_v23  ;;  %v73_v29 = vld [vmem:[#allocation5 + $0x88] sm:$0xff]  ;;  %v72_v33 = vld [vmem:[#allocation5 + $0x80] sm:$0xff]  ;;  %v3842_v56 = vpack.c.bf16 %v333_v52, %v332_v48  ;;  %v59_v57 = vld [vmem:[#allocation5 + $0x18] sm:$0xff] }
  0x40   :  { %3823 = vmatprep.subr.bf16.mxu0 %v3822_v8  ;;  %v77_v30 = vld [vmem:[#allocation5 + $0xa8] sm:$0xff]  ;;  %v76_v34 = vld [vmem:[#allocation5 + $0xa0] sm:$0xff]  ;;  %v63_v61 = vld [vmem:[#allocation5 + $0x38] sm:$0xff] }
  0x41   :  { %3851 = vmatprep.subr.bf16.mxu1 %v3850_v25  ;;  %v3854_v32 = vpack.c.bf16 %v77_v30, %v73_v29  ;;  %v3856_v35 = vpack.c.bf16 %v76_v34, %v72_v33  ;;  %v81_v36 = vld [vmem:[#allocation5 + $0xc8] sm:$0xff]  ;;  %v80_v40 = vld [vmem:[#allocation5 + $0xc0] sm:$0xff]  ;;  %v3878_v1 = vpack.c.bf16 %v63_v61, %v59_v57  ;;  %v58_v2 = vld [vmem:[#allocation5 + $0x10] sm:$0xff] }
  0x42   :  { %v85_v37 = vld [vmem:[#allocation5 + $0xe8] sm:$0xff]  ;;  %v84_v41 = vld [vmem:[#allocation5 + $0xe0] sm:$0xff]  ;;  %v62_v3 = vld [vmem:[#allocation5 + $0x30] sm:$0xff] }
  0x43   :  { %3825 = vmatpush3.bf16.msra.mxu0 %v3822_v8  ;;  %3853 = vmatpush1.bf16.msra.mxu1 %v3852_v26  ;;  %v3858_v39 = vpack.c.bf16 %v85_v37, %v81_v36  ;;  %v330_v42 = vld [vmem:[#allocation7 + $0x60] sm:$0xff]  ;;  %v331_v43 = vld [vmem:[#allocation7 + $0x68] sm:$0xff]  ;;  %v3860_v46 = vpack.c.bf16 %v84_v41, %v80_v40  ;;  %v67_v4 = vld [vmem:[#allocation5 + $0x58] sm:$0xff]  ;;  %v3880_v13 = vpack.c.bf16 %v62_v3, %v58_v2 }
  0x44   :  { %3827 = vmatprep.subr.bf16.mxu0 %v3826_v15  ;;  %3855 = vmatprep.subr.bf16.mxu1 %v3854_v32  ;;  %v89_v44 = vld [vmem:[#allocation5 + $0x108] sm:$0xff]  ;;  %v3838_v47 = vpack.c.bf16 %v331_v43, %v330_v42  ;;  %v88_v50 = vld [vmem:[#allocation5 + $0x100] sm:$0xff]  ;;  %v71_v6 = vld [vmem:[#allocation5 + $0x78] sm:$0xff] }
  0x45   :  { %v93_v45 = vld [vmem:[#allocation5 + $0x128] sm:$0xff]  ;;  %v92_v51 = vld [vmem:[#allocation5 + $0x120] sm:$0xff]  ;;  %v353_v12 = vld [vmem:[#allocation2 + $0x10] sm:$0xff]  ;;  %v3882_v14 = vpack.c.bf16 %v71_v6, %v67_v4 }
  0x46   :  { %v3862_v49 = vpack.c.bf16 %v93_v45, %v89_v44  ;;  %v97_v53 = vld [vmem:[#allocation5 + $0x148] sm:$0xff]  ;;  %v3864_v55 = vpack.c.bf16 %v92_v51, %v88_v50  ;;  %v96_v59 = vld [vmem:[#allocation5 + $0x140] sm:$0xff]  ;;  %v70_v16 = vld [vmem:[#allocation5 + $0x70] sm:$0xff] }
  0x47   :  { %3829 = vmatpush3.bf16.msra.mxu0 %v3826_v15  ;;  %3857 = vmatpush1.bf16.msra.mxu1 %v3856_v35  ;;  %v101_v54 = vld [vmem:[#allocation5 + $0x168] sm:$0xff]  ;;  %v100_v60 = vld [vmem:[#allocation5 + $0x160] sm:$0xff]  ;;  %v66_v15 = vld [vmem:[#allocation5 + $0x50] sm:$0xff] }
  0x48   :  { %3831 = vmatprep.subr.bf16.mxu0 %v3830_v27  ;;  %3859 = vmatprep.subr.bf16.mxu1 %v3858_v39  ;;  %v3866_v58 = vpack.c.bf16 %v101_v54, %v97_v53  ;;  %v105_v62 = vld [vmem:[#allocation5 + $0x188] sm:$0xff]  ;;  %v3868_v0 = vpack.c.bf16 %v100_v60, %v96_v59  ;;  %v104_v7 = vld [vmem:[#allocation5 + $0x180] sm:$0xff]  ;;  %v75_v17 = vld [vmem:[#allocation5 + $0x98] sm:$0xff]  ;;  %v3884_v24 = vpack.c.bf16 %v70_v16, %v66_v15 }
  0x49   :  { %v109_v63 = vld [vmem:[#allocation5 + $0x1a8] sm:$0xff]  ;;  %v108_v8 = vld [vmem:[#allocation5 + $0x1a0] sm:$0xff]  ;;  %v79_v19 = vld [vmem:[#allocation5 + $0xb8] sm:$0xff] }
  0x4a   :  { %v3870_v5 = vpack.c.bf16 %v109_v63, %v105_v62  ;;  %v113_v9 = vld [vmem:[#allocation5 + $0x1c8] sm:$0xff]  ;;  %v3872_v18 = vpack.c.bf16 %v108_v8, %v104_v7  ;;  %v112_v21 = vld [vmem:[#allocation5 + $0x1c0] sm:$0xff]  ;;  %v354_v23 = vld [vmem:[#allocation2 + $0x18] sm:$0xff]  ;;  %v3886_v26 = vpack.c.bf16 %v79_v19, %v75_v17 }
  0x4b   :  { %3833 = vmatpush3.bf16.msra.mxu0 %v3830_v27  ;;  %3861 = vmatpush1.bf16.msra.mxu1 %v3860_v46  ;;  %v117_v10 = vld [vmem:[#allocation5 + $0x1e8] sm:$0xff]  ;;  %v116_v22 = vld [vmem:[#allocation5 + $0x1e0] sm:$0xff]  ;;  %v74_v27 = vld [vmem:[#allocation5 + $0x90] sm:$0xff] }
  0x4c   :  { %3835 = vmatprep.subr.bf16.mxu0 %v3834_v38  ;;  %3863 = vmatprep.subr.bf16.mxu1 %v3862_v49  ;;  %v352_v11 = vld [vmem:[#allocation2 + $0x8] sm:$0xff]  ;;  %v3874_v20 = vpack.c.bf16 %v117_v10, %v113_v9  ;;  %v355_v25 = vld [vmem:[#allocation2 + $0x20] sm:$0xff]  ;;  %v78_v28 = vld [vmem:[#allocation5 + $0xb0] sm:$0xff]  ;;  %v3876_v29 = vpack.c.bf16 %v116_v22, %v112_v21 }
  0x4d   :  { %v83_v30 = vld [vmem:[#allocation5 + $0xd8] sm:$0xff]  ;;  %v356_v32 = vld [vmem:[#allocation2 + $0x28] sm:$0xff]  ;;  %v3888_v33 = vpack.c.bf16 %v78_v28, %v74_v27  ;;  %v357_v34 = vld [vmem:[#allocation2 + $0x30] sm:$0xff] }
  0x4e   :  { %v87_v31 = vld [vmem:[#allocation5 + $0xf8] sm:$0xff]  ;;  %v82_v36 = vld [vmem:[#allocation5 + $0xd0] sm:$0xff]  ;;  %v120_v7 = vld [vmem:[#allocation5 + $0x200] sm:$0xff] }
  0x4f   :  { %3837 = vmatpush3.bf16.msra.mxu0 %v3834_v38  ;;  %3865 = vmatpush1.bf16.msra.mxu1 %v3864_v55  ;;  %v3890_v35 = vpack.c.bf16 %v87_v31, %v83_v30  ;;  %v86_v37 = vld [vmem:[#allocation5 + $0xf0] sm:$0xff]  ;;  %v91_v38 = vld [vmem:[#allocation5 + $0x118] sm:$0xff]  ;;  %v124_v8 = vld [vmem:[#allocation5 + $0x220] sm:$0xff] }
  0x50   :  { %3839 = vmatprep.subr.bf16.mxu0 %v3838_v47  ;;  %3867 = vmatprep.subr.bf16.mxu1 %v3866_v58  ;;  %v95_v39 = vld [vmem:[#allocation5 + $0x138] sm:$0xff]  ;;  %v3892_v41 = vpack.c.bf16 %v86_v37, %v82_v36  ;;  %v90_v43 = vld [vmem:[#allocation5 + $0x110] sm:$0xff]  ;;  %v5729_v15 = vpack.c.bf16 %v124_v8, %v120_v7  ;;  %v128_v17 = vld [vmem:[#allocation5 + $0x240] sm:$0xff] }
  0x51   :  { %v358_v40 = vld [vmem:[#allocation2 + $0x38] sm:$0xff]  ;;  %v3894_v42 = vpack.c.bf16 %v95_v39, %v91_v38  ;;  %v94_v44 = vld [vmem:[#allocation5 + $0x130] sm:$0xff]  ;;  %v132_v19 = vld [vmem:[#allocation5 + $0x260] sm:$0xff] }
  0x52   :  { %v99_v45 = vld [vmem:[#allocation5 + $0x158] sm:$0xff]  ;;  %v98_v49 = vld [vmem:[#allocation5 + $0x150] sm:$0xff]  ;;  %v136_v31 = vld [vmem:[#allocation5 + $0x280] sm:$0xff] }
  0x53   :  { %3841 = vmatpush3.bf16.msra.mxu0 %v3838_v47  ;;  %3869 = vmatpush1.bf16.msra.mxu1 %v3868_v0  ;;  %v103_v46 = vld [vmem:[#allocation5 + $0x178] sm:$0xff]  ;;  %v3896_v47 = vpack.c.bf16 %v94_v44, %v90_v43  ;;  %v102_v50 = vld [vmem:[#allocation5 + $0x170] sm:$0xff]  ;;  %v121_v0 = vld [vmem:[#allocation5 + $0x208] sm:$0xff] }
  0x54   :  { %3843 = vmatprep.subr.bf16.mxu0 %v3842_v56  ;;  %3871 = vmatprep.subr.bf16.mxu1 %v3870_v5  ;;  %v3898_v48 = vpack.c.bf16 %v103_v46, %v99_v45  ;;  %v107_v51 = vld [vmem:[#allocation5 + $0x198] sm:$0xff]  ;;  %v3900_v53 = vpack.c.bf16 %v102_v50, %v98_v49  ;;  %v106_v55 = vld [vmem:[#allocation5 + $0x190] sm:$0xff]  ;;  %v6865_v5 = vmov 0.0   ;;  %v145_v39 = vld [vmem:[#allocation5 + $0x2c8] sm:$0xff] }
  0x55   :  { %v111_v52 = vld [vmem:[#allocation5 + $0x1b8] sm:$0xff]  ;;  %v114_v61 = vld [vmem:[#allocation5 + $0x1d0] sm:$0xff]  ;;  %549 = vmatprep.mubr.f32.mxu1 %v6865_v5  ;;  %v144_v45 = vld [vmem:[#allocation5 + $0x2c0] sm:$0xff] }
  0x56   :  { %v3902_v54 = vpack.c.bf16 %v111_v52, %v107_v51  ;;  %v115_v57 = vld [vmem:[#allocation5 + $0x1d8] sm:$0xff]  ;;  %v118_v62 = vld [vmem:[#allocation5 + $0x1f0] sm:$0xff]  ;;  %v148_v46 = vld [vmem:[#allocation5 + $0x2e0] sm:$0xff] }
  0x57   :  { %3845 = vmatpush3.bf16.msra.mxu0 %v3842_v56  ;;  %3873 = vmatpush1.bf16.msra.mxu1 %v3872_v18  ;;  %v110_v56 = vld [vmem:[#allocation5 + $0x1b0] sm:$0xff]  ;;  %v119_v58 = vld [vmem:[#allocation5 + $0x1f8] sm:$0xff]  ;;  %v3908_v63 = vpack.c.bf16 %v118_v62, %v114_v61  ;;  %v165_v7 = vld [vmem:[#allocation5 + $0x368] sm:$0xff] }
  0x58   :  { %3879 = vmatprep.subr.bf16.mxu0 %v3878_v1  ;;  %3875 = vmatprep.subr.bf16.mxu1 %v3874_v20  ;;  %v3904_v59 = vpack.c.bf16 %v110_v56, %v106_v55  ;;  %v3906_v60 = vpack.c.bf16 %v119_v58, %v115_v57  ;;  %v125_v1 = vld [vmem:[#allocation5 + $0x228] sm:$0xff]  ;;  %v123_v2 = vld [vmem:[#allocation5 + $0x218] sm:$0xff]  ;;  %v122_v9 = vld [vmem:[#allocation5 + $0x210] sm:$0xff]  ;;  %v5769_v57 = vpack.c.bf16 %v148_v46, %v144_v45 }
  0x59   :  { %v5721_v3 = vpack.c.bf16 %v125_v1, %v121_v0  ;;  %v127_v4 = vld [vmem:[#allocation5 + $0x238] sm:$0xff]  ;;  %v126_v10 = vld [vmem:[#allocation5 + $0x230] sm:$0xff]  ;;  %v176_v46 = vld [vmem:[#allocation5 + $0x3c0] sm:$0xff] }
  0x5a   :  { %3593 = vmatmul.mubr.f32.vlgmr.msra.gmra.mrb[0].mxu0 %v352_v11  ;;  %v5725_v6 = vpack.c.bf16 %v127_v4, %v123_v2  ;;  %v129_v11 = vld [vmem:[#allocation5 + $0x248] sm:$0xff]  ;;  %v5731_v16 = vpack.c.bf16 %v126_v10, %v122_v9  ;;  %v130_v20 = vld [vmem:[#allocation5 + $0x250] sm:$0xff]  ;;  %v139_v27 = vld [vmem:[#allocation5 + $0x298] sm:$0xff] }
  0x5b   :  { %3595 = vmatprep.mubr.f32.mxu0 %v353_v12  ;;  %3881 = vmatpush1.bf16.msra.mxu0 %v3880_v13  ;;  %v133_v12 = vld [vmem:[#allocation5 + $0x268] sm:$0xff]  ;;  %v131_v13 = vld [vmem:[#allocation5 + $0x258] sm:$0xff]  ;;  %v134_v21 = vld [vmem:[#allocation5 + $0x270] sm:$0xff] }
  0x5c   :  { %3883 = vmatprep.subr.bf16.mxu0 %v3882_v14  ;;  %3877 = vmatpush1.bf16.msra.mxu1 %v3876_v29  ;;  %v135_v14 = vld [vmem:[#allocation5 + $0x278] sm:$0xff]  ;;  %v5739_v29 = vpack.c.bf16 %v132_v19, %v128_v17  ;;  %v5741_v30 = vpack.c.bf16 %v134_v21, %v130_v20  ;;  %v150_v49 = vld [vmem:[#allocation5 + $0x2f0] sm:$0xff]  ;;  %v161_v2 = vld [vmem:[#allocation5 + $0x348] sm:$0xff] }
  0x5d   :  { %3911 = vmatprep.subr.bf16.mxu1 %v5721_v3  ;;  %v143_v28 = vld [vmem:[#allocation5 + $0x2b8] sm:$0xff]  ;;  %v154_v61 = vld [vmem:[#allocation5 + $0x310] sm:$0xff]  ;;  %v169_v20 = vld [vmem:[#allocation5 + $0x388] sm:$0xff] }
  0x5e   :  { %3596 = vmatmul.mubr.f32.gmra.mrb[2].mxu0 %v354_v23  ;;  %v5733_v23 = vpack.c.bf16 %v133_v12, %v129_v11  ;;  %v5749_v38 = vpack.c.bf16 %v143_v28, %v139_v27  ;;  %v155_v55 = vld [vmem:[#allocation5 + $0x318] sm:$0xff]  ;;  %v158_v62 = vld [vmem:[#allocation5 + $0x330] sm:$0xff]  ;;  %v160_v12 = vld [vmem:[#allocation5 + $0x340] sm:$0xff] }
  0x5f   :  { %3598 = vmatprep.mubr.f32.mxu0 %v355_v25  ;;  %3885 = vmatpush1.bf16.msra.mxu0 %v3884_v24  ;;  %v5735_v24 = vpack.c.bf16 %v135_v14, %v131_v13  ;;  %v137_v25 = vld [vmem:[#allocation5 + $0x288] sm:$0xff]  ;;  %v159_v56 = vld [vmem:[#allocation5 + $0x338] sm:$0xff]  ;;  %v5787_v11 = vpack.c.bf16 %v158_v62, %v154_v61  ;;  %v164_v13 = vld [vmem:[#allocation5 + $0x360] sm:$0xff] }
  0x60   :  { %3887 = vmatprep.subr.bf16.mxu0 %v3886_v26  ;;  %v141_v26 = vld [vmem:[#allocation5 + $0x2a8] sm:$0xff]  ;;  %v5781_v1 = vpack.c.bf16 %v159_v56, %v155_v55  ;;  %v163_v8 = vld [vmem:[#allocation5 + $0x358] sm:$0xff]  ;;  %v162_v14 = vld [vmem:[#allocation5 + $0x350] sm:$0xff]  ;;  %v465_v56 = vlaneseq }
  0x61   :  { %v5747_v37 = vpack.c.bf16 %v141_v26, %v137_v25  ;;  %v167_v9 = vld [vmem:[#allocation5 + $0x378] sm:$0xff]  ;;  %v166_v17 = vld [vmem:[#allocation5 + $0x370] sm:$0xff]  ;;  %v173_v21 = vld [vmem:[#allocation5 + $0x3a8] sm:$0xff]  ;;  %v5799_v26 = vpack.c.bf16 %v164_v13, %v160_v12 }
  0x62   :  { %3599 = vmatmul.mubr.f32.gmra.mrb[4].mxu0 %v356_v32  ;;  %v5795_v19 = vpack.c.bf16 %v167_v9, %v163_v8  ;;  %v175_v25 = vld [vmem:[#allocation5 + $0x3b8] sm:$0xff]  ;;  %v5801_v27 = vpack.c.bf16 %v166_v17, %v162_v14  ;;  %v168_v28 = vld [vmem:[#allocation5 + $0x380] sm:$0xff] }
  0x63   :  { %3601 = vmatprep.mubr.f32.mxu0 %v357_v34  ;;  %3889 = vmatpush1.bf16.msra.mxu0 %v3888_v33  ;;  %v140_v33 = vld [vmem:[#allocation5 + $0x2a0] sm:$0xff]  ;;  %v138_v34 = vld [vmem:[#allocation5 + $0x290] sm:$0xff] }
  0x64   :  { %3891 = vmatprep.subr.bf16.mxu0 %v3890_v35  ;;  %v142_v35 = vld [vmem:[#allocation5 + $0x2b0] sm:$0xff]  ;;  %v5753_v43 = vpack.c.bf16 %v140_v33, %v136_v31  ;;  %v172_v31 = vld [vmem:[#allocation5 + $0x3a0] sm:$0xff] }
  0x65   :  { %v5755_v44 = vpack.c.bf16 %v142_v35, %v138_v34  ;;  %v174_v33 = vld [vmem:[#allocation5 + $0x3b0] sm:$0xff]  ;;  %v5807_v34 = vpack.c.bf16 %v173_v21, %v169_v20 }
  0x66   :  { %3602 = vmatmul.mubr.f32.gmra.mrb[6].mxu0 %v358_v40  ;;  %v149_v40 = vld [vmem:[#allocation5 + $0x2e8] sm:$0xff] }
  0x67   :  { %3893 = vmatpush1.bf16.msra.mxu0 %v3892_v41  ;;  %662 = vmatprep.mubr.f32.mxu0 %v6865_v5  ;;  %v147_v41 = vld [vmem:[#allocation5 + $0x2d8] sm:$0xff]  ;;  %v5763_v50 = vpack.c.bf16 %v149_v40, %v145_v39  ;;  %v181_v39 = vld [vmem:[#allocation5 + $0x3e8] sm:$0xff] }
  0x68   :  { %3895 = vmatprep.subr.bf16.mxu0 %v3894_v42  ;;  %v151_v42 = vld [vmem:[#allocation5 + $0x2f8] sm:$0xff] }
  0x69   :  { %v5765_v51 = vpack.c.bf16 %v151_v42, %v147_v41  ;;  %v179_v40 = vld [vmem:[#allocation5 + $0x3d8] sm:$0xff]  ;;  %v5815_v42 = vpack.c.bf16 %v172_v31, %v168_v28 }
  0x6a   :  { %v183_v41 = vld [vmem:[#allocation5 + $0x3f8] sm:$0xff] }
  0x6b   :  { %3897 = vmatpush1.bf16.msra.mxu0 %v3896_v47  ;;  %v313_v61 = vld [vmem:[#allocation5 + $0x800] ss:$8 sm:$0xf] }
  0x6c   :  { %3899 = vmatprep.subr.bf16.mxu0 %v3898_v48  ;;  %v146_v48 = vld [vmem:[#allocation5 + $0x2d0] sm:$0xff] }
  0x6d   :  { %v5771_v58 = vpack.c.bf16 %v150_v49, %v146_v48  ;;  %v180_v48 = vld [vmem:[#allocation5 + $0x3e0] sm:$0xff]  ;;  %v178_v49 = vld [vmem:[#allocation5 + $0x3d0] sm:$0xff] }
  0x6f   :  { %3901 = vmatpush1.bf16.msra.mxu0 %v3900_v53  ;;  %v153_v53 = vld [vmem:[#allocation5 + $0x308] sm:$0xff] }
  0x70   :  { %3903 = vmatprep.subr.bf16.mxu0 %v3902_v54  ;;  %v157_v54 = vld [vmem:[#allocation5 + $0x328] sm:$0xff] }
  0x71   :  { %v5779_v0 = vpack.c.bf16 %v157_v54, %v153_v53  ;;  %v5825_v53 = vpack.c.bf16 %v183_v41, %v179_v40  ;;  %v5829_v54 = vpack.c.bf16 %v180_v48, %v176_v46 }
  0x73   :  { %3905 = vmatpush1.bf16.msra.mxu0 %v3904_v59  ;;  %v152_v59 = vld [vmem:[#allocation5 + $0x300] sm:$0xff] }
  0x74   :  { %3907 = vmatprep.subr.bf16.mxu0 %v3906_v60  ;;  %v156_v60 = vld [vmem:[#allocation5 + $0x320] sm:$0xff] }
  0x75   :  { %v5785_v10 = vpack.c.bf16 %v156_v60, %v152_v59  ;;  %v466_v59 = vshrl.u32 %v465_v56, 7 }
  0x77   :  { %3909 = vmatpush1.bf16.msra.mxu0 %v3908_v63  ;;  %v467_v60 = vsub.s32 0, %v466_v59  ;;  %v471_v62 = vsub.s32 1, %v466_v59  ;;  %v479_v14 = vsub.s32 3, %v466_v59 }
  0x78   :  { %3943 = vmatprep.subr.bf16.mxu0 %v5725_v6 }
  0x79   :  { %v5890_v28 = vrot.slane %v313_v61, %v479_v14 }
 0x12d   :  { %v3594_v18 = vpop.f32.mrb[0].mxu0 }
 0x12e   :  { %v425_v22 = vpop.f32.mrb[1].mxu0 }
 0x12f   :  { %550 = vmatmul.mubr.f32.vlgmr.msra.gmra.mrb[0].mxu1 %v425_v22  ;;  %663 = vmatmul.mubr.f32.vlgmr.msra.gmra.mrb[8].mxu0 %v425_v22  ;;  %v171_v22 = vld [vmem:[#allocation5 + $0x398] sm:$0xff] }
 0x130   :  { %3913 = vmatpush1.bf16.msra.mxu1 %v5729_v15  ;;  %3945 = vmatpush1.bf16.msra.mxu0 %v5731_v16  ;;  %v5809_v35 = vpack.c.bf16 %v175_v25, %v171_v22 }
 0x131   :  { %555 = vmatprep.mubr.f32.mxu1 %v6865_v5  ;;  %668 = vmatprep.mubr.f32.mxu0 %v6865_v5  ;;  %v3597_v32 = vpop.f32.mrb[2].mxu0 }
 0x132   :  { %3915 = vmatprep.subr.bf16.mxu1 %v5733_v23  ;;  %3947 = vmatprep.subr.bf16.mxu0 %v5735_v24  ;;  %v435_v36 = vpop.f32.mrb[3].mxu0 }
 0x133   :  { %556 = vmatmul.mubr.f32.gmra.mrb[2].mxu1 %v3594_v18  ;;  %669 = vmatmul.mubr.f32.gmra.mrb[10].mxu0 %v3594_v18  ;;  %v5793_v18 = vpack.c.bf16 %v165_v7, %v161_v2  ;;  %v475_v2 = vsub.s32 2, %v466_v59 }
 0x134   :  { %3917 = vmatpush1.bf16.msra.mxu1 %v5739_v29  ;;  %3949 = vmatpush1.bf16.msra.mxu0 %v5741_v30 }
 0x135   :  { %561 = vmatprep.mubr.f32.mxu1 %v6865_v5  ;;  %674 = vmatprep.mubr.f32.mxu0 %v6865_v5  ;;  %v5759_v47 = vpop.f32.mrb[4].mxu0  ;;  %v5886_v12 = vrot.slane %v313_v61, %v475_v2 }
 0x136   :  { %3919 = vmatprep.subr.bf16.mxu1 %v5747_v37  ;;  %3951 = vmatprep.subr.bf16.mxu0 %v5749_v38  ;;  %v445_v52 = vpop.f32.mrb[5].mxu0 }
 0x137   :  { %562 = vmatmul.mubr.f32.gmra.mrb[4].mxu1 %v435_v36  ;;  %675 = vmatmul.mubr.f32.gmra.mrb[12].mxu0 %v435_v36  ;;  %v177_v36 = vld [vmem:[#allocation5 + $0x3c8] sm:$0xff] }
 0x138   :  { %3921 = vmatpush1.bf16.msra.mxu1 %v5753_v43  ;;  %3953 = vmatpush1.bf16.msra.mxu0 %v5755_v44 }
 0x139   :  { %567 = vmatprep.mubr.f32.mxu1 %v6865_v5  ;;  %680 = vmatprep.mubr.f32.mxu0 %v6865_v5  ;;  %v5775_v63 = vpop.f32.mrb[6].mxu0 }
 0x13a   :  { %3923 = vmatprep.subr.bf16.mxu1 %v5763_v50  ;;  %3955 = vmatprep.subr.bf16.mxu0 %v5765_v51  ;;  %v455_v4 = vpop.f32.mrb[7].mxu0 }
 0x13b   :  { %568 = vmatmul.mubr.f32.gmra.mrb[6].mxu1 %v3597_v32  ;;  %681 = vmatmul.mubr.f32.gmra.mrb[14].mxu0 %v3597_v32  ;;  %v170_v32 = vld [vmem:[#allocation5 + $0x390] sm:$0xff] }
 0x13c   :  { %3925 = vmatpush1.bf16.msra.mxu1 %v5769_v57  ;;  %3957 = vmatpush1.bf16.msra.mxu0 %v5771_v58  ;;  %v5817_v45 = vpack.c.bf16 %v174_v33, %v170_v32 }
 0x13d   :  { %573 = vmatprep.mubr.f32.mxu1 %v6865_v5  ;;  %686 = vmatprep.mubr.f32.mxu0 %v6865_v5 }
 0x13e   :  { %3927 = vmatprep.subr.bf16.mxu1 %v5779_v0  ;;  %3959 = vmatprep.subr.bf16.mxu0 %v5781_v1 }
 0x13f   :  { %574 = vmatmul.mubr.f32.gmra.mrb[8].mxu1 %v445_v52  ;;  %687 = vmatmul.mubr.f32.gmra.mrb[16].mxu0 %v445_v52  ;;  %v182_v52 = vld [vmem:[#allocation5 + $0x3f0] sm:$0xff] }
 0x140   :  { %3929 = vmatpush1.bf16.msra.mxu1 %v5785_v10  ;;  %3961 = vmatpush1.bf16.msra.mxu0 %v5787_v11  ;;  %v5831_v55 = vpack.c.bf16 %v182_v52, %v178_v49 }
 0x141   :  { %579 = vmatprep.mubr.f32.mxu1 %v6865_v5  ;;  %692 = vmatprep.mubr.f32.mxu0 %v6865_v5 }
 0x142   :  { %3931 = vmatprep.subr.bf16.mxu1 %v5793_v18  ;;  %3963 = vmatprep.subr.bf16.mxu0 %v5795_v19 }
 0x143   :  { %580 = vmatmul.mubr.f32.gmra.mrb[10].mxu1 %v5759_v47  ;;  %693 = vmatmul.mubr.f32.gmra.mrb[18].mxu0 %v5759_v47  ;;  %v5823_v47 = vpack.c.bf16 %v181_v39, %v177_v36 }
 0x144   :  { %3933 = vmatpush1.bf16.msra.mxu1 %v5799_v26  ;;  %3965 = vmatpush1.bf16.msra.mxu0 %v5801_v27 }
 0x145   :  { %585 = vmatprep.mubr.f32.mxu1 %v6865_v5  ;;  %698 = vmatprep.mubr.f32.mxu0 %v6865_v5 }
 0x146   :  { %3935 = vmatprep.subr.bf16.mxu1 %v5807_v34  ;;  %3967 = vmatprep.subr.bf16.mxu0 %v5809_v35 }
 0x147   :  { %586 = vmatmul.mubr.f32.gmra.mrb[12].mxu1 %v455_v4  ;;  %699 = vmatmul.mubr.f32.gmra.mrb[20].mxu0 %v455_v4  ;;  %v5883_v4 = vrot.slane %v313_v61, %v471_v62 }
 0x148   :  { %3937 = vmatpush1.bf16.msra.mxu1 %v5815_v42  ;;  %3969 = vmatpush1.bf16.msra.mxu0 %v5817_v45 }
 0x149   :  { %591 = vmatprep.mubr.f32.mxu1 %v6865_v5  ;;  %704 = vmatprep.mubr.f32.mxu0 %v6865_v5 }
 0x14a   :  { %3939 = vmatprep.subr.bf16.mxu1 %v5823_v47  ;;  %3971 = vmatprep.subr.bf16.mxu0 %v5825_v53 }
 0x14b   :  { %592 = vmatmul.mubr.f32.gmra.mrb[14].mxu1 %v5775_v63  ;;  %705 = vmatmul.mubr.f32.gmra.mrb[22].mxu0 %v5775_v63  ;;  %v5881_v63 = vrot.slane %v313_v61, %v467_v60 }
 0x14c   :  { %3941 = vmatpush1.bf16.msra.mxu1 %v5829_v54  ;;  %3973 = vmatpush1.bf16.msra.mxu0 %v5831_v55 }
 0x14d   :  { %775 = vmatprep.mubr.f32.mxu1 %v6865_v5  ;;  %846 = vmatprep.mubr.f32.mxu0 %v6865_v5 }
 0x14e   :  { %3975 = vmatprep.subr.bf16.mxu1 %v5721_v3  ;;  %4007 = vmatprep.subr.bf16.mxu0 %v5725_v6 }
 0x14f   :  { %776 = vmatmul.mubr.f32.vlgmr.msra.gmra.mrb[0].mxu1 %v6865_v5  ;;  %847 = vmatmul.mubr.f32.vlgmr.msra.gmra.mrb[8].mxu0 %v6865_v5 }
 0x150   :  { %3977 = vmatpush1.bf16.msra.mxu1 %v5729_v15  ;;  %4009 = vmatpush1.bf16.msra.mxu0 %v5731_v16 }
 0x151   :  { %3979 = vmatprep.subr.bf16.mxu1 %v5733_v23  ;;  %4011 = vmatprep.subr.bf16.mxu0 %v5735_v24 }
 0x152   :  { %939 = vmatprep.mubr.f32.mxu1 %v6865_v5  ;;  %1010 = vmatprep.mubr.f32.mxu0 %v6865_v5 }
 0x154   :  { %3981 = vmatpush1.bf16.msra.mxu1 %v5739_v29  ;;  %4013 = vmatpush1.bf16.msra.mxu0 %v5741_v30 }
 0x155   :  { %3983 = vmatprep.subr.bf16.mxu1 %v5747_v37  ;;  %4015 = vmatprep.subr.bf16.mxu0 %v5749_v38 }
 0x158   :  { %3985 = vmatpush1.bf16.msra.mxu1 %v5753_v43  ;;  %4017 = vmatpush1.bf16.msra.mxu0 %v5755_v44 }
 0x159   :  { %3987 = vmatprep.subr.bf16.mxu1 %v5763_v50  ;;  %4019 = vmatprep.subr.bf16.mxu0 %v5765_v51 }
 0x15c   :  { %3989 = vmatpush1.bf16.msra.mxu1 %v5769_v57  ;;  %4021 = vmatpush1.bf16.msra.mxu0 %v5771_v58 }
 0x15d   :  { %3991 = vmatprep.subr.bf16.mxu1 %v5779_v0  ;;  %4023 = vmatprep.subr.bf16.mxu0 %v5781_v1 }
 0x160   :  { %3993 = vmatpush1.bf16.msra.mxu1 %v5785_v10  ;;  %4025 = vmatpush1.bf16.msra.mxu0 %v5787_v11 }
 0x161   :  { %3995 = vmatprep.subr.bf16.mxu1 %v5793_v18  ;;  %4027 = vmatprep.subr.bf16.mxu0 %v5795_v19 }
 0x164   :  { %3997 = vmatpush1.bf16.msra.mxu1 %v5799_v26  ;;  %4029 = vmatpush1.bf16.msra.mxu0 %v5801_v27 }
 0x165   :  { %3999 = vmatprep.subr.bf16.mxu1 %v5807_v34  ;;  %4031 = vmatprep.subr.bf16.mxu0 %v5809_v35 }
 0x168   :  { %4001 = vmatpush1.bf16.msra.mxu1 %v5815_v42  ;;  %4033 = vmatpush1.bf16.msra.mxu0 %v5817_v45 }
 0x169   :  { %4003 = vmatprep.subr.bf16.mxu1 %v5823_v47  ;;  %4035 = vmatprep.subr.bf16.mxu0 %v5825_v53 }
 0x16c   :  { %4005 = vmatpush1.bf16.msra.mxu1 %v5829_v54  ;;  %4037 = vmatpush1.bf16.msra.mxu0 %v5831_v55 }
 0x16d   :  { %4039 = vmatprep.subr.bf16.mxu1 %v5721_v3  ;;  %4071 = vmatprep.subr.bf16.mxu0 %v5725_v6 }
 0x222   :  { %v777_v7 = vpop.f32.mrb[0].mxu1  ;;  %v848_v8 = vpop.f32.mrb[8].mxu0 }
 0x223   :  { %v5334_v9 = vadd.f32 %v777_v7, %v5881_v63  ;;  %v779_v13 = vpop.f32.mrb[1].mxu1  ;;  %v850_v17 = vpop.f32.mrb[9].mxu0  ;;  %v5350_v25 = vadd.f32 %v848_v8, %v5886_v12 }
 0x224   :  { %v5335_v20 = vadd.f32 %v779_v13, %v5883_v4  ;;  %v5351_v31 = vadd.f32 %v850_v17, %v5890_v28 }
 0x225   :  { %v857_v21 = vmul.f32 0.5, %v5334_v9 }
 0x226   :  { %v861_v22 = vmul.f32 0.5, %v5335_v20  ;;  %v866_v32 = vmul.f32 0.5, %v5351_v31 }
 0x227   :  { %5409 = vtanh.f32 %v857_v21 }
 0x228   :  { %5411 = vtanh.f32 %v861_v22 }
 0x229   :  { %5413 = vtanh.f32 %v5350_v25 }
 0x22a   :  { %5415 = vtanh.f32 %v866_v32 }
 0x231   :  { %v5410_v33 = vpop.eup %5409 }
 0x232   :  { %v5412_v36 = vpop.eup %5411  ;;  %v859_v39 = vmul.f32 0.5, %v5410_v33 }
 0x233   :  { %v863_v40 = vmul.f32 0.5, %v5412_v36  ;;  %v5414_v46 = vpop.eup %5413 }
 0x234   :  { %v860_v41 = vadd.f32 0.5, %v859_v39  ;;  %v5416_v59 = vpop.eup %5415 }
 0x235   :  { %v864_v48 = vadd.f32 0.5, %v863_v40  ;;  %v868_v60 = vmul.f32 0.5, %v5416_v59 }
 0x236   :  { %v871_v49 = vmul.f32 %v5414_v46, %v860_v41 }
 0x237   :  { %v870_v52 = vmul.f32 0.0, %v864_v48  ;;  %v869_v61 = vadd.f32 0.5, %v868_v60 }
 0x239   :  { %v5893_v56 = vadd.f32 %v871_v49, %v870_v52 }
 0x23b   :  { %5417 = vtanh.f32 %v5893_v56 }
 0x245   :  { %v5418_v62 = vpop.eup %5417 }
 0x246   :  { %v874_v2 = vmul.f32 %v5418_v62, %v869_v61 }
 0x248   :  { %940 = vmatmul.mubr.f32.vlgmr.msra.gmra.mrb[2].mxu1 %v874_v2  ;;  %1011 = vmatmul.mubr.f32.vlgmr.msra.gmra.mrb[10].mxu0 %v874_v2 }
 0x249   :  { %4041 = vmatpush1.bf16.msra.mxu1 %v5729_v15  ;;  %4073 = vmatpush1.bf16.msra.mxu0 %v5731_v16 }
 0x24a   :  { %4043 = vmatprep.subr.bf16.mxu1 %v5733_v23  ;;  %4075 = vmatprep.subr.bf16.mxu0 %v5735_v24 }
 0x24b   :  { %1103 = vmatprep.mubr.f32.mxu1 %v6865_v5  ;;  %1174 = vmatprep.mubr.f32.mxu0 %v6865_v5 }
 0x24d   :  { %4045 = vmatpush1.bf16.msra.mxu1 %v5739_v29  ;;  %4077 = vmatpush1.bf16.msra.mxu0 %v5741_v30 }
 0x24e   :  { %4047 = vmatprep.subr.bf16.mxu1 %v5747_v37  ;;  %4079 = vmatprep.subr.bf16.mxu0 %v5749_v38 }
 0x251   :  { %4049 = vmatpush1.bf16.msra.mxu1 %v5753_v43  ;;  %4081 = vmatpush1.bf16.msra.mxu0 %v5755_v44 }
 0x252   :  { %4051 = vmatprep.subr.bf16.mxu1 %v5763_v50  ;;  %4083 = vmatprep.subr.bf16.mxu0 %v5765_v51 }
 0x255   :  { %4053 = vmatpush1.bf16.msra.mxu1 %v5769_v57  ;;  %4085 = vmatpush1.bf16.msra.mxu0 %v5771_v58 }
 0x256   :  { %4055 = vmatprep.subr.bf16.mxu1 %v5779_v0  ;;  %4087 = vmatprep.subr.bf16.mxu0 %v5781_v1 }
 0x259   :  { %4057 = vmatpush1.bf16.msra.mxu1 %v5785_v10  ;;  %4089 = vmatpush1.bf16.msra.mxu0 %v5787_v11 }
 0x25a   :  { %4059 = vmatprep.subr.bf16.mxu1 %v5793_v18  ;;  %4091 = vmatprep.subr.bf16.mxu0 %v5795_v19 }
 0x25d   :  { %4061 = vmatpush1.bf16.msra.mxu1 %v5799_v26  ;;  %4093 = vmatpush1.bf16.msra.mxu0 %v5801_v27 }
 0x25e   :  { %4063 = vmatprep.subr.bf16.mxu1 %v5807_v34  ;;  %4095 = vmatprep.subr.bf16.mxu0 %v5809_v35 }
 0x261   :  { %4065 = vmatpush1.bf16.msra.mxu1 %v5815_v42  ;;  %4097 = vmatpush1.bf16.msra.mxu0 %v5817_v45 }
 0x262   :  { %4067 = vmatprep.subr.bf16.mxu1 %v5823_v47  ;;  %4099 = vmatprep.subr.bf16.mxu0 %v5825_v53 }
 0x265   :  { %4069 = vmatpush1.bf16.msra.mxu1 %v5829_v54  ;;  %4101 = vmatpush1.bf16.msra.mxu0 %v5831_v55 }
 0x266   :  { %4103 = vmatprep.subr.bf16.mxu1 %v5721_v3  ;;  %4135 = vmatprep.subr.bf16.mxu0 %v5725_v6 }
 0x31b   :  { %v941_v7 = vpop.f32.mrb[2].mxu1  ;;  %v1012_v8 = vpop.f32.mrb[10].mxu0 }
 0x31c   :  { %v5336_v9 = vadd.f32 %v941_v7, %v5881_v63  ;;  %v943_v13 = vpop.f32.mrb[3].mxu1  ;;  %v1014_v14 = vpop.f32.mrb[11].mxu0  ;;  %v5352_v22 = vadd.f32 %v1012_v8, %v5886_v12 }
 0x31d   :  { %v5337_v17 = vadd.f32 %v943_v13, %v5883_v4  ;;  %v5353_v25 = vadd.f32 %v1014_v14, %v5890_v28 }
 0x31e   :  { %v1021_v20 = vmul.f32 0.5, %v5336_v9 }
 0x31f   :  { %v1025_v21 = vmul.f32 0.5, %v5337_v17  ;;  %v1030_v31 = vmul.f32 0.5, %v5353_v25 }
 0x320   :  { %5419 = vtanh.f32 %v1021_v20 }
 0x321   :  { %5421 = vtanh.f32 %v1025_v21 }
 0x322   :  { %5423 = vtanh.f32 %v5352_v22 }
 0x323   :  { %5425 = vtanh.f32 %v1030_v31 }
 0x32a   :  { %v5420_v32 = vpop.eup %5419 }
 0x32b   :  { %v5422_v33 = vpop.eup %5421  ;;  %v1023_v36 = vmul.f32 0.5, %v5420_v32 }
 0x32c   :  { %v1027_v39 = vmul.f32 0.5, %v5422_v33  ;;  %v5424_v41 = vpop.eup %5423 }
 0x32d   :  { %v1024_v40 = vadd.f32 0.5, %v1023_v36  ;;  %v5426_v59 = vpop.eup %5425 }
 0x32e   :  { %v1028_v46 = vadd.f32 0.5, %v1027_v39  ;;  %v1032_v60 = vmul.f32 0.5, %v5426_v59 }
 0x32f   :  { %v1035_v48 = vmul.f32 %v5424_v41, %v1024_v40 }
 0x330   :  { %v1034_v49 = vmul.f32 %v1028_v46, %v5893_v56  ;;  %v1033_v61 = vadd.f32 0.5, %v1032_v60 }
 0x332   :  { %v5935_v52 = vadd.f32 %v1035_v48, %v1034_v49 }
 0x334   :  { %5427 = vtanh.f32 %v5935_v52 }
 0x33e   :  { %v5428_v62 = vpop.eup %5427 }
 0x33f   :  { %v1038_v2 = vmul.f32 %v5428_v62, %v1033_v61 }
 0x341   :  { %1104 = vmatmul.mubr.f32.vlgmr.msra.gmra.mrb[4].mxu1 %v1038_v2  ;;  %1175 = vmatmul.mubr.f32.vlgmr.msra.gmra.mrb[12].mxu0 %v1038_v2 }
 0x342   :  { %4105 = vmatpush1.bf16.msra.mxu1 %v5729_v15  ;;  %4137 = vmatpush1.bf16.msra.mxu0 %v5731_v16 }
 0x343   :  { %4107 = vmatprep.subr.bf16.mxu1 %v5733_v23  ;;  %4139 = vmatprep.subr.bf16.mxu0 %v5735_v24 }
 0x344   :  { %1267 = vmatprep.mubr.f32.mxu1 %v6865_v5  ;;  %1338 = vmatprep.mubr.f32.mxu0 %v6865_v5 }
 0x346   :  { %4109 = vmatpush1.bf16.msra.mxu1 %v5739_v29  ;;  %4141 = vmatpush1.bf16.msra.mxu0 %v5741_v30 }
 0x347   :  { %4111 = vmatprep.subr.bf16.mxu1 %v5747_v37  ;;  %4143 = vmatprep.subr.bf16.mxu0 %v5749_v38 }
 0x34a   :  { %4113 = vmatpush1.bf16.msra.mxu1 %v5753_v43  ;;  %4145 = vmatpush1.bf16.msra.mxu0 %v5755_v44 }
 0x34b   :  { %4115 = vmatprep.subr.bf16.mxu1 %v5763_v50  ;;  %4147 = vmatprep.subr.bf16.mxu0 %v5765_v51 }
 0x34e   :  { %4117 = vmatpush1.bf16.msra.mxu1 %v5769_v57  ;;  %4149 = vmatpush1.bf16.msra.mxu0 %v5771_v58 }
 0x34f   :  { %4119 = vmatprep.subr.bf16.mxu1 %v5779_v0  ;;  %4151 = vmatprep.subr.bf16.mxu0 %v5781_v1 }
 0x352   :  { %4121 = vmatpush1.bf16.msra.mxu1 %v5785_v10  ;;  %4153 = vmatpush1.bf16.msra.mxu0 %v5787_v11 }
 0x353   :  { %4123 = vmatprep.subr.bf16.mxu1 %v5793_v18  ;;  %4155 = vmatprep.subr.bf16.mxu0 %v5795_v19 }
 0x356   :  { %4125 = vmatpush1.bf16.msra.mxu1 %v5799_v26  ;;  %4157 = vmatpush1.bf16.msra.mxu0 %v5801_v27 }
 0x357   :  { %4127 = vmatprep.subr.bf16.mxu1 %v5807_v34  ;;  %4159 = vmatprep.subr.bf16.mxu0 %v5809_v35 }
 0x35a   :  { %4129 = vmatpush1.bf16.msra.mxu1 %v5815_v42  ;;  %4161 = vmatpush1.bf16.msra.mxu0 %v5817_v45 }
 0x35b   :  { %4131 = vmatprep.subr.bf16.mxu1 %v5823_v47  ;;  %4163 = vmatprep.subr.bf16.mxu0 %v5825_v53 }
 0x35e   :  { %4133 = vmatpush1.bf16.msra.mxu1 %v5829_v54  ;;  %4165 = vmatpush1.bf16.msra.mxu0 %v5831_v55 }
 0x35f   :  { %4167 = vmatprep.subr.bf16.mxu1 %v5721_v3  ;;  %4199 = vmatprep.subr.bf16.mxu0 %v5725_v6 }
 0x414   :  { %v1105_v56 = vpop.f32.mrb[4].mxu1  ;;  %v1176_v7 = vpop.f32.mrb[12].mxu0 }
 0x415   :  { %v5338_v8 = vadd.f32 %v1105_v56, %v5881_v63  ;;  %v1107_v9 = vpop.f32.mrb[5].mxu1  ;;  %v1178_v13 = vpop.f32.mrb[13].mxu0  ;;  %v5354_v21 = vadd.f32 %v1176_v7, %v5886_v12 }
 0x416   :  { %v5339_v14 = vadd.f32 %v1107_v9, %v5883_v4  ;;  %v5355_v22 = vadd.f32 %v1178_v13, %v5890_v28 }
 0x417   :  { %v1185_v17 = vmul.f32 0.5, %v5338_v8 }
 0x418   :  { %v1189_v20 = vmul.f32 0.5, %v5339_v14  ;;  %v1194_v25 = vmul.f32 0.5, %v5355_v22 }
 0x419   :  { %5429 = vtanh.f32 %v1185_v17 }
 0x41a   :  { %5431 = vtanh.f32 %v1189_v20 }
 0x41b   :  { %5433 = vtanh.f32 %v5354_v21 }
 0x41c   :  { %5435 = vtanh.f32 %v1194_v25 }
 0x423   :  { %v5430_v31 = vpop.eup %5429 }
 0x424   :  { %v5432_v32 = vpop.eup %5431  ;;  %v1187_v33 = vmul.f32 0.5, %v5430_v31 }
 0x425   :  { %v1191_v36 = vmul.f32 0.5, %v5432_v32  ;;  %v5434_v40 = vpop.eup %5433 }
 0x426   :  { %v1188_v39 = vadd.f32 0.5, %v1187_v33  ;;  %v5436_v59 = vpop.eup %5435 }
 0x427   :  { %v1192_v41 = vadd.f32 0.5, %v1191_v36  ;;  %v1196_v60 = vmul.f32 0.5, %v5436_v59 }
 0x428   :  { %v1199_v46 = vmul.f32 %v5434_v40, %v1188_v39 }
 0x429   :  { %v1198_v48 = vmul.f32 %v1192_v41, %v5935_v52  ;;  %v1197_v61 = vadd.f32 0.5, %v1196_v60 }
 0x42b   :  { %v5977_v49 = vadd.f32 %v1199_v46, %v1198_v48 }
 0x42d   :  { %5437 = vtanh.f32 %v5977_v49 }
 0x437   :  { %v5438_v62 = vpop.eup %5437 }
 0x438   :  { %v1202_v2 = vmul.f32 %v5438_v62, %v1197_v61 }
 0x43a   :  { %1268 = vmatmul.mubr.f32.vlgmr.msra.gmra.mrb[6].mxu1 %v1202_v2  ;;  %1339 = vmatmul.mubr.f32.vlgmr.msra.gmra.mrb[14].mxu0 %v1202_v2 }
 0x43b   :  { %4169 = vmatpush1.bf16.msra.mxu1 %v5729_v15  ;;  %4201 = vmatpush1.bf16.msra.mxu0 %v5731_v16 }
 0x43c   :  { %4171 = vmatprep.subr.bf16.mxu1 %v5733_v23  ;;  %4203 = vmatprep.subr.bf16.mxu0 %v5735_v24 }
 0x43d   :  { %1431 = vmatprep.mubr.f32.mxu1 %v6865_v5  ;;  %1502 = vmatprep.mubr.f32.mxu0 %v6865_v5 }
 0x43f   :  { %4173 = vmatpush1.bf16.msra.mxu1 %v5739_v29  ;;  %4205 = vmatpush1.bf16.msra.mxu0 %v5741_v30 }
 0x440   :  { %4175 = vmatprep.subr.bf16.mxu1 %v5747_v37  ;;  %4207 = vmatprep.subr.bf16.mxu0 %v5749_v38 }
 0x443   :  { %4177 = vmatpush1.bf16.msra.mxu1 %v5753_v43  ;;  %4209 = vmatpush1.bf16.msra.mxu0 %v5755_v44 }
 0x444   :  { %4179 = vmatprep.subr.bf16.mxu1 %v5763_v50  ;;  %4211 = vmatprep.subr.bf16.mxu0 %v5765_v51 }
 0x447   :  { %4181 = vmatpush1.bf16.msra.mxu1 %v5769_v57  ;;  %4213 = vmatpush1.bf16.msra.mxu0 %v5771_v58 }
 0x448   :  { %4183 = vmatprep.subr.bf16.mxu1 %v5779_v0  ;;  %4215 = vmatprep.subr.bf16.mxu0 %v5781_v1 }
 0x44b   :  { %4185 = vmatpush1.bf16.msra.mxu1 %v5785_v10  ;;  %4217 = vmatpush1.bf16.msra.mxu0 %v5787_v11 }
 0x44c   :  { %4187 = vmatprep.subr.bf16.mxu1 %v5793_v18  ;;  %4219 = vmatprep.subr.bf16.mxu0 %v5795_v19 }
 0x44f   :  { %4189 = vmatpush1.bf16.msra.mxu1 %v5799_v26  ;;  %4221 = vmatpush1.bf16.msra.mxu0 %v5801_v27 }
 0x450   :  { %4191 = vmatprep.subr.bf16.mxu1 %v5807_v34  ;;  %4223 = vmatprep.subr.bf16.mxu0 %v5809_v35 }
 0x453   :  { %4193 = vmatpush1.bf16.msra.mxu1 %v5815_v42  ;;  %4225 = vmatpush1.bf16.msra.mxu0 %v5817_v45 }
 0x454   :  { %4195 = vmatprep.subr.bf16.mxu1 %v5823_v47  ;;  %4227 = vmatprep.subr.bf16.mxu0 %v5825_v53 }
 0x457   :  { %4197 = vmatpush1.bf16.msra.mxu1 %v5829_v54  ;;  %4229 = vmatpush1.bf16.msra.mxu0 %v5831_v55 }
 0x458   :  { %4231 = vmatprep.subr.bf16.mxu1 %v5721_v3  ;;  %4263 = vmatprep.subr.bf16.mxu0 %v5725_v6 }
 0x50d   :  { %v1269_v52 = vpop.f32.mrb[6].mxu1  ;;  %v1340_v56 = vpop.f32.mrb[14].mxu0 }
 0x50e   :  { %v5340_v7 = vadd.f32 %v1269_v52, %v5881_v63  ;;  %v1271_v8 = vpop.f32.mrb[7].mxu1  ;;  %v1342_v9 = vpop.f32.mrb[15].mxu0  ;;  %v5356_v20 = vadd.f32 %v1340_v56, %v5886_v12 }
 0x50f   :  { %v5341_v13 = vadd.f32 %v1271_v8, %v5883_v4  ;;  %v5357_v21 = vadd.f32 %v1342_v9, %v5890_v28 }
 0x510   :  { %v1349_v14 = vmul.f32 0.5, %v5340_v7 }
 0x511   :  { %v1353_v17 = vmul.f32 0.5, %v5341_v13  ;;  %v1358_v22 = vmul.f32 0.5, %v5357_v21 }
 0x512   :  { %5439 = vtanh.f32 %v1349_v14 }
 0x513   :  { %5441 = vtanh.f32 %v1353_v17 }
 0x514   :  { %5443 = vtanh.f32 %v5356_v20 }
 0x515   :  { %5445 = vtanh.f32 %v1358_v22 }
 0x51c   :  { %v5440_v25 = vpop.eup %5439 }
 0x51d   :  { %v5442_v31 = vpop.eup %5441  ;;  %v1351_v32 = vmul.f32 0.5, %v5440_v25 }
 0x51e   :  { %v1355_v33 = vmul.f32 0.5, %v5442_v31  ;;  %v5444_v39 = vpop.eup %5443 }
 0x51f   :  { %v1352_v36 = vadd.f32 0.5, %v1351_v32  ;;  %v5446_v59 = vpop.eup %5445 }
 0x520   :  { %v1356_v40 = vadd.f32 0.5, %v1355_v33  ;;  %v1360_v60 = vmul.f32 0.5, %v5446_v59 }
 0x521   :  { %v1363_v41 = vmul.f32 %v5444_v39, %v1352_v36 }
 0x522   :  { %v1362_v46 = vmul.f32 %v1356_v40, %v5977_v49  ;;  %v1361_v61 = vadd.f32 0.5, %v1360_v60 }
 0x524   :  { %v6019_v48 = vadd.f32 %v1363_v41, %v1362_v46 }
 0x526   :  { %5447 = vtanh.f32 %v6019_v48 }
 0x530   :  { %v5448_v62 = vpop.eup %5447 }
 0x531   :  { %v1366_v2 = vmul.f32 %v5448_v62, %v1361_v61 }
 0x533   :  { %1432 = vmatmul.mubr.f32.vlgmr.msra.gmra.mrb[8].mxu1 %v1366_v2  ;;  %1503 = vmatmul.mubr.f32.vlgmr.msra.gmra.mrb[16].mxu0 %v1366_v2 }
 0x534   :  { %4233 = vmatpush1.bf16.msra.mxu1 %v5729_v15  ;;  %4265 = vmatpush1.bf16.msra.mxu0 %v5731_v16 }
 0x535   :  { %4235 = vmatprep.subr.bf16.mxu1 %v5733_v23  ;;  %4267 = vmatprep.subr.bf16.mxu0 %v5735_v24 }
 0x536   :  { %1595 = vmatprep.mubr.f32.mxu1 %v6865_v5  ;;  %1666 = vmatprep.mubr.f32.mxu0 %v6865_v5 }
 0x538   :  { %4237 = vmatpush1.bf16.msra.mxu1 %v5739_v29  ;;  %4269 = vmatpush1.bf16.msra.mxu0 %v5741_v30 }
 0x539   :  { %4239 = vmatprep.subr.bf16.mxu1 %v5747_v37  ;;  %4271 = vmatprep.subr.bf16.mxu0 %v5749_v38 }
 0x53c   :  { %4241 = vmatpush1.bf16.msra.mxu1 %v5753_v43  ;;  %4273 = vmatpush1.bf16.msra.mxu0 %v5755_v44 }
 0x53d   :  { %4243 = vmatprep.subr.bf16.mxu1 %v5763_v50  ;;  %4275 = vmatprep.subr.bf16.mxu0 %v5765_v51 }
 0x540   :  { %4245 = vmatpush1.bf16.msra.mxu1 %v5769_v57  ;;  %4277 = vmatpush1.bf16.msra.mxu0 %v5771_v58 }
 0x541   :  { %4247 = vmatprep.subr.bf16.mxu1 %v5779_v0  ;;  %4279 = vmatprep.subr.bf16.mxu0 %v5781_v1 }
 0x544   :  { %4249 = vmatpush1.bf16.msra.mxu1 %v5785_v10  ;;  %4281 = vmatpush1.bf16.msra.mxu0 %v5787_v11 }
 0x545   :  { %4251 = vmatprep.subr.bf16.mxu1 %v5793_v18  ;;  %4283 = vmatprep.subr.bf16.mxu0 %v5795_v19 }
 0x548   :  { %4253 = vmatpush1.bf16.msra.mxu1 %v5799_v26  ;;  %4285 = vmatpush1.bf16.msra.mxu0 %v5801_v27 }
 0x549   :  { %4255 = vmatprep.subr.bf16.mxu1 %v5807_v34  ;;  %4287 = vmatprep.subr.bf16.mxu0 %v5809_v35 }
 0x54c   :  { %4257 = vmatpush1.bf16.msra.mxu1 %v5815_v42  ;;  %4289 = vmatpush1.bf16.msra.mxu0 %v5817_v45 }
 0x54d   :  { %4259 = vmatprep.subr.bf16.mxu1 %v5823_v47  ;;  %4291 = vmatprep.subr.bf16.mxu0 %v5825_v53 }
 0x550   :  { %4261 = vmatpush1.bf16.msra.mxu1 %v5829_v54  ;;  %4293 = vmatpush1.bf16.msra.mxu0 %v5831_v55 }
 0x551   :  { %4295 = vmatprep.subr.bf16.mxu1 %v5721_v3  ;;  %4327 = vmatprep.subr.bf16.mxu0 %v5725_v6 }
 0x606   :  { %v1433_v49 = vpop.f32.mrb[8].mxu1  ;;  %v1504_v52 = vpop.f32.mrb[16].mxu0 }
 0x607   :  { %v5342_v56 = vadd.f32 %v1433_v49, %v5881_v63  ;;  %v1435_v7 = vpop.f32.mrb[9].mxu1  ;;  %v1506_v8 = vpop.f32.mrb[17].mxu0  ;;  %v5358_v17 = vadd.f32 %v1504_v52, %v5886_v12 }
 0x608   :  { %v5343_v9 = vadd.f32 %v1435_v7, %v5883_v4  ;;  %v5359_v20 = vadd.f32 %v1506_v8, %v5890_v28 }
 0x609   :  { %v1513_v13 = vmul.f32 0.5, %v5342_v56 }
 0x60a   :  { %v1517_v14 = vmul.f32 0.5, %v5343_v9  ;;  %v1522_v21 = vmul.f32 0.5, %v5359_v20 }
 0x60b   :  { %5449 = vtanh.f32 %v1513_v13 }
 0x60c   :  { %5451 = vtanh.f32 %v1517_v14 }
 0x60d   :  { %5453 = vtanh.f32 %v5358_v17 }
 0x60e   :  { %5455 = vtanh.f32 %v1522_v21 }
 0x615   :  { %v5450_v22 = vpop.eup %5449 }
 0x616   :  { %v5452_v25 = vpop.eup %5451  ;;  %v1515_v31 = vmul.f32 0.5, %v5450_v22 }
 0x617   :  { %v1519_v32 = vmul.f32 0.5, %v5452_v25  ;;  %v5454_v36 = vpop.eup %5453 }
 0x618   :  { %v1516_v33 = vadd.f32 0.5, %v1515_v31  ;;  %v5456_v59 = vpop.eup %5455 }
 0x619   :  { %v1520_v39 = vadd.f32 0.5, %v1519_v32  ;;  %v1524_v60 = vmul.f32 0.5, %v5456_v59 }
 0x61a   :  { %v1527_v40 = vmul.f32 %v5454_v36, %v1516_v33 }
 0x61b   :  { %v1526_v41 = vmul.f32 %v1520_v39, %v6019_v48  ;;  %v1525_v61 = vadd.f32 0.5, %v1524_v60 }
 0x61d   :  { %v6061_v46 = vadd.f32 %v1527_v40, %v1526_v41 }
 0x61f   :  { %5457 = vtanh.f32 %v6061_v46 }
 0x629   :  { %v5458_v62 = vpop.eup %5457 }
 0x62a   :  { %v1530_v2 = vmul.f32 %v5458_v62, %v1525_v61  ;;  %v193_v62 = vld [vmem:[#allocation5 + $0x448] sm:$0xff] }
 0x62c   :  { %1596 = vmatmul.mubr.f32.vlgmr.msra.gmra.mrb[10].mxu1 %v1530_v2  ;;  %1667 = vmatmul.mubr.f32.vlgmr.msra.gmra.mrb[18].mxu0 %v1530_v2  ;;  %v186_v2 = vld [vmem:[#allocation5 + $0x410] sm:$0xff] }
 0x62d   :  { %4297 = vmatpush1.bf16.msra.mxu1 %v5729_v15  ;;  %4329 = vmatpush1.bf16.msra.mxu0 %v5731_v16 }
 0x62e   :  { %4299 = vmatprep.subr.bf16.mxu1 %v5733_v23  ;;  %4331 = vmatprep.subr.bf16.mxu0 %v5735_v24 }
 0x62f   :  { %1759 = vmatprep.mubr.f32.mxu1 %v6865_v5  ;;  %1830 = vmatprep.mubr.f32.mxu0 %v6865_v5 }
 0x631   :  { %4301 = vmatpush1.bf16.msra.mxu1 %v5739_v29  ;;  %4333 = vmatpush1.bf16.msra.mxu0 %v5741_v30 }
 0x632   :  { %4303 = vmatprep.subr.bf16.mxu1 %v5747_v37  ;;  %4335 = vmatprep.subr.bf16.mxu0 %v5749_v38 }
 0x635   :  { %4305 = vmatpush1.bf16.msra.mxu1 %v5753_v43  ;;  %4337 = vmatpush1.bf16.msra.mxu0 %v5755_v44 }
 0x636   :  { %4307 = vmatprep.subr.bf16.mxu1 %v5763_v50  ;;  %4339 = vmatprep.subr.bf16.mxu0 %v5765_v51 }
 0x639   :  { %4309 = vmatpush1.bf16.msra.mxu1 %v5769_v57  ;;  %4341 = vmatpush1.bf16.msra.mxu0 %v5771_v58 }
 0x63a   :  { %4311 = vmatprep.subr.bf16.mxu1 %v5779_v0  ;;  %4343 = vmatprep.subr.bf16.mxu0 %v5781_v1 }
 0x63d   :  { %4313 = vmatpush1.bf16.msra.mxu1 %v5785_v10  ;;  %4345 = vmatpush1.bf16.msra.mxu0 %v5787_v11 }
 0x63e   :  { %4315 = vmatprep.subr.bf16.mxu1 %v5793_v18  ;;  %4347 = vmatprep.subr.bf16.mxu0 %v5795_v19 }
 0x641   :  { %4317 = vmatpush1.bf16.msra.mxu1 %v5799_v26  ;;  %4349 = vmatpush1.bf16.msra.mxu0 %v5801_v27 }
 0x642   :  { %4319 = vmatprep.subr.bf16.mxu1 %v5807_v34  ;;  %4351 = vmatprep.subr.bf16.mxu0 %v5809_v35 }
 0x645   :  { %4321 = vmatpush1.bf16.msra.mxu1 %v5815_v42  ;;  %4353 = vmatpush1.bf16.msra.mxu0 %v5817_v45 }
 0x646   :  { %4323 = vmatprep.subr.bf16.mxu1 %v5823_v47  ;;  %4355 = vmatprep.subr.bf16.mxu0 %v5825_v53 }
 0x649   :  { %4325 = vmatpush1.bf16.msra.mxu1 %v5829_v54  ;;  %4357 = vmatpush1.bf16.msra.mxu0 %v5831_v55 }
 0x64a   :  { %4359 = vmatprep.subr.bf16.mxu1 %v5721_v3  ;;  %4391 = vmatprep.subr.bf16.mxu0 %v5725_v6 }
 0x6ff   :  { %v1597_v48 = vpop.f32.mrb[10].mxu1  ;;  %v1668_v49 = vpop.f32.mrb[18].mxu0 }
 0x700   :  { %v5344_v52 = vadd.f32 %v1597_v48, %v5881_v63  ;;  %v1599_v56 = vpop.f32.mrb[11].mxu1  ;;  %v1670_v7 = vpop.f32.mrb[19].mxu0  ;;  %v5360_v14 = vadd.f32 %v1668_v49, %v5886_v12  ;;  %v190_v48 = vld [vmem:[#allocation5 + $0x430] sm:$0xff]  ;;  %v197_v49 = vld [vmem:[#allocation5 + $0x468] sm:$0xff] }
 0x701   :  { %v5345_v8 = vadd.f32 %v1599_v56, %v5883_v4  ;;  %v5361_v17 = vadd.f32 %v1670_v7, %v5890_v28  ;;  %v199_v56 = vld [vmem:[#allocation5 + $0x478] sm:$0xff] }
 0x702   :  { %v1677_v9 = vmul.f32 0.5, %v5344_v52  ;;  %v195_v52 = vld [vmem:[#allocation5 + $0x458] sm:$0xff] }
 0x703   :  { %v1681_v13 = vmul.f32 0.5, %v5345_v8  ;;  %v1686_v3 = vmul.f32 0.5, %v5361_v17  ;;  %v6154_v17 = vpack.c.bf16 %v190_v48, %v186_v2  ;;  %v224_v48 = vld [vmem:[#allocation5 + $0x540] sm:$0xff] }
 0x704   :  { %5459 = vtanh.f32 %v1677_v9 }
 0x705   :  { %5461 = vtanh.f32 %v1681_v13  ;;  %v192_v13 = vld [vmem:[#allocation5 + $0x440] sm:$0xff] }
 0x706   :  { %5463 = vtanh.f32 %v5360_v14  ;;  %v196_v14 = vld [vmem:[#allocation5 + $0x460] sm:$0xff] }
 0x707   :  { %5465 = vtanh.f32 %v1686_v3 }
 0x70e   :  { %v5460_v20 = vpop.eup %5459 }
 0x70f   :  { %v5462_v6 = vpop.eup %5461  ;;  %v1679_v21 = vmul.f32 0.5, %v5460_v20  ;;  %v6156_v20 = vpack.c.bf16 %v197_v49, %v193_v62  ;;  %v228_v49 = vld [vmem:[#allocation5 + $0x560] sm:$0xff] }
 0x710   :  { %v1683_v22 = vmul.f32 0.5, %v5462_v6  ;;  %v5464_v31 = vpop.eup %5463  ;;  %v201_v6 = vld [vmem:[#allocation5 + $0x488] sm:$0xff] }
 0x711   :  { %v1680_v25 = vadd.f32 0.5, %v1679_v21  ;;  %v5466_v40 = vpop.eup %5465  ;;  %v6158_v21 = vpack.c.bf16 %v199_v56, %v195_v52  ;;  %v233_v52 = vld [vmem:[#allocation5 + $0x588] sm:$0xff] }
 0x712   :  { %v1684_v32 = vadd.f32 0.5, %v1683_v22  ;;  %v1688_v41 = vmul.f32 0.5, %v5466_v40  ;;  %v194_v22 = vld [vmem:[#allocation5 + $0x450] sm:$0xff]  ;;  %v204_v40 = vld [vmem:[#allocation5 + $0x4a0] sm:$0xff]  ;;  %v237_v56 = vld [vmem:[#allocation5 + $0x5a8] sm:$0xff] }
 0x713   :  { %v1691_v33 = vmul.f32 %v5464_v31, %v1680_v25  ;;  %v198_v25 = vld [vmem:[#allocation5 + $0x470] sm:$0xff]  ;;  %v205_v31 = vld [vmem:[#allocation5 + $0x4a8] sm:$0xff] }
 0x714   :  { %v1690_v36 = vmul.f32 %v1684_v32, %v6061_v46  ;;  %v1689_v59 = vadd.f32 0.5, %v1688_v41  ;;  %v188_v46 = vld [vmem:[#allocation5 + $0x420] sm:$0xff]  ;;  %v203_v32 = vld [vmem:[#allocation5 + $0x498] sm:$0xff]  ;;  %v6164_v41 = vpack.c.bf16 %v198_v25, %v194_v22 }
 0x715   :  { %v231_v22 = vld [vmem:[#allocation5 + $0x578] sm:$0xff] }
 0x716   :  { %v6103_v39 = vadd.f32 %v1691_v33, %v1690_v36  ;;  %v207_v33 = vld [vmem:[#allocation5 + $0x4b8] sm:$0xff]  ;;  %v6161_v36 = vpack.c.bf16 %v196_v14, %v192_v13  ;;  %v232_v13 = vld [vmem:[#allocation5 + $0x580] sm:$0xff] }
 0x717   :  { %v236_v14 = vld [vmem:[#allocation5 + $0x5a0] sm:$0xff] }
 0x718   :  { %5467 = vtanh.f32 %v6103_v39 }
 0x722   :  { %v5468_v60 = vpop.eup %5467 }
 0x723   :  { %v1694_v61 = vmul.f32 %v5468_v60, %v1689_v59  ;;  %v6167_v59 = vpack.c.bf16 %v205_v31, %v201_v6  ;;  %v209_v60 = vld [vmem:[#allocation5 + $0x4c8] sm:$0xff]  ;;  %v227_v6 = vld [vmem:[#allocation5 + $0x558] sm:$0xff]  ;;  %v226_v31 = vld [vmem:[#allocation5 + $0x550] sm:$0xff] }
 0x724   :  { %v6217_v25 = vpack.c.bf16 %v231_v22, %v227_v6  ;;  %v260_v6 = vld [vmem:[#allocation5 + $0x660] sm:$0xff] }
 0x725   :  { %1760 = vmatmul.mubr.f32.vlgmr.msra.gmra.mrb[12].mxu1 %v1694_v61  ;;  %1831 = vmatmul.mubr.f32.vlgmr.msra.gmra.mrb[20].mxu0 %v1694_v61  ;;  %v6170_v61 = vpack.c.bf16 %v207_v33, %v203_v32  ;;  %v230_v32 = vld [vmem:[#allocation5 + $0x570] sm:$0xff] }
 0x726   :  { %4361 = vmatpush1.bf16.msra.mxu1 %v5729_v15  ;;  %4393 = vmatpush1.bf16.msra.mxu0 %v5731_v16  ;;  %v185_v15 = vld [vmem:[#allocation5 + $0x408] sm:$0xff]  ;;  %v6220_v33 = vpack.c.bf16 %v230_v32, %v226_v31  ;;  %v251_v31 = vld [vmem:[#allocation5 + $0x618] sm:$0xff] }
 0x727   :  { %4363 = vmatprep.subr.bf16.mxu1 %v5733_v23  ;;  %4395 = vmatprep.subr.bf16.mxu0 %v5735_v24  ;;  %v189_v16 = vld [vmem:[#allocation5 + $0x428] sm:$0xff]  ;;  %v187_v24 = vld [vmem:[#allocation5 + $0x418] sm:$0xff] }
 0x728   :  { %1923 = vmatprep.mubr.f32.mxu1 %v6865_v5  ;;  %1994 = vmatprep.mubr.f32.mxu0 %v6865_v5  ;;  %v6138_v23 = vpack.c.bf16 %v189_v16, %v185_v15  ;;  %v202_v15 = vld [vmem:[#allocation5 + $0x490] sm:$0xff]  ;;  %6992 = vst [vmem:[#allocation23_spill] sm:$0xff] %v6220_v33  ;;  %v255_v32 = vld [vmem:[#allocation5 + $0x638] sm:$0xff]  ;;  %v288_v5 = vld [vmem:[#allocation5 + $0x740] sm:$0xff] }
 0x729   :  { %v206_v16 = vld [vmem:[#allocation5 + $0x4b0] sm:$0xff] }
 0x72a   :  { %4365 = vmatpush1.bf16.msra.mxu1 %v5739_v29  ;;  %4397 = vmatpush1.bf16.msra.mxu0 %v5741_v30  ;;  %6981 = vst [vmem:[#allocation12_spill] sm:$0xff] %v6138_v23  ;;  %v191_v29 = vld [vmem:[#allocation5 + $0x438] sm:$0xff] }
 0x72b   :  { %4367 = vmatprep.subr.bf16.mxu1 %v5747_v37  ;;  %4399 = vmatprep.subr.bf16.mxu0 %v5749_v38  ;;  %v6141_v30 = vpack.c.bf16 %v191_v29, %v187_v24  ;;  %v213_v24 = vld [vmem:[#allocation5 + $0x4e8] sm:$0xff]  ;;  %v211_v29 = vld [vmem:[#allocation5 + $0x4d8] sm:$0xff] }
 0x72d   :  { %6982 = vst [vmem:[#allocation13_spill] sm:$0xff] %v6141_v30 }
 0x72e   :  { %4369 = vmatpush1.bf16.msra.mxu1 %v5753_v43  ;;  %4401 = vmatpush1.bf16.msra.mxu0 %v5755_v44 }
 0x72f   :  { %4371 = vmatprep.subr.bf16.mxu1 %v5763_v50  ;;  %4403 = vmatprep.subr.bf16.mxu0 %v5765_v51 }
 0x732   :  { %4373 = vmatpush1.bf16.msra.mxu1 %v5769_v57  ;;  %4405 = vmatpush1.bf16.msra.mxu0 %v5771_v58 }
 0x733   :  { %4375 = vmatprep.subr.bf16.mxu1 %v5779_v0  ;;  %4407 = vmatprep.subr.bf16.mxu0 %v5781_v1 }
 0x736   :  { %4377 = vmatpush1.bf16.msra.mxu1 %v5785_v10  ;;  %4409 = vmatpush1.bf16.msra.mxu0 %v5787_v11 }
 0x737   :  { %4379 = vmatprep.subr.bf16.mxu1 %v5793_v18  ;;  %4411 = vmatprep.subr.bf16.mxu0 %v5795_v19 }
 0x73a   :  { %4381 = vmatpush1.bf16.msra.mxu1 %v5799_v26  ;;  %4413 = vmatpush1.bf16.msra.mxu0 %v5801_v27 }
 0x73b   :  { %4383 = vmatprep.subr.bf16.mxu1 %v5807_v34  ;;  %4415 = vmatprep.subr.bf16.mxu0 %v5809_v35 }
 0x73e   :  { %4385 = vmatpush1.bf16.msra.mxu1 %v5815_v42  ;;  %4417 = vmatpush1.bf16.msra.mxu0 %v5817_v45 }
 0x73f   :  { %4387 = vmatprep.subr.bf16.mxu1 %v5823_v47  ;;  %4419 = vmatprep.subr.bf16.mxu0 %v5825_v53 }
 0x742   :  { %4389 = vmatpush1.bf16.msra.mxu1 %v5829_v54  ;;  %4421 = vmatpush1.bf16.msra.mxu0 %v5831_v55  ;;  %v184_v55 = vld [vmem:[#allocation5 + $0x400] sm:$0xff] }
 0x743   :  { %4423 = vmatprep.subr.bf16.mxu1 %v6138_v23  ;;  %4487 = vmatprep.subr.bf16.mxu0 %v6141_v30  ;;  %v6152_v9 = vpack.c.bf16 %v188_v46, %v184_v55  ;;  %v229_v55 = vld [vmem:[#allocation5 + $0x568] sm:$0xff] }
 0x7f8   :  { %v1761_v37 = vpop.f32.mrb[12].mxu1  ;;  %v1832_v38 = vpop.f32.mrb[20].mxu0 }
 0x7f9   :  { %v5346_v43 = vadd.f32 %v1761_v37, %v5881_v63  ;;  %v1763_v44 = vpop.f32.mrb[13].mxu1  ;;  %v1834_v50 = vpop.f32.mrb[21].mxu0  ;;  %v5362_v0 = vadd.f32 %v1832_v38, %v5886_v12  ;;  %v215_v37 = vld [vmem:[#allocation5 + $0x4f8] sm:$0xff] }
 0x7fa   :  { %v5347_v51 = vadd.f32 %v1763_v44, %v5883_v4  ;;  %v5363_v1 = vadd.f32 %v1834_v50, %v5890_v28  ;;  %v212_v44 = vld [vmem:[#allocation5 + $0x4e0] sm:$0xff]  ;;  %v6176_v50 = vpack.c.bf16 %v206_v16, %v202_v15 }
 0x7fb   :  { %v1841_v57 = vmul.f32 0.5, %v5346_v43  ;;  %v208_v43 = vld [vmem:[#allocation5 + $0x4c0] sm:$0xff] }
 0x7fc   :  { %v1845_v58 = vmul.f32 0.5, %v5347_v51  ;;  %v1850_v10 = vmul.f32 0.5, %v5363_v1  ;;  %v6179_v51 = vpack.c.bf16 %v213_v24, %v209_v60  ;;  %v214_v1 = vld [vmem:[#allocation5 + $0x4f0] sm:$0xff]  ;;  %v240_v15 = vld [vmem:[#allocation5 + $0x5c0] sm:$0xff] }
 0x7fd   :  { %5469 = vtanh.f32 %v1841_v57  ;;  %v217_v57 = vld [vmem:[#allocation5 + $0x508] sm:$0xff]  ;;  %v244_v16 = vld [vmem:[#allocation5 + $0x5e0] sm:$0xff] }
 0x7fe   :  { %5471 = vtanh.f32 %v1845_v58  ;;  %6984 = vst [vmem:[#allocation15_spill] sm:$0xff] %v6179_v51  ;;  %v6182_v58 = vpack.c.bf16 %v215_v37, %v211_v29  ;;  %v6226_v24 = vpack.c.bf16 %v244_v16, %v240_v15  ;;  %v235_v29 = vld [vmem:[#allocation5 + $0x598] sm:$0xff]  ;;  %v254_v15 = vld [vmem:[#allocation5 + $0x630] sm:$0xff] }
 0x7ff   :  { %5473 = vtanh.f32 %v5362_v0  ;;  %v210_v0 = vld [vmem:[#allocation5 + $0x4d0] sm:$0xff]  ;;  %v239_v37 = vld [vmem:[#allocation5 + $0x5b8] sm:$0xff] }
 0x800   :  { %5475 = vtanh.f32 %v1850_v10  ;;  %v221_v10 = vld [vmem:[#allocation5 + $0x528] sm:$0xff]  ;;  %6994 = vst [vmem:[#allocation25_spill] sm:$0xff] %v6226_v24 }
 0x807   :  { %v5470_v11 = vpop.eup %5469 }
 0x808   :  { %v5472_v18 = vpop.eup %5471  ;;  %v1843_v19 = vmul.f32 0.5, %v5470_v11  ;;  %v219_v11 = vld [vmem:[#allocation5 + $0x518] sm:$0xff] }
 0x809   :  { %v1847_v26 = vmul.f32 0.5, %v5472_v18  ;;  %v5474_v34 = vpop.eup %5473  ;;  %v223_v18 = vld [vmem:[#allocation5 + $0x538] sm:$0xff] }
 0x80a   :  { %v1844_v27 = vadd.f32 0.5, %v1843_v19  ;;  %v5476_v53 = vpop.eup %5475  ;;  %v6185_v19 = vpack.c.bf16 %v212_v44, %v208_v43  ;;  %v6229_v43 = vpack.c.bf16 %v239_v37, %v235_v29  ;;  %v234_v44 = vld [vmem:[#allocation5 + $0x590] sm:$0xff]  ;;  %v265_v29 = vld [vmem:[#allocation5 + $0x688] sm:$0xff] }
 0x80b   :  { %v1848_v35 = vadd.f32 0.5, %v1847_v26  ;;  %v1852_v54 = vmul.f32 0.5, %v5476_v53  ;;  %v216_v26 = vld [vmem:[#allocation5 + $0x500] sm:$0xff]  ;;  %v222_v53 = vld [vmem:[#allocation5 + $0x530] sm:$0xff]  ;;  %v269_v37 = vld [vmem:[#allocation5 + $0x6a8] sm:$0xff] }
 0x80c   :  { %v1855_v42 = vmul.f32 %v5474_v34, %v1844_v27  ;;  %6985 = vst [vmem:[#allocation16_spill] sm:$0xff] %v6185_v19  ;;  %v6188_v27 = vpack.c.bf16 %v214_v1, %v210_v0  ;;  %v6191_v34 = vpack.c.bf16 %v221_v10, %v217_v57  ;;  %6995 = vst [vmem:[#allocation26_spill] sm:$0xff] %v6229_v43  ;;  %v238_v57 = vld [vmem:[#allocation5 + $0x5b0] sm:$0xff]  ;;  %v249_v1 = vld [vmem:[#allocation5 + $0x608] sm:$0xff] }
 0x80d   :  { %v1854_v45 = vmul.f32 %v1848_v35, %v6103_v39  ;;  %v1853_v7 = vadd.f32 0.5, %v1852_v54  ;;  %v200_v39 = vld [vmem:[#allocation5 + $0x480] sm:$0xff]  ;;  %v225_v54 = vld [vmem:[#allocation5 + $0x548] sm:$0xff]  ;;  %v6232_v0 = vpack.c.bf16 %v238_v57, %v234_v44  ;;  %v6259_v44 = vpack.c.bf16 %v269_v37, %v265_v29  ;;  %v266_v37 = vld [vmem:[#allocation5 + $0x690] sm:$0xff] }
 0x80e   :  { %v6173_v38 = vpack.c.bf16 %v204_v40, %v200_v39  ;;  %6986 = vst [vmem:[#allocation17_spill] sm:$0xff] %v6191_v34  ;;  %v220_v35 = vld [vmem:[#allocation5 + $0x520] sm:$0xff]  ;;  %v6203_v2 = vpack.c.bf16 %v229_v55, %v225_v54  ;;  %v241_v39 = vld [vmem:[#allocation5 + $0x5c8] sm:$0xff]  ;;  %v242_v55 = vld [vmem:[#allocation5 + $0x5d0] sm:$0xff] }
 0x80f   :  { %v6149_v47 = vadd.f32 %v1855_v42, %v1854_v45  ;;  %v6194_v42 = vpack.c.bf16 %v223_v18, %v219_v11  ;;  %v218_v45 = vld [vmem:[#allocation5 + $0x510] sm:$0xff]  ;;  %v6197_v46 = vpack.c.bf16 %v220_v35, %v216_v26  ;;  %v245_v40 = vld [vmem:[#allocation5 + $0x5e8] sm:$0xff]  ;;  %6996 = vst [vmem:[#allocation27_spill] sm:$0xff] %v6232_v0  ;;  %v248_v18 = vld [vmem:[#allocation5 + $0x600] sm:$0xff] }
 0x810   :  { %6983 = vst [vmem:[#allocation14_spill] sm:$0xff] %v6173_v38  ;;  %v6200_v62 = vpack.c.bf16 %v222_v53, %v218_v45  ;;  %6988 = vst [vmem:[#allocation19_spill] sm:$0xff] %v6203_v2  ;;  %v6223_v60 = vpack.c.bf16 %v245_v40, %v241_v39  ;;  %v253_v10 = vld [vmem:[#allocation5 + $0x628] sm:$0xff]  ;;  %v252_v26 = vld [vmem:[#allocation5 + $0x620] sm:$0xff]  ;;  %v6253_v39 = vpack.c.bf16 %v255_v32, %v251_v31 }
 0x811   :  { %5477 = vtanh.f32 %v6149_v47  ;;  %6987 = vst [vmem:[#allocation18_spill] sm:$0xff] %v6197_v46  ;;  %v6235_v11 = vpack.c.bf16 %v253_v10, %v249_v1  ;;  %v6238_v35 = vpack.c.bf16 %v252_v26, %v248_v18  ;;  %v243_v45 = vld [vmem:[#allocation5 + $0x5d8] sm:$0xff]  ;;  %v250_v40 = vld [vmem:[#allocation5 + $0x610] sm:$0xff]  ;;  %7005 = vst [vmem:[#allocation36_spill] sm:$0xff] %v6259_v44 }
 0x812   :  { %6993 = vst [vmem:[#allocation24_spill] sm:$0xff] %v6223_v60  ;;  %v247_v53 = vld [vmem:[#allocation5 + $0x5f8] sm:$0xff]  ;;  %7003 = vst [vmem:[#allocation34_spill] sm:$0xff] %v6253_v39  ;;  %v6256_v16 = vpack.c.bf16 %v254_v15, %v250_v40  ;;  %v264_v57 = vld [vmem:[#allocation5 + $0x680] sm:$0xff] }
 0x813   :  { %6997 = vst [vmem:[#allocation28_spill] sm:$0xff] %v6235_v11  ;;  %6998 = vst [vmem:[#allocation29_spill] sm:$0xff] %v6238_v35  ;;  %v6241_v54 = vpack.c.bf16 %v247_v53, %v243_v45  ;;  %v268_v1 = vld [vmem:[#allocation5 + $0x6a0] sm:$0xff]  ;;  %v259_v18 = vld [vmem:[#allocation5 + $0x658] sm:$0xff] }
 0x814   :  { %7004 = vst [vmem:[#allocation35_spill] sm:$0xff] %v6256_v16  ;;  %v6262_v10 = vpack.c.bf16 %v268_v1, %v264_v57  ;;  %v263_v26 = vld [vmem:[#allocation5 + $0x678] sm:$0xff]  ;;  %v258_v53 = vld [vmem:[#allocation5 + $0x650] sm:$0xff]  ;;  %v276_v31 = vld [vmem:[#allocation5 + $0x6e0] sm:$0xff] }
 0x815   :  { %6999 = vst [vmem:[#allocation30_spill] sm:$0xff] %v6241_v54  ;;  %v6265_v45 = vpack.c.bf16 %v263_v26, %v259_v18  ;;  %v267_v40 = vld [vmem:[#allocation5 + $0x698] sm:$0xff]  ;;  %v270_v57 = vld [vmem:[#allocation5 + $0x6b0] sm:$0xff]  ;;  %v281_v18 = vld [vmem:[#allocation5 + $0x708] sm:$0xff] }
 0x816   :  { %7006 = vst [vmem:[#allocation37_spill] sm:$0xff] %v6262_v10  ;;  %v271_v15 = vld [vmem:[#allocation5 + $0x6b8] sm:$0xff]  ;;  %v6280_v1 = vpack.c.bf16 %v270_v57, %v266_v37  ;;  %v285_v26 = vld [vmem:[#allocation5 + $0x728] sm:$0xff]  ;;  %v278_v37 = vld [vmem:[#allocation5 + $0x6f0] sm:$0xff] }
 0x817   :  { %7007 = vst [vmem:[#allocation38_spill] sm:$0xff] %v6265_v45  ;;  %v6277_v29 = vpack.c.bf16 %v271_v15, %v267_v40  ;;  %v274_v15 = vld [vmem:[#allocation5 + $0x6d0] sm:$0xff] }
 0x818   :  { %7012 = vst [vmem:[#allocation43_spill] sm:$0xff] %v6280_v1  ;;  %v6292_v57 = vpack.c.bf16 %v278_v37, %v274_v15  ;;  %v297_v15 = vld [vmem:[#allocation5 + $0x788] sm:$0xff] }
 0x819   :  { %7011 = vst [vmem:[#allocation42_spill] sm:$0xff] %v6277_v29 }
 0x81a   :  { %7016 = vst [vmem:[#allocation47_spill] sm:$0xff] %v6292_v57 }
 0x81b   :  { %v5478_v8 = vpop.eup %5477 }
 0x81c   :  { %v1858_v3 = vmul.f32 %v5478_v8, %v1853_v7  ;;  %v6207_v7 = vpack.c.bf16 %v228_v49, %v224_v48  ;;  %v6211_v8 = vpack.c.bf16 %v237_v56, %v233_v52  ;;  %v246_v48 = vld [vmem:[#allocation5 + $0x5f0] sm:$0xff]  ;;  %v257_v52 = vld [vmem:[#allocation5 + $0x648] sm:$0xff] }
 0x81d   :  { %v6244_v49 = vpack.c.bf16 %v246_v48, %v242_v55  ;;  %v261_v56 = vld [vmem:[#allocation5 + $0x668] sm:$0xff]  ;;  %v262_v55 = vld [vmem:[#allocation5 + $0x670] sm:$0xff] }
 0x81e   :  { %1924 = vmatmul.mubr.f32.vlgmr.msra.gmra.mrb[14].mxu1 %v1858_v3  ;;  %1995 = vmatmul.mubr.f32.vlgmr.msra.gmra.mrb[22].mxu0 %v1858_v3  ;;  %6989 = vst [vmem:[#allocation20_spill] sm:$0xff] %v6207_v7  ;;  %6990 = vst [vmem:[#allocation21_spill] sm:$0xff] %v6211_v8  ;;  %v6215_v3 = vpack.c.bf16 %v236_v14, %v232_v13  ;;  %v6247_v13 = vpack.c.bf16 %v261_v56, %v257_v52  ;;  %v256_v14 = vld [vmem:[#allocation5 + $0x640] sm:$0xff]  ;;  %v273_v52 = vld [vmem:[#allocation5 + $0x6c8] sm:$0xff] }
 0x81f   :  { %4425 = vmatpush1.bf16.msra.mxu1 %v6152_v9  ;;  %4489 = vmatpush1.bf16.msra.mxu0 %v6154_v17  ;;  %7000 = vst [vmem:[#allocation31_spill] sm:$0xff] %v6244_v49  ;;  %v6250_v22 = vpack.c.bf16 %v260_v6, %v256_v14  ;;  %v6268_v48 = vpack.c.bf16 %v262_v55, %v258_v53  ;;  %v277_v56 = vld [vmem:[#allocation5 + $0x6e8] sm:$0xff]  ;;  %v272_v6 = vld [vmem:[#allocation5 + $0x6c0] sm:$0xff] }
 0x820   :  { %4427 = vmatprep.subr.bf16.mxu1 %v6156_v20  ;;  %4491 = vmatprep.subr.bf16.mxu0 %v6158_v21  ;;  %6991 = vst [vmem:[#allocation22_spill] sm:$0xff] %v6215_v3  ;;  %7001 = vst [vmem:[#allocation32_spill] sm:$0xff] %v6247_v13  ;;  %v6271_v14 = vpack.c.bf16 %v277_v56, %v273_v52  ;;  %v6274_v32 = vpack.c.bf16 %v276_v31, %v272_v6  ;;  %v280_v55 = vld [vmem:[#allocation5 + $0x700] sm:$0xff]  ;;  %v275_v6 = vld [vmem:[#allocation5 + $0x6d8] sm:$0xff] }
 0x821   :  { %7002 = vst [vmem:[#allocation33_spill] sm:$0xff] %v6250_v22  ;;  %7008 = vst [vmem:[#allocation39_spill] sm:$0xff] %v6268_v48  ;;  %v6283_v53 = vpack.c.bf16 %v285_v26, %v281_v18  ;;  %v284_v52 = vld [vmem:[#allocation5 + $0x720] sm:$0xff]  ;;  %v279_v31 = vld [vmem:[#allocation5 + $0x6f8] sm:$0xff] }
 0x822   :  { %7009 = vst [vmem:[#allocation40_spill] sm:$0xff] %v6271_v14  ;;  %7010 = vst [vmem:[#allocation41_spill] sm:$0xff] %v6274_v32  ;;  %v6286_v56 = vpack.c.bf16 %v284_v52, %v280_v55  ;;  %v6289_v40 = vpack.c.bf16 %v279_v31, %v275_v6  ;;  %v289_v18 = vld [vmem:[#allocation5 + $0x748] sm:$0xff]  ;;  %v292_v55 = vld [vmem:[#allocation5 + $0x760] sm:$0xff] }
 0x823   :  { %4429 = vmatpush1.bf16.msra.mxu1 %v6161_v36  ;;  %4493 = vmatpush1.bf16.msra.mxu0 %v6164_v41  ;;  %7013 = vst [vmem:[#allocation44_spill] sm:$0xff] %v6283_v53  ;;  %v293_v26 = vld [vmem:[#allocation5 + $0x768] sm:$0xff]  ;;  %v283_v52 = vld [vmem:[#allocation5 + $0x718] sm:$0xff]  ;;  %v6298_v6 = vpack.c.bf16 %v292_v55, %v288_v5 }
 0x824   :  { %4431 = vmatprep.subr.bf16.mxu1 %v6167_v59  ;;  %4495 = vmatprep.subr.bf16.mxu0 %v6170_v61  ;;  %7014 = vst [vmem:[#allocation45_spill] sm:$0xff] %v6286_v56  ;;  %7015 = vst [vmem:[#allocation46_spill] sm:$0xff] %v6289_v40  ;;  %v295_v55 = vld [vmem:[#allocation5 + $0x778] sm:$0xff] }
 0x825   :  { %7018 = vst [vmem:[#allocation49_spill] sm:$0xff] %v6298_v6 }
 0x827   :  { %4433 = vmatpush1.bf16.msra.mxu1 %v6173_v38  ;;  %4497 = vmatpush1.bf16.msra.mxu0 %v6176_v50 }
 0x828   :  { %4435 = vmatprep.subr.bf16.mxu1 %v6179_v51  ;;  %4499 = vmatprep.subr.bf16.mxu0 %v6182_v58 }
 0x82b   :  { %4437 = vmatpush1.bf16.msra.mxu1 %v6185_v19  ;;  %4501 = vmatpush1.bf16.msra.mxu0 %v6188_v27 }
 0x82c   :  { %4439 = vmatprep.subr.bf16.mxu1 %v6191_v34  ;;  %4503 = vmatprep.subr.bf16.mxu0 %v6194_v42 }
 0x82f   :  { %4441 = vmatpush1.bf16.msra.mxu1 %v6197_v46  ;;  %4505 = vmatpush1.bf16.msra.mxu0 %v6200_v62 }
 0x830   :  { %4443 = vmatprep.subr.bf16.mxu1 %v6203_v2  ;;  %4507 = vmatprep.subr.bf16.mxu0 %v6217_v25 }
 0x833   :  { %4445 = vmatpush1.bf16.msra.mxu1 %v6207_v7  ;;  %4509 = vmatpush1.bf16.msra.mxu0 %v6220_v33 }
 0x834   :  { %4447 = vmatprep.subr.bf16.mxu1 %v6211_v8  ;;  %4511 = vmatprep.subr.bf16.mxu0 %v6229_v43 }
 0x837   :  { %4449 = vmatpush1.bf16.msra.mxu1 %v6215_v3  ;;  %4513 = vmatpush1.bf16.msra.mxu0 %v6232_v0 }
 0x838   :  { %4451 = vmatprep.subr.bf16.mxu1 %v6223_v60  ;;  %4515 = vmatprep.subr.bf16.mxu0 %v6241_v54 }
 0x83b   :  { %4453 = vmatpush1.bf16.msra.mxu1 %v6226_v24  ;;  %4517 = vmatpush1.bf16.msra.mxu0 %v6244_v49  ;;  %v305_v49 = vld [vmem:[#allocation5 + $0x7c8] sm:$0xff] }
 0x83c   :  { %4455 = vmatprep.subr.bf16.mxu1 %v6235_v11  ;;  %4519 = vmatprep.subr.bf16.mxu0 %v6253_v39  ;;  %v294_v39 = vld [vmem:[#allocation5 + $0x770] sm:$0xff] }
 0x83f   :  { %4457 = vmatpush1.bf16.msra.mxu1 %v6238_v35  ;;  %4521 = vmatpush1.bf16.msra.mxu0 %v6256_v16  ;;  %v301_v16 = vld [vmem:[#allocation5 + $0x7a8] sm:$0xff] }
 0x840   :  { %4459 = vmatprep.subr.bf16.mxu1 %v6247_v13  ;;  %4523 = vmatprep.subr.bf16.mxu0 %v6265_v45  ;;  %v286_v45 = vld [vmem:[#allocation5 + $0x730] sm:$0xff] }
 0x843   :  { %4461 = vmatpush1.bf16.msra.mxu1 %v6250_v22  ;;  %4525 = vmatpush1.bf16.msra.mxu0 %v6268_v48  ;;  %v282_v48 = vld [vmem:[#allocation5 + $0x710] sm:$0xff] }
 0x844   :  { %4463 = vmatprep.subr.bf16.mxu1 %v6259_v44  ;;  %4527 = vmatprep.subr.bf16.mxu0 %v6277_v29  ;;  %v287_v29 = vld [vmem:[#allocation5 + $0x738] sm:$0xff]  ;;  %v6303_v37 = vpack.c.bf16 %v286_v45, %v282_v48  ;;  %v309_v45 = vld [vmem:[#allocation5 + $0x7e8] sm:$0xff] }
 0x845   :  { %v6300_v31 = vpack.c.bf16 %v287_v29, %v283_v52  ;;  %v291_v29 = vld [vmem:[#allocation5 + $0x758] sm:$0xff]  ;;  %v290_v52 = vld [vmem:[#allocation5 + $0x750] sm:$0xff]  ;;  %v6317_v54 = vpack.c.bf16 %v309_v45, %v305_v49 }
 0x846   :  { %7020 = vst [vmem:[#allocation51_spill] sm:$0xff] %v6303_v37  ;;  %v6315_v48 = vpack.c.bf16 %v294_v39, %v290_v52  ;;  %v298_v49 = vld [vmem:[#allocation5 + $0x790] sm:$0xff]  ;;  %v307_v45 = vld [vmem:[#allocation5 + $0x7d8] sm:$0xff] }
 0x847   :  { %4465 = vmatpush1.bf16.msra.mxu1 %v6262_v10  ;;  %4529 = vmatpush1.bf16.msra.mxu0 %v6280_v1  ;;  %v6295_v1 = vpack.c.bf16 %v293_v26, %v289_v18  ;;  %7019 = vst [vmem:[#allocation50_spill] sm:$0xff] %v6300_v31  ;;  %v300_v18 = vld [vmem:[#allocation5 + $0x7a0] sm:$0xff]  ;;  %v6307_v26 = vpack.c.bf16 %v301_v16, %v297_v15  ;;  %7025 = vst [vmem:[#allocation56_spill] sm:$0xff] %v6317_v54  ;;  %v302_v39 = vld [vmem:[#allocation5 + $0x7b0] sm:$0xff] }
 0x848   :  { %4467 = vmatprep.subr.bf16.mxu1 %v6271_v14  ;;  %4531 = vmatprep.subr.bf16.mxu0 %v6289_v40  ;;  %v296_v40 = vld [vmem:[#allocation5 + $0x780] sm:$0xff]  ;;  %7024 = vst [vmem:[#allocation55_spill] sm:$0xff] %v6315_v48  ;;  %v6329_v52 = vpack.c.bf16 %v302_v39, %v298_v49 }
 0x849   :  { %7017 = vst [vmem:[#allocation48_spill] sm:$0xff] %v6295_v1  ;;  %7021 = vst [vmem:[#allocation52_spill] sm:$0xff] %v6307_v26  ;;  %v6309_v5 = vpack.c.bf16 %v300_v18, %v296_v40  ;;  %v304_v16 = vld [vmem:[#allocation5 + $0x7c0] sm:$0xff]  ;;  %v299_v40 = vld [vmem:[#allocation5 + $0x798] sm:$0xff] }
 0x84a   :  { %v308_v15 = vld [vmem:[#allocation5 + $0x7e0] sm:$0xff]  ;;  %v303_v18 = vld [vmem:[#allocation5 + $0x7b8] sm:$0xff]  ;;  %7028 = vst [vmem:[#allocation59_spill] sm:$0xff] %v6329_v52 }
 0x84b   :  { %4469 = vmatpush1.bf16.msra.mxu1 %v6274_v32  ;;  %4533 = vmatpush1.bf16.msra.mxu0 %v6292_v57  ;;  %7022 = vst [vmem:[#allocation53_spill] sm:$0xff] %v6309_v5  ;;  %v6311_v57 = vpack.c.bf16 %v295_v55, %v291_v29  ;;  %v6321_v29 = vpack.c.bf16 %v308_v15, %v304_v16  ;;  %v306_v16 = vld [vmem:[#allocation5 + $0x7d0] sm:$0xff] }
 0x84c   :  { %4471 = vmatprep.subr.bf16.mxu1 %v6283_v53  ;;  %4535 = vmatprep.subr.bf16.mxu0 %v6300_v31  ;;  %v6323_v55 = vpack.c.bf16 %v303_v18, %v299_v40  ;;  %v310_v40 = vld [vmem:[#allocation5 + $0x7f0] sm:$0xff] }
 0x84d   :  { %7023 = vst [vmem:[#allocation54_spill] sm:$0xff] %v6311_v57  ;;  %7026 = vst [vmem:[#allocation57_spill] sm:$0xff] %v6321_v29  ;;  %v6334_v18 = vpack.c.bf16 %v310_v40, %v306_v16 }
 0x84e   :  { %7027 = vst [vmem:[#allocation58_spill] sm:$0xff] %v6323_v55 }
 0x84f   :  { %4473 = vmatpush1.bf16.msra.mxu1 %v6286_v56  ;;  %4537 = vmatpush1.bf16.msra.mxu0 %v6303_v37  ;;  %7030 = vst [vmem:[#allocation61_spill] sm:$0xff] %v6334_v18 }
 0x850   :  { %4475 = vmatprep.subr.bf16.mxu1 %v6295_v1  ;;  %4539 = vmatprep.subr.bf16.mxu0 %v6311_v57  ;;  %v311_v57 = vld [vmem:[#allocation5 + $0x7f8] sm:$0xff] }
 0x851   :  { %v6332_v15 = vpack.c.bf16 %v311_v57, %v307_v45 }
 0x853   :  { %4477 = vmatpush1.bf16.msra.mxu1 %v6298_v6  ;;  %4541 = vmatpush1.bf16.msra.mxu0 %v6315_v48  ;;  %7029 = vst [vmem:[#allocation60_spill] sm:$0xff] %v6332_v15 }
 0x854   :  { %4479 = vmatprep.subr.bf16.mxu1 %v6307_v26  ;;  %4543 = vmatprep.subr.bf16.mxu0 %v6323_v55 }
 0x857   :  { %4481 = vmatpush1.bf16.msra.mxu1 %v6309_v5  ;;  %4545 = vmatpush1.bf16.msra.mxu0 %v6329_v52 }
 0x858   :  { %4483 = vmatprep.subr.bf16.mxu1 %v6317_v54  ;;  %4547 = vmatprep.subr.bf16.mxu0 %v6332_v15 }
 0x85b   :  { %4485 = vmatpush1.bf16.msra.mxu1 %v6321_v29  ;;  %4549 = vmatpush1.bf16.msra.mxu0 %v6334_v18 }
 0x85c   :  { %4575 = vmatprep.subr.bf16.mxu0 %v6138_v23 }
 0x8f1   :  { %v1925_v55 = vpop.f32.mrb[14].mxu1  ;;  %v1996_v48 = vpop.f32.mrb[22].mxu0 }
 0x8f2   :  { %v5348_v49 = vadd.f32 %v1925_v55, %v5881_v63  ;;  %v1927_v39 = vpop.f32.mrb[15].mxu1  ;;  %v1998_v52 = vpop.f32.mrb[23].mxu0  ;;  %v5364_v45 = vadd.f32 %v1996_v48, %v5886_v12 }
 0x8f3   :  { %v5349_v37 = vadd.f32 %v1927_v39, %v5883_v4  ;;  %v5365_v16 = vadd.f32 %v1998_v52, %v5890_v28  ;;  %v338_v39 = vld [vmem:[#allocation7 + $0xa0] sm:$0xff] }
 0x8f4   :  { %v2005_v31 = vmul.f32 0.5, %v5348_v49  ;;  %v2024_v49 = vld [vmem:[#allocation2 + $0x38] sm:$0xff] }
 0x8f5   :  { %v2009_v57 = vmul.f32 0.5, %v5349_v37  ;;  %v2014_v40 = vmul.f32 0.5, %v5365_v16  ;;  %v340_v16 = vld [vmem:[#allocation7 + $0xb0] sm:$0xff] }
 0x8f6   :  { %5479 = vtanh.f32 %v2005_v31 }
 0x8f7   :  { %5481 = vtanh.f32 %v2009_v57  ;;  %v339_v57 = vld [vmem:[#allocation7 + $0xa8] sm:$0xff] }
 0x8f8   :  { %5483 = vtanh.f32 %v5364_v45  ;;  %v6388_v45 = vpack.c.bf16 %v339_v57, %v338_v39  ;;  %v7036_v39 = vmov 0.0   ;;  %v6414_v57 = vld [vmem:[#allocation5 + $0x820] sm:$0xff] }
 0x8f9   :  { %5485 = vtanh.f32 %v2014_v40  ;;  %v341_v40 = vld [vmem:[#allocation7 + $0xb8] sm:$0xff]  ;;  %7037 = vst [vmem:[#allocation67_spill] sm:$0xff] %v6414_v57 }
 0x900   :  { %v5480_v18 = vpop.eup %5479 }
 0x901   :  { %v5482_v23 = vpop.eup %5481  ;;  %v2007_v15 = vmul.f32 0.5, %v5480_v18 }
 0x902   :  { %v2011_v0 = vmul.f32 0.5, %v5482_v23  ;;  %v5484_v55 = vpop.eup %5483  ;;  %v334_v23 = vld [vmem:[#allocation7 + $0x80] sm:$0xff] }
 0x903   :  { %v2008_v63 = vadd.f32 0.5, %v2007_v15  ;;  %v5486_v12 = vpop.eup %5485  ;;  %v337_v15 = vld [vmem:[#allocation7 + $0x98] sm:$0xff] }
 0x904   :  { %v2012_v43 = vadd.f32 0.5, %v2011_v0  ;;  %v2016_v31 = vmul.f32 0.5, %v5486_v12  ;;  %v336_v0 = vld [vmem:[#allocation7 + $0x90] sm:$0xff] }
 0x905   :  { %v2019_v33 = vmul.f32 %v5484_v55, %v2008_v63  ;;  %v6384_v18 = vpack.c.bf16 %v337_v15, %v336_v0  ;;  %v6392_v63 = vpack.c.bf16 %v341_v40, %v340_v16  ;;  %v342_v55 = vld [vmem:[#allocation7 + $0xc0] sm:$0xff]  ;;  %v349_v0 = vld [vmem:[#allocation7 + $0xf8] sm:$0xff]  ;;  %v6416_v16 = vld [vmem:[#allocation5 + $0x828] sm:$0xff] }
 0x906   :  { %v2018_v4 = vmul.f32 %v2012_v43, %v6149_v47  ;;  %v2017_v48 = vadd.f32 0.5, %v2016_v31  ;;  %v335_v47 = vld [vmem:[#allocation7 + $0x88] sm:$0xff]  ;;  %v6911_v43 = vmov 0.0|0.0   ;;  %v344_v31 = vld [vmem:[#allocation7 + $0xd0] sm:$0xff] }
 0x907   :  { %4550 = vmatprep.subr.bf16.mxu1 %v6911_v43  ;;  %7031 = vst [vmem:[#allocation62_spill] sm:$0xff] %v6392_v63 }
 0x908   :  { %v6344_v37 = vadd.f32 %v2019_v33, %v2018_v4  ;;  %v6378_v33 = vpack.c.bf16 %v335_v47, %v334_v23  ;;  %v343_v4 = vld [vmem:[#allocation7 + $0xc8] sm:$0xff]  ;;  %v348_v47 = vld [vmem:[#allocation7 + $0xf0] sm:$0xff] }
 0x909   :  { %v6396_v12 = vpack.c.bf16 %v343_v4, %v342_v55  ;;  %v6408_v15 = vpack.c.bf16 %v349_v0, %v348_v47  ;;  %v6418_v55 = vld [vmem:[#allocation5 + $0x830] sm:$0xff] }
 0x90a   :  { %5487 = vtanh.f32 %v6344_v37 }
 0x90b   :  { %7032 = vst [vmem:[#allocation63_spill] sm:$0xff] %v6396_v12  ;;  %7035 = vst [vmem:[#allocation66_spill] sm:$0xff] %v6408_v15 }
 0x914   :  { %v5488_v28 = vpop.eup %5487 }
 0x915   :  { %v2022_v52 = vmul.f32 %v5488_v28, %v2017_v48  ;;  %v345_v48 = vld [vmem:[#allocation7 + $0xd8] sm:$0xff] }
 0x916   :  { %v6400_v28 = vpack.c.bf16 %v345_v48, %v344_v31 }
 0x917   :  { %2089 = vmatprep.mubr.f32.mxu1 %v2022_v52  ;;  %2160 = vmatprep.mubr.f32.mxu0 %v2022_v52  ;;  %v346_v52 = vld [vmem:[#allocation7 + $0xe0] sm:$0xff] }
 0x918   :  { %2090 = vmatmul.mubr.f32.vlgmr.msra.gmra.mrb[16].mxu1 %v2024_v49  ;;  %2161 = vmatmul.mubr.f32.vlgmr.msra.gmra.mrb[24].mxu0 %v2024_v49  ;;  %7033 = vst [vmem:[#allocation64_spill] sm:$0xff] %v6400_v28  ;;  %v347_v49 = vld [vmem:[#allocation7 + $0xe8] sm:$0xff] }
 0x919   :  { %4577 = vmatpush1.bf16.msra.mxu0 %v6152_v9  ;;  %4552 = vmatpush3.bf16.msra.mxu1 %v6378_v33  ;;  %v6404_v23 = vpack.c.bf16 %v347_v49, %v346_v52 }
 0x91a   :  { %4579 = vmatprep.subr.bf16.mxu0 %v6156_v20  ;;  %4553 = vmatprep.subr.bf16.mxu1 %v6911_v43 }
 0x91b   :  { %7034 = vst [vmem:[#allocation65_spill] sm:$0xff] %v6404_v23  ;;  %3636 = vmatprep.mubr.msk.f32.mxu1 %vm5657_vm0, %v7036_v39 }
 0x91d   :  { %4581 = vmatpush1.bf16.msra.mxu0 %v6161_v36  ;;  %4555 = vmatpush3.bf16.msra.mxu1 %v6384_v18 }
 0x91e   :  { %4583 = vmatprep.subr.bf16.mxu0 %v6167_v59  ;;  %4556 = vmatprep.subr.bf16.mxu1 %v6911_v43 }
 0x921   :  { %4585 = vmatpush1.bf16.msra.mxu0 %v6173_v38  ;;  %4558 = vmatpush3.bf16.msra.mxu1 %v6388_v45 }
 0x922   :  { %4587 = vmatprep.subr.bf16.mxu0 %v6179_v51  ;;  %4559 = vmatprep.subr.bf16.mxu1 %v6911_v43 }
 0x925   :  { %4589 = vmatpush1.bf16.msra.mxu0 %v6185_v19  ;;  %4561 = vmatpush3.bf16.msra.mxu1 %v6392_v63 }
 0x926   :  { %4591 = vmatprep.subr.bf16.mxu0 %v6191_v34  ;;  %4562 = vmatprep.subr.bf16.mxu1 %v6911_v43 }
 0x929   :  { %4593 = vmatpush1.bf16.msra.mxu0 %v6197_v46  ;;  %4564 = vmatpush3.bf16.msra.mxu1 %v6396_v12 }
 0x92a   :  { %4595 = vmatprep.subr.bf16.mxu0 %v6203_v2  ;;  %4565 = vmatprep.subr.bf16.mxu1 %v6911_v43 }
 0x92d   :  { %4597 = vmatpush1.bf16.msra.mxu0 %v6207_v7  ;;  %4567 = vmatpush3.bf16.msra.mxu1 %v6400_v28 }
 0x92e   :  { %4599 = vmatprep.subr.bf16.mxu0 %v6211_v8  ;;  %4568 = vmatprep.subr.bf16.mxu1 %v6911_v43 }
 0x931   :  { %4601 = vmatpush1.bf16.msra.mxu0 %v6215_v3  ;;  %4570 = vmatpush3.bf16.msra.mxu1 %v6404_v23 }
 0x932   :  { %4603 = vmatprep.subr.bf16.mxu0 %v6223_v60  ;;  %4571 = vmatprep.subr.bf16.mxu1 %v6911_v43 }
 0x935   :  { %4605 = vmatpush1.bf16.msra.mxu0 %v6226_v24  ;;  %4573 = vmatpush3.bf16.msra.mxu1 %v6408_v15 }
 0x936   :  { %4607 = vmatprep.subr.bf16.mxu0 %v6235_v11  ;;  %4639 = vmatprep.subr.bf16.mxu1 %v6141_v30 }
 0x939   :  { %4609 = vmatpush1.bf16.msra.mxu0 %v6238_v35 }
 0x93a   :  { %4611 = vmatprep.subr.bf16.mxu0 %v6247_v13 }
 0x93d   :  { %4613 = vmatpush1.bf16.msra.mxu0 %v6250_v22 }
 0x93e   :  { %4615 = vmatprep.subr.bf16.mxu0 %v6259_v44 }
 0x941   :  { %4617 = vmatpush1.bf16.msra.mxu0 %v6262_v10 }
 0x942   :  { %4619 = vmatprep.subr.bf16.mxu0 %v6271_v14 }
 0x945   :  { %4621 = vmatpush1.bf16.msra.mxu0 %v6274_v32 }
 0x946   :  { %4623 = vmatprep.subr.bf16.mxu0 %v6283_v53 }
 0x949   :  { %4625 = vmatpush1.bf16.msra.mxu0 %v6286_v56 }
 0x94a   :  { %4627 = vmatprep.subr.bf16.mxu0 %v6295_v1 }
 0x94d   :  { %4629 = vmatpush1.bf16.msra.mxu0 %v6298_v6 }
 0x94e   :  { %4631 = vmatprep.subr.bf16.mxu0 %v6307_v26 }
 0x951   :  { %4633 = vmatpush1.bf16.msra.mxu0 %v6309_v5 }
 0x952   :  { %4635 = vmatprep.subr.bf16.mxu0 %v6317_v54 }
 0x955   :  { %4637 = vmatpush1.bf16.msra.mxu0 %v6321_v29  ;;  %v6423_v29 = vld [vmem:[#allocation5 + $0x838] sm:$0xff] }
 0x956   :  { %4702 = vmatprep.subr.bf16.mxu0 %v6911_v43 }
 0x9eb   :  { %v2091_v40 = vpop.f32.mrb[16].mxu1  ;;  %v2162_v4 = vpop.f32.mrb[24].mxu0 }
 0x9ec   :  { %v2092_v31 = vadd.f32 %v2091_v40, %v6414_v57  ;;  %v2093_v48 = vpop.f32.mrb[17].mxu1  ;;  %v2164_v52 = vpop.f32.mrb[25].mxu0  ;;  %v2163_v0 = vadd.f32 %v2162_v4, %v6418_v55 }
 0x9ed   :  { %v2094_v49 = vadd.f32 %v2093_v48, %v6416_v16  ;;  %v2165_v54 = vadd.f32 %v2164_v52, %v6423_v29 }
 0x9ee   :  { %v2167_v47 = vmul.f32 0.5, %v2092_v31 }
 0x9ef   :  { %v2171_v43 = vmul.f32 0.5, %v2094_v49  ;;  %v2176_v5 = vmul.f32 0.5, %v2165_v54 }
 0x9f0   :  { %5489 = vtanh.f32 %v2167_v47 }
 0x9f1   :  { %5491 = vtanh.f32 %v2171_v43 }
 0x9f2   :  { %5493 = vtanh.f32 %v2163_v0 }
 0x9f3   :  { %5495 = vtanh.f32 %v2176_v5  ;;  %v7042_v5 = vld [vmem:[#allocation31_spill] sm:$0xff] }
 0x9fa   :  { %v5490_v26 = vpop.eup %5489 }
 0x9fb   :  { %v5492_v6 = vpop.eup %5491  ;;  %v2169_v1 = vmul.f32 0.5, %v5490_v26  ;;  %v7041_v26 = vld [vmem:[#allocation30_spill] sm:$0xff] }
 0x9fc   :  { %v5494_v40 = vpop.eup %5493  ;;  %v2173_v57 = vmul.f32 0.5, %v5492_v6  ;;  %v7040_v6 = vld [vmem:[#allocation27_spill] sm:$0xff] }
 0x9fd   :  { %v2170_v56 = vadd.f32 0.5, %v2169_v1  ;;  %v5496_v43 = vpop.eup %5495  ;;  %v7038_v1 = vld [vmem:[#allocation23_spill] sm:$0xff] }
 0x9fe   :  { %v2174_v48 = vadd.f32 0.5, %v2173_v57  ;;  %v2178_v47 = vmul.f32 0.5, %v5496_v43  ;;  %v7044_v57 = vld [vmem:[#allocation35_spill] sm:$0xff]  ;;  %v7049_v43 = vld [vmem:[#allocation46_spill] sm:$0xff] }
 0x9ff   :  { %v2181_v31 = vmul.f32 %v5494_v40, %v2170_v56  ;;  %v7039_v56 = vld [vmem:[#allocation26_spill] sm:$0xff] }
 0xa00   :  { %v2180_v4 = vmul.f32 %v2174_v48, %v6344_v37  ;;  %v2179_v0 = vadd.f32 0.5, %v2178_v47  ;;  %v7043_v37 = vld [vmem:[#allocation34_spill] sm:$0xff]  ;;  %v7046_v48 = vld [vmem:[#allocation39_spill] sm:$0xff] }
 0xa01   :  { %v7045_v40 = vld [vmem:[#allocation38_spill] sm:$0xff]  ;;  %v7050_v47 = vld [vmem:[#allocation47_spill] sm:$0xff] }
 0xa02   :  { %v6427_v49 = vadd.f32 %v2181_v31, %v2180_v4  ;;  %v7047_v31 = vld [vmem:[#allocation42_spill] sm:$0xff]  ;;  %v7048_v4 = vld [vmem:[#allocation43_spill] sm:$0xff] }
 0xa04   :  { %5497 = vtanh.f32 %v6427_v49 }
 0xa0e   :  { %v5498_v52 = vpop.eup %5497 }
 0xa0f   :  { %v2184_v54 = vmul.f32 %v5498_v52, %v2179_v0  ;;  %v7051_v0 = vld [vmem:[#allocation50_spill] sm:$0xff]  ;;  %v7052_v52 = vld [vmem:[#allocation51_spill] sm:$0xff] }
 0xa11   :  { %3637 = vmatmul.mubr.f32.vlgmr.msra.gmra.mrb[18].mxu1 %v2184_v54  ;;  %2320 = vmatprep.mubr.f32.mxu0 %v2184_v54 }
 0xa12   :  { %2391 = vmatprep.mubr.f32.mxu1 %v2184_v54  ;;  %4641 = vmatpush1.bf16.msra.mxu1 %v6154_v17  ;;  %v7053_v54 = vld [vmem:[#allocation54_spill] sm:$0xff] }
 0xa13   :  { %4643 = vmatprep.subr.bf16.mxu1 %v6158_v21 }
 0xa16   :  { %4645 = vmatpush1.bf16.msra.mxu1 %v6164_v41 }
 0xa17   :  { %4647 = vmatprep.subr.bf16.mxu1 %v6170_v61 }
 0xa1a   :  { %4649 = vmatpush1.bf16.msra.mxu1 %v6176_v50 }
 0xa1b   :  { %4651 = vmatprep.subr.bf16.mxu1 %v6182_v58 }
 0xa1e   :  { %4653 = vmatpush1.bf16.msra.mxu1 %v6188_v27 }
 0xa1f   :  { %4655 = vmatprep.subr.bf16.mxu1 %v6194_v42 }
 0xa22   :  { %4657 = vmatpush1.bf16.msra.mxu1 %v6200_v62 }
 0xa23   :  { %4659 = vmatprep.subr.bf16.mxu1 %v6217_v25 }
 0xa26   :  { %4661 = vmatpush1.bf16.msra.mxu1 %v7038_v1 }
 0xa27   :  { %4663 = vmatprep.subr.bf16.mxu1 %v7039_v56 }
 0xa2a   :  { %4665 = vmatpush1.bf16.msra.mxu1 %v7040_v6 }
 0xa2b   :  { %4667 = vmatprep.subr.bf16.mxu1 %v7041_v26 }
 0xa2e   :  { %4669 = vmatpush1.bf16.msra.mxu1 %v7042_v5 }
 0xa2f   :  { %4671 = vmatprep.subr.bf16.mxu1 %v7043_v37  ;;  %v7054_v37 = vld [vmem:[#allocation55_spill] sm:$0xff] }
 0xa32   :  { %4673 = vmatpush1.bf16.msra.mxu1 %v7044_v57  ;;  %v7055_v57 = vld [vmem:[#allocation58_spill] sm:$0xff] }
 0xa33   :  { %4675 = vmatprep.subr.bf16.mxu1 %v7045_v40  ;;  %v7056_v40 = vld [vmem:[#allocation59_spill] sm:$0xff] }
 0xa36   :  { %4677 = vmatpush1.bf16.msra.mxu1 %v7046_v48  ;;  %v7057_v48 = vld [vmem:[#allocation60_spill] sm:$0xff] }
 0xa37   :  { %4679 = vmatprep.subr.bf16.mxu1 %v7047_v31  ;;  %v7058_v31 = vld [vmem:[#allocation61_spill] sm:$0xff] }
 0xa3a   :  { %4681 = vmatpush1.bf16.msra.mxu1 %v7048_v4  ;;  %v7059_v4 = vld [vmem:[#allocation12_spill] sm:$0xff] }
 0xa3b   :  { %4683 = vmatprep.subr.bf16.mxu1 %v7049_v43  ;;  %v6462_v43 = vld [vmem:[#allocation7 + $0x100] sm:$0xff] }
 0xa3e   :  { %4685 = vmatpush1.bf16.msra.mxu1 %v7050_v47 }
 0xa3f   :  { %4687 = vmatprep.subr.bf16.mxu1 %v7051_v0 }
 0xa42   :  { %4689 = vmatpush1.bf16.msra.mxu1 %v7052_v52 }
 0xa43   :  { %4691 = vmatprep.subr.bf16.mxu1 %v7053_v54 }
 0xa46   :  { %4693 = vmatpush1.bf16.msra.mxu1 %v7054_v37 }
 0xa47   :  { %4695 = vmatprep.subr.bf16.mxu1 %v7055_v57 }
 0xa4a   :  { %4697 = vmatpush1.bf16.msra.mxu1 %v7056_v40  ;;  %v7060_v40 = vmov 0.0|0.0  }
 0xa4b   :  { %4699 = vmatprep.subr.bf16.mxu1 %v7057_v48 }
 0xa4e   :  { %4701 = vmatpush1.bf16.msra.mxu1 %v7058_v31 }
 0xa4f   :  { %4727 = vmatprep.subr.bf16.mxu1 %v7059_v4 }
 0xae4   :  { %v2251_v47 = vpop.f32.mrb[18].mxu1 }
 0xae5   :  { %v2252_v0 = vadd.f32 %v2251_v47, %v6462_v43  ;;  %v3638_v52 = vpop.f32.mrb[19].mxu1  ;;  %v7061_v47 = vld [vmem:[#allocation45_spill] sm:$0xff] }
 0xae6   :  { %v7063_v52 = vld [vmem:[#allocation49_spill] sm:$0xff] }
 0xae7   :  { %2255 = vst [vmem:[#allocation8] sm:$0xff] %v2252_v0  ;;  %2321 = vmatmul.mubr.f32.vlgmr.msra.gmra.mrb[26].mxu0 %v2252_v0  ;;  %2392 = vmatmul.mubr.f32.vlgmr.msra.gmra.mrb[20].mxu1 %v2252_v0  ;;  %v7062_v0 = vld [vmem:[#allocation48_spill] sm:$0xff] }
 0xae8   :  { %4704 = vmatpush3.bf16.msra.mxu0 %v6378_v33  ;;  %3671 = vmatprep.mubr.msk.f32.mxu0 %vm5657_vm0, %v7036_v39 }
 0xae9   :  { %4705 = vmatprep.subr.bf16.mxu0 %v7060_v40  ;;  %4729 = vmatpush1.bf16.msra.mxu1 %v6152_v9 }
 0xaea   :  { %4731 = vmatprep.subr.bf16.mxu1 %v6156_v20 }
 0xaec   :  { %4707 = vmatpush3.bf16.msra.mxu0 %v6384_v18 }
 0xaed   :  { %4708 = vmatprep.subr.bf16.mxu0 %v7060_v40  ;;  %4733 = vmatpush1.bf16.msra.mxu1 %v6161_v36 }
 0xaee   :  { %4735 = vmatprep.subr.bf16.mxu1 %v6167_v59 }
 0xaf0   :  { %4710 = vmatpush3.bf16.msra.mxu0 %v6388_v45 }
 0xaf1   :  { %4711 = vmatprep.subr.bf16.mxu0 %v7060_v40  ;;  %4737 = vmatpush1.bf16.msra.mxu1 %v6173_v38 }
 0xaf2   :  { %4739 = vmatprep.subr.bf16.mxu1 %v6179_v51 }
 0xaf4   :  { %4713 = vmatpush3.bf16.msra.mxu0 %v6392_v63 }
 0xaf5   :  { %4714 = vmatprep.subr.bf16.mxu0 %v7060_v40  ;;  %4741 = vmatpush1.bf16.msra.mxu1 %v6185_v19 }
 0xaf6   :  { %4743 = vmatprep.subr.bf16.mxu1 %v6191_v34 }
 0xaf8   :  { %4716 = vmatpush3.bf16.msra.mxu0 %v6396_v12 }
 0xaf9   :  { %4717 = vmatprep.subr.bf16.mxu0 %v7060_v40  ;;  %4745 = vmatpush1.bf16.msra.mxu1 %v6197_v46 }
 0xafa   :  { %4747 = vmatprep.subr.bf16.mxu1 %v6203_v2 }
 0xafc   :  { %4719 = vmatpush3.bf16.msra.mxu0 %v6400_v28 }
 0xafd   :  { %4720 = vmatprep.subr.bf16.mxu0 %v7060_v40  ;;  %4749 = vmatpush1.bf16.msra.mxu1 %v6207_v7 }
 0xafe   :  { %4751 = vmatprep.subr.bf16.mxu1 %v6211_v8 }
 0xb00   :  { %4722 = vmatpush3.bf16.msra.mxu0 %v6404_v23 }
 0xb01   :  { %4723 = vmatprep.subr.bf16.mxu0 %v7060_v40  ;;  %4753 = vmatpush1.bf16.msra.mxu1 %v6215_v3 }
 0xb02   :  { %4755 = vmatprep.subr.bf16.mxu1 %v6223_v60 }
 0xb04   :  { %4725 = vmatpush3.bf16.msra.mxu0 %v6408_v15 }
 0xb05   :  { %4791 = vmatprep.subr.bf16.mxu0 %v6141_v30  ;;  %4757 = vmatpush1.bf16.msra.mxu1 %v6226_v24 }
 0xb06   :  { %4759 = vmatprep.subr.bf16.mxu1 %v6235_v11 }
 0xb09   :  { %4761 = vmatpush1.bf16.msra.mxu1 %v6238_v35  ;;  %v7064_v35 = vld [vmem:[#allocation52_spill] sm:$0xff] }
 0xb0a   :  { %4763 = vmatprep.subr.bf16.mxu1 %v6247_v13  ;;  %v7065_v13 = vld [vmem:[#allocation53_spill] sm:$0xff] }
 0xb0d   :  { %4765 = vmatpush1.bf16.msra.mxu1 %v6250_v22  ;;  %v7066_v22 = vld [vmem:[#allocation56_spill] sm:$0xff] }
 0xb0e   :  { %4767 = vmatprep.subr.bf16.mxu1 %v6259_v44  ;;  %v7067_v44 = vld [vmem:[#allocation57_spill] sm:$0xff] }
 0xb11   :  { %4769 = vmatpush1.bf16.msra.mxu1 %v6262_v10  ;;  %v7068_v10 = vld [vmem:[#allocation67_spill] sm:$0xff] }
 0xb12   :  { %4771 = vmatprep.subr.bf16.mxu1 %v6271_v14 }
 0xb15   :  { %4773 = vmatpush1.bf16.msra.mxu1 %v6274_v32 }
 0xb16   :  { %4775 = vmatprep.subr.bf16.mxu1 %v6283_v53 }
 0xb19   :  { %4777 = vmatpush1.bf16.msra.mxu1 %v7061_v47 }
 0xb1a   :  { %4779 = vmatprep.subr.bf16.mxu1 %v7062_v0 }
 0xb1d   :  { %4781 = vmatpush1.bf16.msra.mxu1 %v7063_v52 }
 0xb1e   :  { %4783 = vmatprep.subr.bf16.mxu1 %v7064_v35 }
 0xb21   :  { %4785 = vmatpush1.bf16.msra.mxu1 %v7065_v13 }
 0xb22   :  { %4787 = vmatprep.subr.bf16.mxu1 %v7066_v22 }
 0xb25   :  { %4789 = vmatpush1.bf16.msra.mxu1 %v7067_v44 }
 0xb26   :  { %4854 = vmatprep.subr.bf16.mxu1 %v7060_v40 }
 0xbba   :  { %v2322_v14 = vpop.f32.mrb[26].mxu0  ;;  %v2393_v32 = vpop.f32.mrb[20].mxu1 }
 0xbbb   :  { %v2323_v53 = vadd.f32 %v2322_v14, %v7068_v10  ;;  %v2324_v11 = vpop.f32.mrb[27].mxu0  ;;  %v2395_v47 = vpop.f32.mrb[21].mxu1  ;;  %v2394_v35 = vadd.f32 %v2393_v32, %v6418_v55 }
 0xbbc   :  { %v2325_v0 = vadd.f32 %v2324_v11, %v6416_v16  ;;  %v2396_v22 = vadd.f32 %v2395_v47, %v6423_v29 }
 0xbbd   :  { %v2398_v24 = vmul.f32 0.5, %v2323_v53 }
 0xbbe   :  { %v2402_v52 = vmul.f32 0.5, %v2325_v0  ;;  %v2407_v44 = vmul.f32 0.5, %v2396_v22  ;;  %v7078_v0 = vld [vmem:[#allocation51_spill] sm:$0xff] }
 0xbbf   :  { %5499 = vtanh.f32 %v2398_v24 }
 0xbc0   :  { %5501 = vtanh.f32 %v2402_v52  ;;  %v7079_v52 = vld [vmem:[#allocation59_spill] sm:$0xff] }
 0xbc1   :  { %5503 = vtanh.f32 %v2394_v35 }
 0xbc2   :  { %5505 = vtanh.f32 %v2407_v44  ;;  %v7073_v44 = vld [vmem:[#allocation42_spill] sm:$0xff] }
 0xbc9   :  { %v5500_v13 = vpop.eup %5499 }
 0xbca   :  { %v5502_v30 = vpop.eup %5501  ;;  %v2400_v15 = vmul.f32 0.5, %v5500_v13  ;;  %v7072_v13 = vld [vmem:[#allocation39_spill] sm:$0xff] }
 0xbcb   :  { %v2404_v60 = vmul.f32 0.5, %v5502_v30  ;;  %v5504_v10 = vpop.eup %5503  ;;  %v7069_v30 = vld [vmem:[#allocation34_spill] sm:$0xff] }
 0xbcc   :  { %v2401_v14 = vadd.f32 0.5, %v2400_v15  ;;  %v5506_v24 = vpop.eup %5505  ;;  %v7076_v15 = vld [vmem:[#allocation47_spill] sm:$0xff] }
 0xbcd   :  { %v2405_v3 = vadd.f32 0.5, %v2404_v60  ;;  %v2409_v35 = vmul.f32 0.5, %v5506_v24  ;;  %v7071_v60 = vld [vmem:[#allocation38_spill] sm:$0xff] }
 0xbce   :  { %v2412_v23 = vmul.f32 %v5504_v10, %v2401_v14  ;;  %v7074_v10 = vld [vmem:[#allocation43_spill] sm:$0xff] }
 0xbcf   :  { %v2411_v11 = vmul.f32 %v2405_v3, %v6427_v49  ;;  %v2410_v32 = vadd.f32 0.5, %v2409_v35  ;;  %v7070_v3 = vld [vmem:[#allocation35_spill] sm:$0xff]  ;;  %v7077_v49 = vld [vmem:[#allocation50_spill] sm:$0xff]  ;;  %v7080_v35 = vld [vmem:[#allocation65_spill] sm:$0xff] }
 0xbd1   :  { %v6520_v53 = vadd.f32 %v2412_v23, %v2411_v11  ;;  %v7075_v23 = vld [vmem:[#allocation46_spill] sm:$0xff] }
 0xbd3   :  { %5507 = vtanh.f32 %v6520_v53 }
 0xbdd   :  { %v5508_v47 = vpop.eup %5507 }
 0xbde   :  { %v2415_v22 = vmul.f32 %v5508_v47, %v2410_v32  ;;  %v7081_v32 = vld [vmem:[#allocation22_spill] sm:$0xff]  ;;  %v7082_v47 = vld [vmem:[#allocation24_spill] sm:$0xff] }
 0xbe0   :  { %3672 = vmatmul.mubr.f32.vlgmr.msra.gmra.mrb[28].mxu0 %v2415_v22  ;;  %2552 = vmatprep.mubr.f32.mxu1 %v2415_v22 }
 0xbe1   :  { %2623 = vmatprep.mubr.f32.mxu0 %v2415_v22  ;;  %4793 = vmatpush1.bf16.msra.mxu0 %v6154_v17  ;;  %v7083_v22 = vld [vmem:[#allocation66_spill] sm:$0xff] }
 0xbe2   :  { %4795 = vmatprep.subr.bf16.mxu0 %v6158_v21 }
 0xbe5   :  { %4797 = vmatpush1.bf16.msra.mxu0 %v6164_v41 }
 0xbe6   :  { %4799 = vmatprep.subr.bf16.mxu0 %v6170_v61 }
 0xbe9   :  { %4801 = vmatpush1.bf16.msra.mxu0 %v6176_v50 }
 0xbea   :  { %4803 = vmatprep.subr.bf16.mxu0 %v6182_v58 }
 0xbed   :  { %4805 = vmatpush1.bf16.msra.mxu0 %v6188_v27 }
 0xbee   :  { %4807 = vmatprep.subr.bf16.mxu0 %v6194_v42 }
 0xbf1   :  { %4809 = vmatpush1.bf16.msra.mxu0 %v6200_v62 }
 0xbf2   :  { %4811 = vmatprep.subr.bf16.mxu0 %v6217_v25 }
 0xbf5   :  { %4813 = vmatpush1.bf16.msra.mxu0 %v7038_v1 }
 0xbf6   :  { %4815 = vmatprep.subr.bf16.mxu0 %v7039_v56 }
 0xbf9   :  { %4817 = vmatpush1.bf16.msra.mxu0 %v7040_v6 }
 0xbfa   :  { %4819 = vmatprep.subr.bf16.mxu0 %v7041_v26 }
 0xbfd   :  { %4821 = vmatpush1.bf16.msra.mxu0 %v7042_v5 }
 0xbfe   :  { %4823 = vmatprep.subr.bf16.mxu0 %v7069_v30 }
 0xc01   :  { %4825 = vmatpush1.bf16.msra.mxu0 %v7070_v3 }
 0xc02   :  { %4827 = vmatprep.subr.bf16.mxu0 %v7071_v60 }
 0xc05   :  { %4829 = vmatpush1.bf16.msra.mxu0 %v7072_v13 }
 0xc06   :  { %4831 = vmatprep.subr.bf16.mxu0 %v7073_v44 }
 0xc09   :  { %4833 = vmatpush1.bf16.msra.mxu0 %v7074_v10 }
 0xc0a   :  { %4835 = vmatprep.subr.bf16.mxu0 %v7075_v23 }
 0xc0d   :  { %4837 = vmatpush1.bf16.msra.mxu0 %v7076_v15 }
 0xc0e   :  { %4839 = vmatprep.subr.bf16.mxu0 %v7077_v49 }
 0xc11   :  { %4841 = vmatpush1.bf16.msra.mxu0 %v7078_v0 }
 0xc12   :  { %4843 = vmatprep.subr.bf16.mxu0 %v7053_v54 }
 0xc15   :  { %4845 = vmatpush1.bf16.msra.mxu0 %v7054_v37 }
 0xc16   :  { %4847 = vmatprep.subr.bf16.mxu0 %v7055_v57 }
 0xc19   :  { %4849 = vmatpush1.bf16.msra.mxu0 %v7079_v52 }
 0xc1a   :  { %4851 = vmatprep.subr.bf16.mxu0 %v7057_v48 }
 0xc1d   :  { %4853 = vmatpush1.bf16.msra.mxu0 %v7058_v31 }
 0xc1e   :  { %4879 = vmatprep.subr.bf16.mxu0 %v7059_v4 }
 0xcb3   :  { %v2482_v14 = vpop.f32.mrb[28].mxu0 }
 0xcb4   :  { %v2483_v11 = vadd.f32 %v2482_v14, %v6462_v43  ;;  %v3673_v24 = vpop.f32.mrb[29].mxu0  ;;  %v7084_v14 = vld [vmem:[#allocation13_spill] sm:$0xff] }
 0xcb5   :  { %v7086_v24 = vld [vmem:[#allocation28_spill] sm:$0xff] }
 0xcb6   :  { %2487 = vst [vmem:[#allocation8 + $0x8] sm:$0xff] %v2483_v11  ;;  %2553 = vmatmul.mubr.f32.vlgmr.msra.gmra.mrb[22].mxu1 %v2483_v11  ;;  %2624 = vmatmul.mubr.f32.vlgmr.msra.gmra.mrb[30].mxu0 %v2483_v11  ;;  %v7085_v11 = vld [vmem:[#allocation25_spill] sm:$0xff] }
 0xcb7   :  { %4856 = vmatpush3.bf16.msra.mxu1 %v6378_v33  ;;  %3706 = vmatprep.mubr.msk.f32.mxu1 %vm5657_vm0, %v7036_v39 }
 0xcb8   :  { %4857 = vmatprep.subr.bf16.mxu1 %v7060_v40  ;;  %4881 = vmatpush1.bf16.msra.mxu0 %v6152_v9 }
 0xcb9   :  { %4883 = vmatprep.subr.bf16.mxu0 %v6156_v20 }
 0xcbb   :  { %4859 = vmatpush3.bf16.msra.mxu1 %v6384_v18 }
 0xcbc   :  { %4860 = vmatprep.subr.bf16.mxu1 %v7060_v40  ;;  %4885 = vmatpush1.bf16.msra.mxu0 %v6161_v36 }
 0xcbd   :  { %4887 = vmatprep.subr.bf16.mxu0 %v6167_v59 }
 0xcbf   :  { %4862 = vmatpush3.bf16.msra.mxu1 %v6388_v45 }
 0xcc0   :  { %4863 = vmatprep.subr.bf16.mxu1 %v7060_v40  ;;  %4889 = vmatpush1.bf16.msra.mxu0 %v6173_v38 }
 0xcc1   :  { %4891 = vmatprep.subr.bf16.mxu0 %v6179_v51 }
 0xcc3   :  { %4865 = vmatpush3.bf16.msra.mxu1 %v6392_v63 }
 0xcc4   :  { %4866 = vmatprep.subr.bf16.mxu1 %v7060_v40  ;;  %4893 = vmatpush1.bf16.msra.mxu0 %v6185_v19 }
 0xcc5   :  { %4895 = vmatprep.subr.bf16.mxu0 %v6191_v34 }
 0xcc7   :  { %4868 = vmatpush3.bf16.msra.mxu1 %v6396_v12 }
 0xcc8   :  { %4869 = vmatprep.subr.bf16.mxu1 %v7060_v40  ;;  %4897 = vmatpush1.bf16.msra.mxu0 %v6197_v46 }
 0xcc9   :  { %4899 = vmatprep.subr.bf16.mxu0 %v6203_v2  ;;  %v7091_v2 = vld [vmem:[#allocation37_spill] sm:$0xff] }
 0xccb   :  { %4871 = vmatpush3.bf16.msra.mxu1 %v6400_v28  ;;  %v7087_v28 = vld [vmem:[#allocation29_spill] sm:$0xff] }
 0xccc   :  { %4872 = vmatprep.subr.bf16.mxu1 %v7060_v40  ;;  %4901 = vmatpush1.bf16.msra.mxu0 %v6207_v7  ;;  %v7088_v7 = vld [vmem:[#allocation32_spill] sm:$0xff] }
 0xccd   :  { %4903 = vmatprep.subr.bf16.mxu0 %v6211_v8  ;;  %v7089_v8 = vld [vmem:[#allocation33_spill] sm:$0xff] }
 0xccf   :  { %4874 = vmatpush3.bf16.msra.mxu1 %v7080_v35  ;;  %v7090_v35 = vld [vmem:[#allocation36_spill] sm:$0xff] }
 0xcd0   :  { %4875 = vmatprep.subr.bf16.mxu1 %v7060_v40  ;;  %4905 = vmatpush1.bf16.msra.mxu0 %v7081_v32  ;;  %v7092_v32 = vld [vmem:[#allocation40_spill] sm:$0xff] }
 0xcd1   :  { %4907 = vmatprep.subr.bf16.mxu0 %v7082_v47  ;;  %v7093_v47 = vld [vmem:[#allocation41_spill] sm:$0xff] }
 0xcd3   :  { %4877 = vmatpush3.bf16.msra.mxu1 %v7083_v22  ;;  %v7094_v22 = vld [vmem:[#allocation44_spill] sm:$0xff] }
 0xcd4   :  { %4943 = vmatprep.subr.bf16.mxu1 %v7084_v14  ;;  %4909 = vmatpush1.bf16.msra.mxu0 %v7085_v11  ;;  %v7095_v14 = vld [vmem:[#allocation45_spill] sm:$0xff]  ;;  %v7096_v11 = vld [vmem:[#allocation48_spill] sm:$0xff] }
 0xcd5   :  { %4911 = vmatprep.subr.bf16.mxu0 %v7086_v24  ;;  %v7097_v24 = vld [vmem:[#allocation49_spill] sm:$0xff] }
 0xcd8   :  { %4913 = vmatpush1.bf16.msra.mxu0 %v7087_v28  ;;  %v7098_v28 = vld [vmem:[#allocation52_spill] sm:$0xff] }
 0xcd9   :  { %4915 = vmatprep.subr.bf16.mxu0 %v7088_v7  ;;  %v7099_v7 = vld [vmem:[#allocation53_spill] sm:$0xff] }
 0xcdc   :  { %4917 = vmatpush1.bf16.msra.mxu0 %v7089_v8  ;;  %v7100_v8 = vld [vmem:[#allocation56_spill] sm:$0xff] }
 0xcdd   :  { %4919 = vmatprep.subr.bf16.mxu0 %v7090_v35  ;;  %v7101_v35 = vld [vmem:[#allocation57_spill] sm:$0xff] }
 0xce0   :  { %4921 = vmatpush1.bf16.msra.mxu0 %v7091_v2  ;;  %v7102_v2 = vld [vmem:[#allocation67_spill] sm:$0xff] }
 0xce1   :  { %4923 = vmatprep.subr.bf16.mxu0 %v7092_v32 }
 0xce4   :  { %4925 = vmatpush1.bf16.msra.mxu0 %v7093_v47 }
 0xce5   :  { %4927 = vmatprep.subr.bf16.mxu0 %v7094_v22 }
 0xce8   :  { %4929 = vmatpush1.bf16.msra.mxu0 %v7095_v14 }
 0xce9   :  { %4931 = vmatprep.subr.bf16.mxu0 %v7096_v11 }
 0xcec   :  { %4933 = vmatpush1.bf16.msra.mxu0 %v7097_v24 }
 0xced   :  { %4935 = vmatprep.subr.bf16.mxu0 %v7098_v28 }
 0xcf0   :  { %4937 = vmatpush1.bf16.msra.mxu0 %v7099_v7 }
 0xcf1   :  { %4939 = vmatprep.subr.bf16.mxu0 %v7100_v8 }
 0xcf4   :  { %4941 = vmatpush1.bf16.msra.mxu0 %v7101_v35 }
 0xcf5   :  { %5006 = vmatprep.subr.bf16.mxu0 %v7060_v40 }
 0xd89   :  { %v2554_v32 = vpop.f32.mrb[22].mxu1  ;;  %v2625_v47 = vpop.f32.mrb[30].mxu0 }
 0xd8a   :  { %v2555_v22 = vadd.f32 %v2554_v32, %v7102_v2  ;;  %v2556_v46 = vpop.f32.mrb[23].mxu1  ;;  %v2627_v14 = vpop.f32.mrb[31].mxu0  ;;  %v2626_v28 = vadd.f32 %v2625_v47, %v6418_v55 }
 0xd8b   :  { %v2557_v11 = vadd.f32 %v2556_v46, %v6416_v16  ;;  %v2628_v8 = vadd.f32 %v2627_v14, %v6423_v29 }
 0xd8c   :  { %v2630_v12 = vmul.f32 0.5, %v2555_v22 }
 0xd8d   :  { %v2634_v24 = vmul.f32 0.5, %v2557_v11  ;;  %v2639_v35 = vmul.f32 0.5, %v2628_v8  ;;  %v7109_v11 = vld [vmem:[#allocation18_spill] sm:$0xff] }
 0xd8e   :  { %5509 = vtanh.f32 %v2630_v12 }
 0xd8f   :  { %5511 = vtanh.f32 %v2634_v24  ;;  %v7110_v24 = vld [vmem:[#allocation19_spill] sm:$0xff] }
 0xd90   :  { %5513 = vtanh.f32 %v2626_v28 }
 0xd91   :  { %5515 = vtanh.f32 %v2639_v35  ;;  %v7108_v35 = vld [vmem:[#allocation63_spill] sm:$0xff] }
 0xd98   :  { %v5510_v7 = vpop.eup %5509 }
 0xd99   :  { %v5512_v34 = vpop.eup %5511  ;;  %v2632_v19 = vmul.f32 0.5, %v5510_v7  ;;  %v7105_v7 = vld [vmem:[#allocation62_spill] sm:$0xff] }
 0xd9a   :  { %v2636_v63 = vmul.f32 0.5, %v5512_v34  ;;  %v5514_v2 = vpop.eup %5513  ;;  %v7103_v34 = vld [vmem:[#allocation14_spill] sm:$0xff] }
 0xd9b   :  { %v2633_v32 = vadd.f32 0.5, %v2632_v19  ;;  %v5516_v12 = vpop.eup %5515 }
 0xd9c   :  { %v2637_v51 = vadd.f32 0.5, %v2636_v63  ;;  %v2641_v28 = vmul.f32 0.5, %v5516_v12  ;;  %v7106_v63 = vld [vmem:[#allocation16_spill] sm:$0xff]  ;;  %v7113_v12 = vld [vmem:[#allocation21_spill] sm:$0xff] }
 0xd9d   :  { %v2644_v38 = vmul.f32 %v5514_v2, %v2633_v32  ;;  %v7104_v2 = vld [vmem:[#allocation15_spill] sm:$0xff]  ;;  %v7111_v32 = vld [vmem:[#allocation64_spill] sm:$0xff] }
 0xd9e   :  { %v2643_v46 = vmul.f32 %v2637_v51, %v6520_v53  ;;  %v2642_v47 = vadd.f32 0.5, %v2641_v28  ;;  %v7107_v53 = vld [vmem:[#allocation17_spill] sm:$0xff] }
 0xd9f   :  { %v7114_v28 = vld [vmem:[#allocation65_spill] sm:$0xff] }
 0xda0   :  { %v6611_v22 = vadd.f32 %v2644_v38, %v2643_v46  ;;  %v7112_v46 = vld [vmem:[#allocation20_spill] sm:$0xff] }
 0xda2   :  { %5517 = vtanh.f32 %v6611_v22 }
 0xdac   :  { %v5518_v14 = vpop.eup %5517 }
 0xdad   :  { %v2647_v8 = vmul.f32 %v5518_v14, %v2642_v47  ;;  %v7115_v47 = vld [vmem:[#allocation22_spill] sm:$0xff]  ;;  %v7116_v14 = vld [vmem:[#allocation24_spill] sm:$0xff] }
 0xdaf   :  { %3707 = vmatmul.mubr.f32.vlgmr.msra.gmra.mrb[24].mxu1 %v2647_v8  ;;  %2784 = vmatprep.mubr.f32.mxu0 %v2647_v8 }
 0xdb0   :  { %2855 = vmatprep.mubr.f32.mxu1 %v2647_v8  ;;  %4945 = vmatpush1.bf16.msra.mxu1 %v6154_v17  ;;  %v7117_v8 = vld [vmem:[#allocation66_spill] sm:$0xff] }
 0xdb1   :  { %4947 = vmatprep.subr.bf16.mxu1 %v6158_v21 }
 0xdb4   :  { %4949 = vmatpush1.bf16.msra.mxu1 %v6164_v41 }
 0xdb5   :  { %4951 = vmatprep.subr.bf16.mxu1 %v6170_v61 }
 0xdb8   :  { %4953 = vmatpush1.bf16.msra.mxu1 %v6176_v50 }
 0xdb9   :  { %4955 = vmatprep.subr.bf16.mxu1 %v6182_v58 }
 0xdbc   :  { %4957 = vmatpush1.bf16.msra.mxu1 %v6188_v27 }
 0xdbd   :  { %4959 = vmatprep.subr.bf16.mxu1 %v6194_v42 }
 0xdc0   :  { %4961 = vmatpush1.bf16.msra.mxu1 %v6200_v62 }
 0xdc1   :  { %4963 = vmatprep.subr.bf16.mxu1 %v6217_v25 }
 0xdc4   :  { %4965 = vmatpush1.bf16.msra.mxu1 %v7038_v1 }
 0xdc5   :  { %4967 = vmatprep.subr.bf16.mxu1 %v7039_v56 }
 0xdc8   :  { %4969 = vmatpush1.bf16.msra.mxu1 %v7040_v6 }
 0xdc9   :  { %4971 = vmatprep.subr.bf16.mxu1 %v7041_v26 }
 0xdcc   :  { %4973 = vmatpush1.bf16.msra.mxu1 %v7042_v5 }
 0xdcd   :  { %4975 = vmatprep.subr.bf16.mxu1 %v7069_v30 }
 0xdd0   :  { %4977 = vmatpush1.bf16.msra.mxu1 %v7070_v3 }
 0xdd1   :  { %4979 = vmatprep.subr.bf16.mxu1 %v7071_v60 }
 0xdd4   :  { %4981 = vmatpush1.bf16.msra.mxu1 %v7072_v13 }
 0xdd5   :  { %4983 = vmatprep.subr.bf16.mxu1 %v7073_v44 }
 0xdd8   :  { %4985 = vmatpush1.bf16.msra.mxu1 %v7074_v10 }
 0xdd9   :  { %4987 = vmatprep.subr.bf16.mxu1 %v7075_v23 }
 0xddc   :  { %4989 = vmatpush1.bf16.msra.mxu1 %v7076_v15 }
 0xddd   :  { %4991 = vmatprep.subr.bf16.mxu1 %v7077_v49 }
 0xde0   :  { %4993 = vmatpush1.bf16.msra.mxu1 %v7078_v0 }
 0xde1   :  { %4995 = vmatprep.subr.bf16.mxu1 %v7053_v54 }
 0xde4   :  { %4997 = vmatpush1.bf16.msra.mxu1 %v7054_v37 }
 0xde5   :  { %4999 = vmatprep.subr.bf16.mxu1 %v7055_v57 }
 0xde8   :  { %5001 = vmatpush1.bf16.msra.mxu1 %v7079_v52 }
 0xde9   :  { %5003 = vmatprep.subr.bf16.mxu1 %v7057_v48 }
 0xdec   :  { %5005 = vmatpush1.bf16.msra.mxu1 %v7058_v31 }
 0xded   :  { %5031 = vmatprep.subr.bf16.mxu1 %v7059_v4 }
 0xe82   :  { %v2714_v38 = vpop.f32.mrb[24].mxu1 }
 0xe83   :  { %v2715_v51 = vadd.f32 %v2714_v38, %v6462_v43  ;;  %v3708_v19 = vpop.f32.mrb[25].mxu1  ;;  %v7118_v38 = vld [vmem:[#allocation13_spill] sm:$0xff] }
 0xe84   :  { %v7120_v19 = vld [vmem:[#allocation28_spill] sm:$0xff] }
 0xe85   :  { %2719 = vst [vmem:[#allocation8 + $0x10] sm:$0xff] %v2715_v51  ;;  %2785 = vmatmul.mubr.f32.vlgmr.msra.gmra.mrb[32].mxu0 %v2715_v51  ;;  %2856 = vmatmul.mubr.f32.vlgmr.msra.gmra.mrb[26].mxu1 %v2715_v51  ;;  %v7119_v51 = vld [vmem:[#allocation25_spill] sm:$0xff] }
 0xe86   :  { %5008 = vmatpush3.bf16.msra.mxu0 %v6378_v33  ;;  %3741 = vmatprep.mubr.msk.f32.mxu0 %vm5657_vm0, %v7036_v39 }
 0xe87   :  { %5009 = vmatprep.subr.bf16.mxu0 %v7060_v40  ;;  %5033 = vmatpush1.bf16.msra.mxu1 %v6152_v9 }
 0xe88   :  { %5035 = vmatprep.subr.bf16.mxu1 %v6156_v20 }
 0xe8a   :  { %5011 = vmatpush3.bf16.msra.mxu0 %v6384_v18 }
 0xe8b   :  { %5012 = vmatprep.subr.bf16.mxu0 %v7060_v40  ;;  %5037 = vmatpush1.bf16.msra.mxu1 %v6161_v36 }
 0xe8c   :  { %5039 = vmatprep.subr.bf16.mxu1 %v6167_v59 }
 0xe8e   :  { %5014 = vmatpush3.bf16.msra.mxu0 %v6388_v45 }
 0xe8f   :  { %5015 = vmatprep.subr.bf16.mxu0 %v7060_v40  ;;  %5041 = vmatpush1.bf16.msra.mxu1 %v7103_v34 }
 0xe90   :  { %5043 = vmatprep.subr.bf16.mxu1 %v7104_v2 }
 0xe92   :  { %5017 = vmatpush3.bf16.msra.mxu0 %v7105_v7 }
 0xe93   :  { %5018 = vmatprep.subr.bf16.mxu0 %v7060_v40  ;;  %5045 = vmatpush1.bf16.msra.mxu1 %v7106_v63 }
 0xe94   :  { %5047 = vmatprep.subr.bf16.mxu1 %v7107_v53 }
 0xe96   :  { %5020 = vmatpush3.bf16.msra.mxu0 %v7108_v35 }
 0xe97   :  { %5021 = vmatprep.subr.bf16.mxu0 %v7060_v40  ;;  %5049 = vmatpush1.bf16.msra.mxu1 %v7109_v11 }
 0xe98   :  { %5051 = vmatprep.subr.bf16.mxu1 %v7110_v24  ;;  %v7125_v24 = vld [vmem:[#allocation37_spill] sm:$0xff] }
 0xe9a   :  { %5023 = vmatpush3.bf16.msra.mxu0 %v7111_v32  ;;  %v7121_v32 = vld [vmem:[#allocation29_spill] sm:$0xff] }
 0xe9b   :  { %5024 = vmatprep.subr.bf16.mxu0 %v7060_v40  ;;  %5053 = vmatpush1.bf16.msra.mxu1 %v7112_v46  ;;  %v7122_v46 = vld [vmem:[#allocation32_spill] sm:$0xff] }
 0xe9c   :  { %5055 = vmatprep.subr.bf16.mxu1 %v7113_v12  ;;  %v7123_v12 = vld [vmem:[#allocation33_spill] sm:$0xff] }
 0xe9e   :  { %5026 = vmatpush3.bf16.msra.mxu0 %v7114_v28  ;;  %v7124_v28 = vld [vmem:[#allocation36_spill] sm:$0xff] }
 0xe9f   :  { %5027 = vmatprep.subr.bf16.mxu0 %v7060_v40  ;;  %5057 = vmatpush1.bf16.msra.mxu1 %v7115_v47  ;;  %v7126_v47 = vld [vmem:[#allocation40_spill] sm:$0xff] }
 0xea0   :  { %5059 = vmatprep.subr.bf16.mxu1 %v7116_v14  ;;  %v7127_v14 = vld [vmem:[#allocation41_spill] sm:$0xff] }
 0xea2   :  { %5029 = vmatpush3.bf16.msra.mxu0 %v7117_v8  ;;  %v7128_v8 = vld [vmem:[#allocation44_spill] sm:$0xff] }
 0xea3   :  { %5095 = vmatprep.subr.bf16.mxu0 %v7118_v38  ;;  %5061 = vmatpush1.bf16.msra.mxu1 %v7119_v51  ;;  %v7129_v38 = vld [vmem:[#allocation45_spill] sm:$0xff]  ;;  %v7130_v51 = vld [vmem:[#allocation48_spill] sm:$0xff] }
 0xea4   :  { %5063 = vmatprep.subr.bf16.mxu1 %v7120_v19  ;;  %v7131_v19 = vld [vmem:[#allocation49_spill] sm:$0xff] }
 0xea7   :  { %5065 = vmatpush1.bf16.msra.mxu1 %v7121_v32  ;;  %v7132_v32 = vld [vmem:[#allocation52_spill] sm:$0xff] }
 0xea8   :  { %5067 = vmatprep.subr.bf16.mxu1 %v7122_v46  ;;  %v7133_v46 = vld [vmem:[#allocation53_spill] sm:$0xff] }
 0xeab   :  { %5069 = vmatpush1.bf16.msra.mxu1 %v7123_v12  ;;  %v7134_v12 = vld [vmem:[#allocation56_spill] sm:$0xff] }
 0xeac   :  { %5071 = vmatprep.subr.bf16.mxu1 %v7124_v28  ;;  %v7135_v28 = vld [vmem:[#allocation57_spill] sm:$0xff] }
 0xeaf   :  { %5073 = vmatpush1.bf16.msra.mxu1 %v7125_v24  ;;  %v7136_v24 = vld [vmem:[#allocation67_spill] sm:$0xff] }
 0xeb0   :  { %5075 = vmatprep.subr.bf16.mxu1 %v7126_v47 }
 0xeb3   :  { %5077 = vmatpush1.bf16.msra.mxu1 %v7127_v14 }
 0xeb4   :  { %5079 = vmatprep.subr.bf16.mxu1 %v7128_v8 }
 0xeb7   :  { %5081 = vmatpush1.bf16.msra.mxu1 %v7129_v38 }
 0xeb8   :  { %5083 = vmatprep.subr.bf16.mxu1 %v7130_v51 }
 0xebb   :  { %5085 = vmatpush1.bf16.msra.mxu1 %v7131_v19 }
 0xebc   :  { %5087 = vmatprep.subr.bf16.mxu1 %v7132_v32 }
 0xebf   :  { %5089 = vmatpush1.bf16.msra.mxu1 %v7133_v46 }
 0xec0   :  { %5091 = vmatprep.subr.bf16.mxu1 %v7134_v12 }
 0xec3   :  { %5093 = vmatpush1.bf16.msra.mxu1 %v7135_v28 }
 0xec4   :  { %5158 = vmatprep.subr.bf16.mxu1 %v7060_v40 }
 0xf58   :  { %v2786_v47 = vpop.f32.mrb[32].mxu0  ;;  %v2857_v14 = vpop.f32.mrb[26].mxu1 }
 0xf59   :  { %v2787_v8 = vadd.f32 %v2786_v47, %v7136_v24  ;;  %v2788_v11 = vpop.f32.mrb[33].mxu0  ;;  %v2859_v38 = vpop.f32.mrb[27].mxu1  ;;  %v2858_v32 = vadd.f32 %v2857_v14, %v6418_v55 }
 0xf5a   :  { %v2789_v51 = vadd.f32 %v2788_v11, %v6416_v16  ;;  %v2860_v12 = vadd.f32 %v2859_v38, %v6423_v29 }
 0xf5b   :  { %v2862_v35 = vmul.f32 0.5, %v2787_v8 }
 0xf5c   :  { %v2866_v19 = vmul.f32 0.5, %v2789_v51  ;;  %v2871_v28 = vmul.f32 0.5, %v2860_v12  ;;  %v7148_v51 = vld [vmem:[#allocation65_spill] sm:$0xff] }
 0xf5d   :  { %5519 = vtanh.f32 %v2862_v35 }
 0xf5e   :  { %5521 = vtanh.f32 %v2866_v19  ;;  %v7149_v19 = vld [vmem:[#allocation22_spill] sm:$0xff] }
 0xf5f   :  { %5523 = vtanh.f32 %v2858_v32 }
 0xf60   :  { %5525 = vtanh.f32 %v2871_v28  ;;  %v7147_v28 = vld [vmem:[#allocation21_spill] sm:$0xff] }
 0xf67   :  { %v5520_v46 = vpop.eup %5519 }
 0xf68   :  { %v5522_v53 = vpop.eup %5521  ;;  %v2864_v63 = vmul.f32 0.5, %v5520_v46  ;;  %v7146_v46 = vld [vmem:[#allocation20_spill] sm:$0xff] }
 0xf69   :  { %v2868_v7 = vmul.f32 0.5, %v5522_v53  ;;  %v5524_v24 = vpop.eup %5523  ;;  %v7142_v53 = vld [vmem:[#allocation63_spill] sm:$0xff] }
 0xf6a   :  { %v2865_v47 = vadd.f32 0.5, %v2864_v63  ;;  %v5526_v35 = vpop.eup %5525  ;;  %v7139_v63 = vld [vmem:[#allocation62_spill] sm:$0xff] }
 0xf6b   :  { %v2869_v2 = vadd.f32 0.5, %v2868_v7  ;;  %v2873_v32 = vmul.f32 0.5, %v5526_v35  ;;  %v7138_v7 = vld [vmem:[#allocation15_spill] sm:$0xff]  ;;  %v7152_v35 = vld [vmem:[#allocation13_spill] sm:$0xff] }
 0xf6c   :  { %v2876_v34 = vmul.f32 %v5524_v24, %v2865_v47  ;;  %v7145_v24 = vld [vmem:[#allocation64_spill] sm:$0xff] }
 0xf6d   :  { %v2875_v11 = vmul.f32 %v2869_v2, %v6611_v22  ;;  %v2874_v14 = vadd.f32 0.5, %v2873_v32  ;;  %v7150_v47 = vld [vmem:[#allocation24_spill] sm:$0xff]  ;;  %v7153_v32 = vld [vmem:[#allocation25_spill] sm:$0xff] }
 0xf6f   :  { %v6702_v8 = vadd.f32 %v2876_v34, %v2875_v11  ;;  %v7151_v11 = vld [vmem:[#allocation66_spill] sm:$0xff] }
 0xf71   :  { %5527 = vtanh.f32 %v6702_v8 }
 0xf7b   :  { %v5528_v38 = vpop.eup %5527 }
 0xf7c   :  { %v2879_v12 = vmul.f32 %v5528_v38, %v2874_v14  ;;  %v7154_v14 = vld [vmem:[#allocation28_spill] sm:$0xff]  ;;  %v7155_v38 = vld [vmem:[#allocation29_spill] sm:$0xff] }
 0xf7e   :  { %3742 = vmatmul.mubr.f32.vlgmr.msra.gmra.mrb[34].mxu0 %v2879_v12  ;;  %3016 = vmatprep.mubr.f32.mxu1 %v2879_v12 }
 0xf7f   :  { %3087 = vmatprep.mubr.f32.mxu0 %v2879_v12  ;;  %5097 = vmatpush1.bf16.msra.mxu0 %v6154_v17  ;;  %v7156_v12 = vld [vmem:[#allocation32_spill] sm:$0xff] }
 0xf80   :  { %5099 = vmatprep.subr.bf16.mxu0 %v6158_v21 }
 0xf83   :  { %5101 = vmatpush1.bf16.msra.mxu0 %v6164_v41 }
 0xf84   :  { %5103 = vmatprep.subr.bf16.mxu0 %v6170_v61 }
 0xf87   :  { %5105 = vmatpush1.bf16.msra.mxu0 %v6176_v50 }
 0xf88   :  { %5107 = vmatprep.subr.bf16.mxu0 %v6182_v58 }
 0xf8b   :  { %5109 = vmatpush1.bf16.msra.mxu0 %v6188_v27 }
 0xf8c   :  { %5111 = vmatprep.subr.bf16.mxu0 %v6194_v42 }
 0xf8f   :  { %5113 = vmatpush1.bf16.msra.mxu0 %v6200_v62 }
 0xf90   :  { %5115 = vmatprep.subr.bf16.mxu0 %v6217_v25 }
 0xf93   :  { %5117 = vmatpush1.bf16.msra.mxu0 %v7038_v1 }
 0xf94   :  { %5119 = vmatprep.subr.bf16.mxu0 %v7039_v56 }
 0xf97   :  { %5121 = vmatpush1.bf16.msra.mxu0 %v7040_v6 }
 0xf98   :  { %5123 = vmatprep.subr.bf16.mxu0 %v7041_v26 }
 0xf9b   :  { %5125 = vmatpush1.bf16.msra.mxu0 %v7042_v5 }
 0xf9c   :  { %5127 = vmatprep.subr.bf16.mxu0 %v7069_v30 }
 0xf9f   :  { %5129 = vmatpush1.bf16.msra.mxu0 %v7070_v3 }
 0xfa0   :  { %5131 = vmatprep.subr.bf16.mxu0 %v7071_v60 }
 0xfa3   :  { %5133 = vmatpush1.bf16.msra.mxu0 %v7072_v13 }
 0xfa4   :  { %5135 = vmatprep.subr.bf16.mxu0 %v7073_v44 }
 0xfa7   :  { %5137 = vmatpush1.bf16.msra.mxu0 %v7074_v10 }
 0xfa8   :  { %5139 = vmatprep.subr.bf16.mxu0 %v7075_v23 }
 0xfab   :  { %5141 = vmatpush1.bf16.msra.mxu0 %v7076_v15 }
 0xfac   :  { %5143 = vmatprep.subr.bf16.mxu0 %v7077_v49 }
 0xfaf   :  { %5145 = vmatpush1.bf16.msra.mxu0 %v7078_v0 }
 0xfb0   :  { %5147 = vmatprep.subr.bf16.mxu0 %v7053_v54 }
 0xfb3   :  { %5149 = vmatpush1.bf16.msra.mxu0 %v7054_v37 }
 0xfb4   :  { %5151 = vmatprep.subr.bf16.mxu0 %v7055_v57 }
 0xfb7   :  { %5153 = vmatpush1.bf16.msra.mxu0 %v7079_v52 }
 0xfb8   :  { %5155 = vmatprep.subr.bf16.mxu0 %v7057_v48 }
 0xfbb   :  { %5157 = vmatpush1.bf16.msra.mxu0 %v7058_v31 }
 0xfbc   :  { %5183 = vmatprep.subr.bf16.mxu0 %v7059_v4  ;;  %v7137_v4 = vld [vmem:[#allocation14_spill] sm:$0xff] }
0x1051   :  { %v2946_v22 = vpop.f32.mrb[34].mxu0 }
0x1052   :  { %v2947_v34 = vadd.f32 %v2946_v22, %v6462_v43  ;;  %v3743_v2 = vpop.f32.mrb[35].mxu0  ;;  %v7157_v22 = vld [vmem:[#allocation33_spill] sm:$0xff] }
0x1053   :  { %v7159_v2 = vld [vmem:[#allocation37_spill] sm:$0xff] }
0x1054   :  { %2951 = vst [vmem:[#allocation8 + $0x18] sm:$0xff] %v2947_v34  ;;  %3017 = vmatmul.mubr.f32.vlgmr.msra.gmra.mrb[28].mxu1 %v2947_v34  ;;  %3088 = vmatmul.mubr.f32.vlgmr.msra.gmra.mrb[36].mxu0 %v2947_v34  ;;  %v7158_v34 = vld [vmem:[#allocation36_spill] sm:$0xff] }
0x1055   :  { %5160 = vmatpush3.bf16.msra.mxu1 %v6378_v33  ;;  %3776 = vmatprep.mubr.msk.f32.mxu1 %vm5657_vm0, %v7036_v39 }
0x1056   :  { %5161 = vmatprep.subr.bf16.mxu1 %v7060_v40  ;;  %5185 = vmatpush1.bf16.msra.mxu0 %v6152_v9  ;;  %v7140_v9 = vld [vmem:[#allocation16_spill] sm:$0xff] }
0x1057   :  { %5187 = vmatprep.subr.bf16.mxu0 %v6156_v20  ;;  %v7141_v20 = vld [vmem:[#allocation17_spill] sm:$0xff] }
0x1059   :  { %5163 = vmatpush3.bf16.msra.mxu1 %v6384_v18 }
0x105a   :  { %5164 = vmatprep.subr.bf16.mxu1 %v7060_v40  ;;  %5189 = vmatpush1.bf16.msra.mxu0 %v6161_v36  ;;  %v7143_v36 = vld [vmem:[#allocation18_spill] sm:$0xff] }
0x105b   :  { %5191 = vmatprep.subr.bf16.mxu0 %v6167_v59  ;;  %v7144_v59 = vld [vmem:[#allocation19_spill] sm:$0xff] }
0x105d   :  { %5166 = vmatpush3.bf16.msra.mxu1 %v6388_v45 }
0x105e   :  { %5167 = vmatprep.subr.bf16.mxu1 %v7060_v40  ;;  %5193 = vmatpush1.bf16.msra.mxu0 %v7137_v4  ;;  %v7160_v4 = vld [vmem:[#allocation40_spill] sm:$0xff] }
0x105f   :  { %5195 = vmatprep.subr.bf16.mxu0 %v7138_v7  ;;  %v7161_v7 = vld [vmem:[#allocation41_spill] sm:$0xff] }
0x1061   :  { %5169 = vmatpush3.bf16.msra.mxu1 %v7139_v63 }
0x1062   :  { %5170 = vmatprep.subr.bf16.mxu1 %v7060_v40  ;;  %5197 = vmatpush1.bf16.msra.mxu0 %v7140_v9  ;;  %v7162_v9 = vld [vmem:[#allocation44_spill] sm:$0xff] }
0x1063   :  { %5199 = vmatprep.subr.bf16.mxu0 %v7141_v20  ;;  %v7163_v20 = vld [vmem:[#allocation45_spill] sm:$0xff] }
0x1065   :  { %5172 = vmatpush3.bf16.msra.mxu1 %v7142_v53 }
0x1066   :  { %5173 = vmatprep.subr.bf16.mxu1 %v7060_v40  ;;  %5201 = vmatpush1.bf16.msra.mxu0 %v7143_v36  ;;  %v7164_v36 = vld [vmem:[#allocation48_spill] sm:$0xff] }
0x1067   :  { %5203 = vmatprep.subr.bf16.mxu0 %v7144_v59  ;;  %v7165_v59 = vld [vmem:[#allocation49_spill] sm:$0xff] }
0x1069   :  { %5175 = vmatpush3.bf16.msra.mxu1 %v7145_v24 }
0x106a   :  { %5176 = vmatprep.subr.bf16.mxu1 %v7060_v40  ;;  %5205 = vmatpush1.bf16.msra.mxu0 %v7146_v46  ;;  %v7166_v46 = vld [vmem:[#allocation52_spill] sm:$0xff] }
0x106b   :  { %5207 = vmatprep.subr.bf16.mxu0 %v7147_v28  ;;  %v7167_v28 = vld [vmem:[#allocation53_spill] sm:$0xff] }
0x106d   :  { %5178 = vmatpush3.bf16.msra.mxu1 %v7148_v51 }
0x106e   :  { %5179 = vmatprep.subr.bf16.mxu1 %v7060_v40  ;;  %5209 = vmatpush1.bf16.msra.mxu0 %v7149_v19  ;;  %v7168_v19 = vld [vmem:[#allocation56_spill] sm:$0xff] }
0x106f   :  { %5211 = vmatprep.subr.bf16.mxu0 %v7150_v47  ;;  %v7169_v47 = vld [vmem:[#allocation57_spill] sm:$0xff] }
0x1071   :  { %5181 = vmatpush3.bf16.msra.mxu1 %v7151_v11 }
0x1072   :  { %5247 = vmatprep.subr.bf16.mxu1 %v7152_v35  ;;  %5213 = vmatpush1.bf16.msra.mxu0 %v7153_v32 }
0x1073   :  { %5215 = vmatprep.subr.bf16.mxu0 %v7154_v14  ;;  %v7170_v14 = vld [vmem:[#allocation67_spill] sm:$0xff] }
0x1076   :  { %5217 = vmatpush1.bf16.msra.mxu0 %v7155_v38 }
0x1077   :  { %5219 = vmatprep.subr.bf16.mxu0 %v7156_v12 }
0x107a   :  { %5221 = vmatpush1.bf16.msra.mxu0 %v7157_v22 }
0x107b   :  { %5223 = vmatprep.subr.bf16.mxu0 %v7158_v34 }
0x107e   :  { %5225 = vmatpush1.bf16.msra.mxu0 %v7159_v2 }
0x107f   :  { %5227 = vmatprep.subr.bf16.mxu0 %v7160_v4 }
0x1082   :  { %5229 = vmatpush1.bf16.msra.mxu0 %v7161_v7 }
0x1083   :  { %5231 = vmatprep.subr.bf16.mxu0 %v7162_v9 }
0x1086   :  { %5233 = vmatpush1.bf16.msra.mxu0 %v7163_v20 }
0x1087   :  { %5235 = vmatprep.subr.bf16.mxu0 %v7164_v36 }
0x108a   :  { %5237 = vmatpush1.bf16.msra.mxu0 %v7165_v59 }
0x108b   :  { %5239 = vmatprep.subr.bf16.mxu0 %v7166_v46 }
0x108e   :  { %5241 = vmatpush1.bf16.msra.mxu0 %v7167_v28 }
0x108f   :  { %5243 = vmatprep.subr.bf16.mxu0 %v7168_v19 }
0x1092   :  { %5245 = vmatpush1.bf16.msra.mxu0 %v7169_v47 }
0x1093   :  { %5310 = vmatprep.subr.bf16.mxu0 %v7060_v40 }
0x1127   :  { %v3018_v35 = vpop.f32.mrb[28].mxu1  ;;  %v3089_v32 = vpop.f32.mrb[36].mxu0 }
0x1128   :  { %v3019_v38 = vadd.f32 %v3018_v35, %v7170_v14  ;;  %v3020_v12 = vpop.f32.mrb[29].mxu1  ;;  %v3091_v22 = vpop.f32.mrb[37].mxu0  ;;  %v3090_v7 = vadd.f32 %v3089_v32, %v6418_v55 }
0x1129   :  { %v3021_v34 = vadd.f32 %v3020_v12, %v6416_v16  ;;  %v3092_v9 = vadd.f32 %v3091_v22, %v6423_v29 }
0x112a   :  { %v3094_v2 = vmul.f32 0.5, %v3019_v38 }
0x112b   :  { %v3098_v4 = vmul.f32 0.5, %v3021_v34  ;;  %v3103_v20 = vmul.f32 0.5, %v3092_v9 }
0x112c   :  { %5529 = vtanh.f32 %v3094_v2 }
0x112d   :  { %5531 = vtanh.f32 %v3098_v4 }
0x112e   :  { %5533 = vtanh.f32 %v3090_v7 }
0x112f   :  { %5535 = vtanh.f32 %v3103_v20 }
0x1136   :  { %v5530_v36 = vpop.eup %5529 }
0x1137   :  { %v5532_v59 = vpop.eup %5531  ;;  %v3096_v46 = vmul.f32 0.5, %v5530_v36 }
0x1138   :  { %v3100_v28 = vmul.f32 0.5, %v5532_v59  ;;  %v5534_v47 = vpop.eup %5533 }
0x1139   :  { %v3097_v19 = vadd.f32 0.5, %v3096_v46  ;;  %v5536_v55 = vpop.eup %5535 }
0x113a   :  { %v3101_v35 = vadd.f32 0.5, %v3100_v28  ;;  %v3105_v32 = vmul.f32 0.5, %v5536_v55 }
0x113b   :  { %v3108_v14 = vmul.f32 %v5534_v47, %v3097_v19 }
0x113c   :  { %v3107_v16 = vmul.f32 %v3101_v35, %v6702_v8  ;;  %v3106_v12 = vadd.f32 0.5, %v3105_v32 }
0x113e   :  { %v6793_v38 = vadd.f32 %v3108_v14, %v3107_v16 }
0x1140   :  { %5537 = vtanh.f32 %v6793_v38 }
0x114a   :  { %v5538_v29 = vpop.eup %5537 }
0x114b   :  { %v3111_v22 = vmul.f32 %v5538_v29, %v3106_v12 }
0x114d   :  { %3777 = vmatmul.mubr.f32.vlgmr.msra.gmra.mrb[30].mxu1 %v3111_v22  ;;  %3248 = vmatprep.mubr.f32.mxu0 %v3111_v22 }
0x114e   :  { %3319 = vmatprep.mubr.f32.mxu1 %v3111_v22  ;;  %5249 = vmatpush1.bf16.msra.mxu1 %v6154_v17 }
0x114f   :  { %5251 = vmatprep.subr.bf16.mxu1 %v6158_v21 }
0x1152   :  { %5253 = vmatpush1.bf16.msra.mxu1 %v6164_v41 }
0x1153   :  { %5255 = vmatprep.subr.bf16.mxu1 %v6170_v61 }
0x1156   :  { %5257 = vmatpush1.bf16.msra.mxu1 %v6176_v50 }
0x1157   :  { %5259 = vmatprep.subr.bf16.mxu1 %v6182_v58  ;;  %v5549_v58 = vld [vmem:[#allocation5 + $0x820] sm:$0xff] }
0x115a   :  { %5261 = vmatpush1.bf16.msra.mxu1 %v6188_v27 }
0x115b   :  { %5263 = vmatprep.subr.bf16.mxu1 %v6194_v42 }
0x115e   :  { %5265 = vmatpush1.bf16.msra.mxu1 %v6200_v62 }
0x115f   :  { %5267 = vmatprep.subr.bf16.mxu1 %v6217_v25  ;;  %v5550_v25 = vld [vmem:[#allocation5 + $0x828] sm:$0xff] }
0x1162   :  { %5269 = vmatpush1.bf16.msra.mxu1 %v7038_v1 }
0x1163   :  { %5271 = vmatprep.subr.bf16.mxu1 %v7039_v56  ;;  %v5552_v56 = vld [vmem:[#allocation5 + $0x838] sm:$0xff] }
0x1166   :  { %5273 = vmatpush1.bf16.msra.mxu1 %v7040_v6 }
0x1167   :  { %5275 = vmatprep.subr.bf16.mxu1 %v7041_v26 }
0x116a   :  { %5277 = vmatpush1.bf16.msra.mxu1 %v7042_v5 }
0x116b   :  { %5279 = vmatprep.subr.bf16.mxu1 %v7069_v30 }
0x116e   :  { %5281 = vmatpush1.bf16.msra.mxu1 %v7070_v3 }
0x116f   :  { %5283 = vmatprep.subr.bf16.mxu1 %v7071_v60 }
0x1172   :  { %5285 = vmatpush1.bf16.msra.mxu1 %v7072_v13 }
0x1173   :  { %5287 = vmatprep.subr.bf16.mxu1 %v7073_v44 }
0x1176   :  { %5289 = vmatpush1.bf16.msra.mxu1 %v7074_v10 }
0x1177   :  { %5291 = vmatprep.subr.bf16.mxu1 %v7075_v23 }
0x117a   :  { %5293 = vmatpush1.bf16.msra.mxu1 %v7076_v15 }
0x117b   :  { %5295 = vmatprep.subr.bf16.mxu1 %v7077_v49  ;;  %v5553_v49 = vld [vmem:[#allocation7 + $0x100] sm:$0xff] }
0x117e   :  { %5297 = vmatpush1.bf16.msra.mxu1 %v7078_v0 }
0x117f   :  { %5299 = vmatprep.subr.bf16.mxu1 %v7053_v54 }
0x1182   :  { %5301 = vmatpush1.bf16.msra.mxu1 %v7054_v37 }
0x1183   :  { %5303 = vmatprep.subr.bf16.mxu1 %v7055_v57 }
0x1186   :  { %5305 = vmatpush1.bf16.msra.mxu1 %v7079_v52 }
0x1187   :  { %5307 = vmatprep.subr.bf16.mxu1 %v7057_v48 }
0x118a   :  { %5309 = vmatpush1.bf16.msra.mxu1 %v7058_v31 }
0x1220   :  { %v3178_v17 = vpop.f32.mrb[30].mxu1 }
0x1221   :  { %v3179_v21 = vadd.f32 %v3178_v17, %v6462_v43  ;;  %v3778_v41 = vpop.f32.mrb[31].mxu1 }
0x1223   :  { %3183 = vst [vmem:[#allocation8 + $0x20] sm:$0xff] %v3179_v21  ;;  %3249 = vmatmul.mubr.f32.vlgmr.msra.gmra.mrb[38].mxu0 %v3179_v21  ;;  %3320 = vmatmul.mubr.f32.vlgmr.msra.gmra.mrb[32].mxu1 %v3179_v21 }
0x1224   :  { %5312 = vmatpush3.bf16.msra.mxu0 %v6378_v33  ;;  %3811 = vmatprep.mubr.msk.f32.mxu0 %vm5657_vm0, %v7036_v39  ;;  %v5551_v39 = vld [vmem:[#allocation5 + $0x830] sm:$0xff] }
0x1225   :  { %5313 = vmatprep.subr.bf16.mxu0 %v7060_v40 }
0x1228   :  { %5315 = vmatpush3.bf16.msra.mxu0 %v6384_v18 }
0x1229   :  { %5316 = vmatprep.subr.bf16.mxu0 %v7060_v40 }
0x122c   :  { %5318 = vmatpush3.bf16.msra.mxu0 %v6388_v45 }
0x122d   :  { %5319 = vmatprep.subr.bf16.mxu0 %v7060_v40 }
0x1230   :  { %5321 = vmatpush3.bf16.msra.mxu0 %v7139_v63 }
0x1231   :  { %5322 = vmatprep.subr.bf16.mxu0 %v7060_v40 }
0x1234   :  { %5324 = vmatpush3.bf16.msra.mxu0 %v7142_v53 }
0x1235   :  { %5325 = vmatprep.subr.bf16.mxu0 %v7060_v40 }
0x1238   :  { %5327 = vmatpush3.bf16.msra.mxu0 %v7145_v24 }
0x1239   :  { %5328 = vmatprep.subr.bf16.mxu0 %v7060_v40 }
0x123c   :  { %5330 = vmatpush3.bf16.msra.mxu0 %v7148_v51 }
0x123d   :  { %5331 = vmatprep.subr.bf16.mxu0 %v7060_v40 }
0x1240   :  { %5333 = vmatpush3.bf16.msra.mxu0 %v7151_v11 }
0x12f6   :  { %v3250_v61 = vpop.f32.mrb[38].mxu0  ;;  %v3321_v50 = vpop.f32.mrb[32].mxu1 }
0x12f7   :  { %v3251_v27 = vadd.f32 %v5549_v58, %v3250_v61  ;;  %v3252_v42 = vpop.f32.mrb[39].mxu0  ;;  %v3323_v62 = vpop.f32.mrb[33].mxu1  ;;  %v3322_v1 = vadd.f32 %v5551_v39, %v3321_v50 }
0x12f8   :  { %v3253_v33 = vadd.f32 %v5550_v25, %v3252_v42  ;;  %v3324_v6 = vadd.f32 %v5552_v56, %v3323_v62 }
0x12f9   :  { %v3326_v18 = vmul.f32 0.5, %v3251_v27 }
0x12fa   :  { %v3330_v45 = vmul.f32 0.5, %v3253_v33  ;;  %v3335_v26 = vmul.f32 0.5, %v3324_v6 }
0x12fb   :  { %5539 = vtanh.f32 %v3326_v18 }
0x12fc   :  { %5541 = vtanh.f32 %v3330_v45 }
0x12fd   :  { %5543 = vtanh.f32 %v3322_v1 }
0x12fe   :  { %5545 = vtanh.f32 %v3335_v26 }
0x1305   :  { %v5540_v5 = vpop.eup %5539 }
0x1306   :  { %v5542_v37 = vpop.eup %5541  ;;  %v3328_v57 = vmul.f32 0.5, %v5540_v5 }
0x1307   :  { %v3332_v40 = vmul.f32 0.5, %v5542_v37  ;;  %v5544_v31 = vpop.eup %5543 }
0x1308   :  { %v3329_v48 = vadd.f32 0.5, %v3328_v57  ;;  %v5546_v60 = vpop.eup %5545 }
0x1309   :  { %v3333_v43 = vadd.f32 0.5, %v3332_v40  ;;  %v3337_v13 = vmul.f32 0.5, %v5546_v60 }
0x130a   :  { %v3340_v54 = vmul.f32 %v5544_v31, %v3329_v48 }
0x130b   :  { %v3339_v30 = vmul.f32 %v3333_v43, %v6793_v38  ;;  %v3338_v44 = vadd.f32 0.5, %v3337_v13 }
0x130d   :  { %v3341_v3 = vadd.f32 %v3340_v54, %v3339_v30 }
0x130f   :  { %5547 = vtanh.f32 %v3341_v3 }
0x1319   :  { %v5548_v10 = vpop.eup %5547 }
0x131a   :  { %v3343_v23 = vmul.f32 %v5548_v10, %v3338_v44 }
0x131c   :  { %3812 = vmatmul.mubr.f32.vlgmr.msra.gmra.mrb[40].mxu0 %v3343_v23 }
0x13ef   :  { %v3410_v15 = vpop.f32.mrb[40].mxu0 }
0x13f0   :  { %v3411_v0 = vadd.f32 %v5553_v49, %v3410_v15  ;;  %v3813_v52 = vpop.f32.mrb[41].mxu0 }
0x13f2   :  { %3415 = vst [vmem:[#allocation8 + $0x28] sm:$0xff] %v3411_v0 }
0x13f3   :  { %5631 = shalt.err (!%p5628_p0)
}
0x13f4   :  { %s5632_s27 = scalar_lea.hbm %s6864_s3, 768 }
0x13f5   :  { %p5633_p1 = scmp.ne.s32.totalorder %s6864_s3, %s5632_s27  ;;  %p5636_p2 = scmp.lt.u32.totalorder %s5632_s27, %s6864_s3 }
0x13f7   :  { %p5638_p3 = pnand %p5636_p2, %p5633_p1 }
0x13f9   :  { %5641 = shalt.err (!%p5638_p3)
}
0x13fa   :  { %3427 = dma.vmem_to_hbm [thread:$0]  %s3422_s23, 768, %s6864_s3, [#allocation4], %s5652_s1, %s5652_s1, %s5653_s9  }
0x13fb   :  { %5646 = dma.done.wait [#allocation4], 768  }
0x13fc   :  { %5647 = vsyncadd [#allocation4], 4294966528 }
0x13fd   :  { %3431 = vsyncpa [#allocation3], 1 }
0x13fe   :  { %3432 = vsyncpa [#allocation6], 1 }
0x13ff   :  { %3433 = vsyncpa [#allocation4], 1 }

</bundles_post_ra>
